<compile_context>
chip_gen: v7x
topology: tpu7x:2x2x1
jax: 0.10.0
libtpu: 0.0.40
codegen_flags: <defaults>
</compile_context>

<pallas_src>
import functools

import jax
import jax.numpy as jnp
from jax import lax
from jax.experimental import pallas as pl
from jax.experimental.pallas import tpu as pltpu


def _bitonic_sort_last(v, n):
    """Ascending bitonic sort of v (shape (R, n)) along the last axis; n power of 2.

    Masks are computed in-kernel from a single (1, n) lane iota (no captured array
    constants).  The compare/exchange network is fully unrolled at trace time; each
    stage is 2 XLU rolls + ~4 VPU ops per carried vreg plus a few (1, n) integer ops.
    """
    lane = lax.broadcasted_iota(jnp.int32, (1, n), 1)
    k = 2
    while k <= n:  # static Python loops -> fully unrolled network
        j = k // 2
        while j >= 1:
            low_m = (lane & j) == 0                 # partner sits at i + j
            asc_m = (lane & k) == 0                 # ascending sub-block
            take_min_m = jnp.logical_not(jnp.logical_xor(asc_m, low_m))

            v_plus = pltpu.roll(v, n - j, axis=1)   # v[(i + j) mod n]
            v_minus = pltpu.roll(v, j, axis=1)      # v[(i - j) mod n]
            pv = jnp.where(low_m, v_plus, v_minus)
            v = jnp.where(take_min_m, jnp.minimum(v, pv), jnp.maximum(v, pv))
            j //= 2
        k *= 2
    return v


def _gswd_kernel(theta_bd_ref, xy_ref, out_ref, *, loss_type, block_l, n):
    # theta_bd block: (2*block_l, 2D) = [theta_b, 0; 0, theta_b]
    # xy:             (N, 2D)        = concat([x, y], axis=1)
    # One dot_general gives both projections fused as (2*block_l, N):
    #   rows [0, block_l)          = theta_b @ x.T
    #   rows [block_l, 2*block_l)  = theta_b @ y.T
    dn = (((1,), (1,)), ((), ()))                   # contract the 2D axis, no transposes
    # HIGHEST keeps the f32 path so the kernel matches the f32 reference within 1e-4;
    # switch to DEFAULT/bf16 operands if D or L grow and the tolerance allows.
    proj = lax.dot_general(theta_bd_ref[...], xy_ref[...], dimension_numbers=dn,
                           preferred_element_type=jnp.float32,
                           precision=lax.Precision.HIGHEST)

    proj_sorted = _bitonic_sort_last(proj, n)       # == torch.sort(..., dim=-2), transposed
    xs = proj_sorted[:block_l]                      # sublane-tile aligned slices (block_l % 8 == 0)
    ys = proj_sorted[block_l:]

    diff = xs - ys
    err = jnp.abs(diff) if loss_type == 'l1' else diff * diff

    # Per-block partial sums reduced to one (8, N) slab: pure VALU adds of aligned
    # 8-row slices.  Lane-dense, full-sublane output; final mean in the wrapper.
    partial = err[0:8]
    for g in range(1, block_l // 8):
        partial = partial + err[g * 8:(g + 1) * 8]
    out_ref[...] = partial[jnp.newaxis]


def _round_up(v, m):
    return (v + m - 1) // m * m


def _pick_block_l(l_padded, n, vmem_budget_bytes):
    """Largest multiple of 8 dividing l_padded, capped for regs/VMEM, preferring >=2 blocks."""
    # ~3 live copies of the (2*block_l, N) f32 sort state must fit the VMEM budget;
    # cap at 64 rows per side so the carried value stays <= 16 vregs at N=128.
    vmem_cap = max(8, (vmem_budget_bytes // (3 * 2 * n * 4)) // 8 * 8)
    cap = min(64, l_padded, vmem_cap)
    best = None
    for bl in range(cap, 7, -8):
        if l_padded % bl == 0:
            if l_padded // bl >= 2:      # >= 2 grid steps -> both TensorCores on v7x
                return bl
            if best is None:
                best = bl
    return best if best is not None else 8


def gswd(x, y, theta, loss_type='l1', vmem_budget_bytes=24 * 1024 * 1024):
    """Generalized (linear) sliced Wasserstein distance.

    x, y:  (N, D) float32 point clouds; N a power of two (N=128 keeps every roll an
           intra-vreg lane rotate).
    theta: (L, D) float32 unit-norm projection directions.
    """
    assert loss_type in ('l1', 'mse')
    n, d = x.shape
    assert y.shape == (n, d)
    assert n & (n - 1) == 0, "N must be a power of two for the bitonic sort"
    l = theta.shape[0]
    assert theta.shape == (l, d)
    # TODO(synk): N > 128 is correct but rolls become cross-vreg; a two-level
    # (in-vreg sort + cross-segment merge) network would be the faster design there.

    # Pad L to a multiple of 8 with zero rows: zero rows project both x and y to
    # all-zero rows whose sorted difference is 0, so the sum is unchanged.
    l_pad = _round_up(l, 8)
    if l_pad != l:
        theta = jnp.concatenate([theta, jnp.zeros((l_pad - l, d), theta.dtype)], axis=0)

    block_l = _pick_block_l(l_pad, n, vmem_budget_bytes)
    num_blocks = l_pad // block_l

    # Host-side (one-time) layout plumbing: xy (N, 2D) and a per-block block-diagonal
    # theta (num_blocks*2*block_l, 2D), so each grid step is a single MXU op and the
    # kernel never concatenates/copies projections in VMEM.
    xy = jnp.concatenate([x, y], axis=1)
    theta_blocks = theta.reshape(num_blocks, block_l, d)
    zeros = jnp.zeros_like(theta_blocks)
    theta_bd = jnp.concatenate(
        [jnp.concatenate([theta_blocks, zeros], axis=2),
         jnp.concatenate([zeros, theta_blocks], axis=2)],
        axis=1,
    ).reshape(num_blocks * 2 * block_l, 2 * d)

    kernel = functools.partial(_gswd_kernel, loss_type=loss_type, block_l=block_l, n=n)
    partials = pl.pallas_call(
        kernel,
        out_shape=jax.ShapeDtypeStruct((num_blocks, 8, n), jnp.float32),
        grid_spec=pltpu.PrefetchScalarGridSpec(
            num_scalar_prefetch=0,
            grid=(num_blocks,),
            in_specs=[
                pl.BlockSpec((2 * block_l, 2 * d), lambda i: (i, 0)),   # theta block-diag
                pl.BlockSpec((n, 2 * d), lambda i: (0, 0)),             # [x | y] (full)
            ],
            out_specs=pl.BlockSpec((1, 8, n), lambda i: (i, 0, 0)),
        ),
        compiler_params=pltpu.CompilerParams(
            dimension_semantics=("parallel",),
            vmem_limit_bytes=32 * 1024 * 1024,
        ),
    )(theta_bd, xy)

    return jnp.sum(partials) / jnp.float32(l * n)   # reduction='mean'


def gswd_ref(x, y, theta, loss_type='l1'):
    """Pure-JAX reference mirroring the PyTorch forward."""
    xp = jnp.dot(x, theta.T, precision=lax.Precision.HIGHEST)   # (N, L)
    yp = jnp.dot(y, theta.T, precision=lax.Precision.HIGHEST)
    xs = jnp.sort(xp, axis=-2)
    ys = jnp.sort(yp, axis=-2)
    dd = xs - ys
    return jnp.mean(jnp.abs(dd)) if loss_type == 'l1' else jnp.mean(dd * dd)


if __name__ == "__main__":
    key = jax.random.PRNGKey(0)
    kx, ky, kt = jax.random.split(key, 3)

    # Small shapes: N samples, D features, L slices (projection directions).
    N, D, L = 128, 32, 64
    x = jax.random.normal(kx, (N, D), dtype=jnp.float32)
    y = jax.random.normal(ky, (N, D), dtype=jnp.float32) + 0.5

    # Deterministic projector parameters (what projector.reset() would sample).
    # TODO(synk): projector.reset() resamples theta each forward in PyTorch; here
    # theta is a deterministic explicit argument.
    theta = jax.random.normal(kt, (L, D), dtype=jnp.float32)
    theta = theta / jnp.linalg.norm(theta, axis=-1, keepdims=True)

    for lt in ('l1', 'mse'):
        out = jax.block_until_ready(gswd(x, y, theta, loss_type=lt))
        ref = gswd_ref(x, y, theta, loss_type=lt)
        assert jnp.allclose(out, ref, rtol=1e-4, atol=1e-5), (lt, out, ref)

    print("KERNEL_OK")
</pallas_src>

<mosaic_0001>
module attributes {stable_mosaic.version = 11 : i64} {
  func.func @_gswd_kernel(%arg0: i32, %arg1: memref<64x64xf32, #tpu.memory_space<vmem>>, %arg2: memref<128x64xf32, #tpu.memory_space<vmem>>, %arg3: memref<1x8x128xf32, #tpu.memory_space<vmem>>) attributes {dimension_semantics = [#tpu.dimension_semantics<parallel>], iteration_bounds = array<i64: 2>, scalar_prefetch = 0 : i64, scratch_operands = 0 : i64, tpu.core_type = #tpu.core_type<tc>, window_params = [{transform_indices = @transform_0, window_bounds = array<i64: 64, 64>}, {pipeline_mode = #tpu.pipeline_mode<synchronous>, transform_indices = @transform_1, window_bounds = array<i64: 128, 64>}, {transform_indices = @transform_2, window_bounds = array<i64: 1, 8, 128>}]} {
    %c0 = arith.constant 0 : index
    %c0_0 = arith.constant 0 : index
    %0 = vector.load %arg1[%c0, %c0_0] : memref<64x64xf32, #tpu.memory_space<vmem>>, vector<64x64xf32>
    %c0_1 = arith.constant 0 : index
    %c0_2 = arith.constant 0 : index
    %1 = vector.load %arg2[%c0_1, %c0_2] : memref<128x64xf32, #tpu.memory_space<vmem>>, vector<128x64xf32>
    %cst = arith.constant dense<0.000000e+00> : vector<64x128xf32>
    %2 = tpu.matmul %0, %1, %cst {dimension_numbers = #tpu.dot_dimension_numbers<[1], [1], [0], [0], [0, 0, 1, 0], [], []>, precision = #tpu.contract_precision<fp32>} : vector<64x64xf32>, vector<128x64xf32>, vector<64x128xf32> -> vector<64x128xf32>
    %3 = tpu.iota {dimensions = array<i32: 1>} : vector<1x128xi32>
    %c1_i32 = arith.constant 1 : i32
    %4 = vector.broadcast %c1_i32 : i32 to vector<1x128xi32>
    %5 = arith.andi %3, %4 : vector<1x128xi32>
    %c0_i32 = arith.constant 0 : i32
    %6 = vector.broadcast %c0_i32 : i32 to vector<1x128xi32>
    %7 = arith.cmpi eq, %5, %6 : vector<1x128xi32>
    %c2_i32 = arith.constant 2 : i32
    %8 = vector.broadcast %c2_i32 : i32 to vector<1x128xi32>
    %9 = arith.andi %3, %8 : vector<1x128xi32>
    %c0_i32_3 = arith.constant 0 : i32
    %10 = vector.broadcast %c0_i32_3 : i32 to vector<1x128xi32>
    %11 = arith.cmpi eq, %9, %10 : vector<1x128xi32>
    %12 = arith.xori %11, %7 : vector<1x128xi1>
    %cst_4 = arith.constant dense<true> : vector<1x128xi1>
    %13 = arith.xori %12, %cst_4 : vector<1x128xi1>
    %c127_i32 = arith.constant 127 : i32
    %14 = tpu.dynamic_rotate %2 by %c127_i32 dim 1 : vector<64x128xf32>, i32 -> vector<64x128xf32>
    %c1_i32_5 = arith.constant 1 : i32
    %15 = tpu.dynamic_rotate %2 by %c1_i32_5 dim 1 : vector<64x128xf32>, i32 -> vector<64x128xf32>
    %16 = vector.shape_cast %7 : vector<1x128xi1> to vector<1x128xi1>
    %17 = vector.broadcast %16 : vector<1x128xi1> to vector<64x128xi1>
    %18 = arith.select %17, %14, %15 : vector<64x128xi1>, vector<64x128xf32>
    %19 = arith.minimumf %2, %18 : vector<64x128xf32>
    %20 = arith.maximumf %2, %18 : vector<64x128xf32>
    %21 = vector.shape_cast %13 : vector<1x128xi1> to vector<1x128xi1>
    %22 = vector.broadcast %21 : vector<1x128xi1> to vector<64x128xi1>
    %23 = arith.select %22, %19, %20 : vector<64x128xi1>, vector<64x128xf32>
    %c2_i32_6 = arith.constant 2 : i32
    %24 = vector.broadcast %c2_i32_6 : i32 to vector<1x128xi32>
    %25 = arith.andi %3, %24 : vector<1x128xi32>
    %c0_i32_7 = arith.constant 0 : i32
    %26 = vector.broadcast %c0_i32_7 : i32 to vector<1x128xi32>
    %27 = arith.cmpi eq, %25, %26 : vector<1x128xi32>
    %c4_i32 = arith.constant 4 : i32
    %28 = vector.broadcast %c4_i32 : i32 to vector<1x128xi32>
    %29 = arith.andi %3, %28 : vector<1x128xi32>
    %c0_i32_8 = arith.constant 0 : i32
    %30 = vector.broadcast %c0_i32_8 : i32 to vector<1x128xi32>
    %31 = arith.cmpi eq, %29, %30 : vector<1x128xi32>
    %32 = arith.xori %31, %27 : vector<1x128xi1>
    %cst_9 = arith.constant dense<true> : vector<1x128xi1>
    %33 = arith.xori %32, %cst_9 : vector<1x128xi1>
    %c126_i32 = arith.constant 126 : i32
    %34 = tpu.dynamic_rotate %23 by %c126_i32 dim 1 : vector<64x128xf32>, i32 -> vector<64x128xf32>
    %c2_i32_10 = arith.constant 2 : i32
    %35 = tpu.dynamic_rotate %23 by %c2_i32_10 dim 1 : vector<64x128xf32>, i32 -> vector<64x128xf32>
    %36 = vector.shape_cast %27 : vector<1x128xi1> to vector<1x128xi1>
    %37 = vector.broadcast %36 : vector<1x128xi1> to vector<64x128xi1>
    %38 = arith.select %37, %34, %35 : vector<64x128xi1>, vector<64x128xf32>
    %39 = arith.minimumf %23, %38 : vector<64x128xf32>
    %40 = arith.maximumf %23, %38 : vector<64x128xf32>
    %41 = vector.shape_cast %33 : vector<1x128xi1> to vector<1x128xi1>
    %42 = vector.broadcast %41 : vector<1x128xi1> to vector<64x128xi1>
    %43 = arith.select %42, %39, %40 : vector<64x128xi1>, vector<64x128xf32>
    %c1_i32_11 = arith.constant 1 : i32
    %44 = vector.broadcast %c1_i32_11 : i32 to vector<1x128xi32>
    %45 = arith.andi %3, %44 : vector<1x128xi32>
    %c0_i32_12 = arith.constant 0 : i32
    %46 = vector.broadcast %c0_i32_12 : i32 to vector<1x128xi32>
    %47 = arith.cmpi eq, %45, %46 : vector<1x128xi32>
    %c4_i32_13 = arith.constant 4 : i32
    %48 = vector.broadcast %c4_i32_13 : i32 to vector<1x128xi32>
    %49 = arith.andi %3, %48 : vector<1x128xi32>
    %c0_i32_14 = arith.constant 0 : i32
    %50 = vector.broadcast %c0_i32_14 : i32 to vector<1x128xi32>
    %51 = arith.cmpi eq, %49, %50 : vector<1x128xi32>
    %52 = arith.xori %51, %47 : vector<1x128xi1>
    %cst_15 = arith.constant dense<true> : vector<1x128xi1>
    %53 = arith.xori %52, %cst_15 : vector<1x128xi1>
    %c127_i32_16 = arith.constant 127 : i32
    %54 = tpu.dynamic_rotate %43 by %c127_i32_16 dim 1 : vector<64x128xf32>, i32 -> vector<64x128xf32>
    %c1_i32_17 = arith.constant 1 : i32
    %55 = tpu.dynamic_rotate %43 by %c1_i32_17 dim 1 : vector<64x128xf32>, i32 -> vector<64x128xf32>
    %56 = vector.shape_cast %47 : vector<1x128xi1> to vector<1x128xi1>
    %57 = vector.broadcast %56 : vector<1x128xi1> to vector<64x128xi1>
    %58 = arith.select %57, %54, %55 : vector<64x128xi1>, vector<64x128xf32>
    %59 = arith.minimumf %43, %58 : vector<64x128xf32>
    %60 = arith.maximumf %43, %58 : vector<64x128xf32>
    %61 = vector.shape_cast %53 : vector<1x128xi1> to vector<1x128xi1>
    %62 = vector.broadcast %61 : vector<1x128xi1> to vector<64x128xi1>
    %63 = arith.select %62, %59, %60 : vector<64x128xi1>, vector<64x128xf32>
    %c4_i32_18 = arith.constant 4 : i32
    %64 = vector.broadcast %c4_i32_18 : i32 to vector<1x128xi32>
    %65 = arith.andi %3, %64 : vector<1x128xi32>
    %c0_i32_19 = arith.constant 0 : i32
    %66 = vector.broadcast %c0_i32_19 : i32 to vector<1x128xi32>
    %67 = arith.cmpi eq, %65, %66 : vector<1x128xi32>
    %c8_i32 = arith.constant 8 : i32
    %68 = vector.broadcast %c8_i32 : i32 to vector<1x128xi32>
    %69 = arith.andi %3, %68 : vector<1x128xi32>
    %c0_i32_20 = arith.constant 0 : i32
    %70 = vector.broadcast %c0_i32_20 : i32 to vector<1x128xi32>
    %71 = arith.cmpi eq, %69, %70 : vector<1x128xi32>
    %72 = arith.xori %71, %67 : vector<1x128xi1>
    %cst_21 = arith.constant dense<true> : vector<1x128xi1>
    %73 = arith.xori %72, %cst_21 : vector<1x128xi1>
    %c124_i32 = arith.constant 124 : i32
    %74 = tpu.dynamic_rotate %63 by %c124_i32 dim 1 : vector<64x128xf32>, i32 -> vector<64x128xf32>
    %c4_i32_22 = arith.constant 4 : i32
    %75 = tpu.dynamic_rotate %63 by %c4_i32_22 dim 1 : vector<64x128xf32>, i32 -> vector<64x128xf32>
    %76 = vector.shape_cast %67 : vector<1x128xi1> to vector<1x128xi1>
    %77 = vector.broadcast %76 : vector<1x128xi1> to vector<64x128xi1>
    %78 = arith.select %77, %74, %75 : vector<64x128xi1>, vector<64x128xf32>
    %79 = arith.minimumf %63, %78 : vector<64x128xf32>
    %80 = arith.maximumf %63, %78 : vector<64x128xf32>
    %81 = vector.shape_cast %73 : vector<1x128xi1> to vector<1x128xi1>
    %82 = vector.broadcast %81 : vector<1x128xi1> to vector<64x128xi1>
    %83 = arith.select %82, %79, %80 : vector<64x128xi1>, vector<64x128xf32>
    %c2_i32_23 = arith.constant 2 : i32
    %84 = vector.broadcast %c2_i32_23 : i32 to vector<1x128xi32>
    %85 = arith.andi %3, %84 : vector<1x128xi32>
    %c0_i32_24 = arith.constant 0 : i32
    %86 = vector.broadcast %c0_i32_24 : i32 to vector<1x128xi32>
    %87 = arith.cmpi eq, %85, %86 : vector<1x128xi32>
    %c8_i32_25 = arith.constant 8 : i32
    %88 = vector.broadcast %c8_i32_25 : i32 to vector<1x128xi32>
    %89 = arith.andi %3, %88 : vector<1x128xi32>
    %c0_i32_26 = arith.constant 0 : i32
    %90 = vector.broadcast %c0_i32_26 : i32 to vector<1x128xi32>
    %91 = arith.cmpi eq, %89, %90 : vector<1x128xi32>
    %92 = arith.xori %91, %87 : vector<1x128xi1>
    %cst_27 = arith.constant dense<true> : vector<1x128xi1>
    %93 = arith.xori %92, %cst_27 : vector<1x128xi1>
    %c126_i32_28 = arith.constant 126 : i32
    %94 = tpu.dynamic_rotate %83 by %c126_i32_28 dim 1 : vector<64x128xf32>, i32 -> vector<64x128xf32>
    %c2_i32_29 = arith.constant 2 : i32
    %95 = tpu.dynamic_rotate %83 by %c2_i32_29 dim 1 : vector<64x128xf32>, i32 -> vector<64x128xf32>
    %96 = vector.shape_cast %87 : vector<1x128xi1> to vector<1x128xi1>
    %97 = vector.broadcast %96 : vector<1x128xi1> to vector<64x128xi1>
    %98 = arith.select %97, %94, %95 : vector<64x128xi1>, vector<64x128xf32>
    %99 = arith.minimumf %83, %98 : vector<64x128xf32>
    %100 = arith.maximumf %83, %98 : vector<64x128xf32>
    %101 = vector.shape_cast %93 : vector<1x128xi1> to vector<1x128xi1>
    %102 = vector.broadcast %101 : vector<1x128xi1> to vector<64x128xi1>
    %103 = arith.select %102, %99, %100 : vector<64x128xi1>, vector<64x128xf32>
    %c1_i32_30 = arith.constant 1 : i32
    %104 = vector.broadcast %c1_i32_30 : i32 to vector<1x128xi32>
    %105 = arith.andi %3, %104 : vector<1x128xi32>
    %c0_i32_31 = arith.constant 0 : i32
    %106 = vector.broadcast %c0_i32_31 : i32 to vector<1x128xi32>
    %107 = arith.cmpi eq, %105, %106 : vector<1x128xi32>
    %c8_i32_32 = arith.constant 8 : i32
    %108 = vector.broadcast %c8_i32_32 : i32 to vector<1x128xi32>
    %109 = arith.andi %3, %108 : vector<1x128xi32>
    %c0_i32_33 = arith.constant 0 : i32
    %110 = vector.broadcast %c0_i32_33 : i32 to vector<1x128xi32>
    %111 = arith.cmpi eq, %109, %110 : vector<1x128xi32>
    %112 = arith.xori %111, %107 : vector<1x128xi1>
    %cst_34 = arith.constant dense<true> : vector<1x128xi1>
    %113 = arith.xori %112, %cst_34 : vector<1x128xi1>
    %c127_i32_35 = arith.constant 127 : i32
    %114 = tpu.dynamic_rotate %103 by %c127_i32_35 dim 1 : vector<64x128xf32>, i32 -> vector<64x128xf32>
    %c1_i32_36 = arith.constant 1 : i32
    %115 = tpu.dynamic_rotate %103 by %c1_i32_36 dim 1 : vector<64x128xf32>, i32 -> vector<64x128xf32>
    %116 = vector.shape_cast %107 : vector<1x128xi1> to vector<1x128xi1>
    %117 = vector.broadcast %116 : vector<1x128xi1> to vector<64x128xi1>
    %118 = arith.select %117, %114, %115 : vector<64x128xi1>, vector<64x128xf32>
    %119 = arith.minimumf %103, %118 : vector<64x128xf32>
    %120 = arith.maximumf %103, %118 : vector<64x128xf32>
    %121 = vector.shape_cast %113 : vector<1x128xi1> to vector<1x128xi1>
    %122 = vector.broadcast %121 : vector<1x128xi1> to vector<64x128xi1>
    %123 = arith.select %122, %119, %120 : vector<64x128xi1>, vector<64x128xf32>
    %c8_i32_37 = arith.constant 8 : i32
    %124 = vector.broadcast %c8_i32_37 : i32 to vector<1x128xi32>
    %125 = arith.andi %3, %124 : vector<1x128xi32>
    %c0_i32_38 = arith.constant 0 : i32
    %126 = vector.broadcast %c0_i32_38 : i32 to vector<1x128xi32>
    %127 = arith.cmpi eq, %125, %126 : vector<1x128xi32>
    %c16_i32 = arith.constant 16 : i32
    %128 = vector.broadcast %c16_i32 : i32 to vector<1x128xi32>
    %129 = arith.andi %3, %128 : vector<1x128xi32>
    %c0_i32_39 = arith.constant 0 : i32
    %130 = vector.broadcast %c0_i32_39 : i32 to vector<1x128xi32>
    %131 = arith.cmpi eq, %129, %130 : vector<1x128xi32>
    %132 = arith.xori %131, %127 : vector<1x128xi1>
    %cst_40 = arith.constant dense<true> : vector<1x128xi1>
    %133 = arith.xori %132, %cst_40 : vector<1x128xi1>
    %c120_i32 = arith.constant 120 : i32
    %134 = tpu.dynamic_rotate %123 by %c120_i32 dim 1 : vector<64x128xf32>, i32 -> vector<64x128xf32>
    %c8_i32_41 = arith.constant 8 : i32
    %135 = tpu.dynamic_rotate %123 by %c8_i32_41 dim 1 : vector<64x128xf32>, i32 -> vector<64x128xf32>
    %136 = vector.shape_cast %127 : vector<1x128xi1> to vector<1x128xi1>
    %137 = vector.broadcast %136 : vector<1x128xi1> to vector<64x128xi1>
    %138 = arith.select %137, %134, %135 : vector<64x128xi1>, vector<64x128xf32>
    %139 = arith.minimumf %123, %138 : vector<64x128xf32>
    %140 = arith.maximumf %123, %138 : vector<64x128xf32>
    %141 = vector.shape_cast %133 : vector<1x128xi1> to vector<1x128xi1>
    %142 = vector.broadcast %141 : vector<1x128xi1> to vector<64x128xi1>
    %143 = arith.select %142, %139, %140 : vector<64x128xi1>, vector<64x128xf32>
    %c4_i32_42 = arith.constant 4 : i32
    %144 = vector.broadcast %c4_i32_42 : i32 to vector<1x128xi32>
    %145 = arith.andi %3, %144 : vector<1x128xi32>
    %c0_i32_43 = arith.constant 0 : i32
    %146 = vector.broadcast %c0_i32_43 : i32 to vector<1x128xi32>
    %147 = arith.cmpi eq, %145, %146 : vector<1x128xi32>
    %c16_i32_44 = arith.constant 16 : i32
    %148 = vector.broadcast %c16_i32_44 : i32 to vector<1x128xi32>
    %149 = arith.andi %3, %148 : vector<1x128xi32>
    %c0_i32_45 = arith.constant 0 : i32
    %150 = vector.broadcast %c0_i32_45 : i32 to vector<1x128xi32>
    %151 = arith.cmpi eq, %149, %150 : vector<1x128xi32>
    %152 = arith.xori %151, %147 : vector<1x128xi1>
    %cst_46 = arith.constant dense<true> : vector<1x128xi1>
    %153 = arith.xori %152, %cst_46 : vector<1x128xi1>
    %c124_i32_47 = arith.constant 124 : i32
    %154 = tpu.dynamic_rotate %143 by %c124_i32_47 dim 1 : vector<64x128xf32>, i32 -> vector<64x128xf32>
    %c4_i32_48 = arith.constant 4 : i32
    %155 = tpu.dynamic_rotate %143 by %c4_i32_48 dim 1 : vector<64x128xf32>, i32 -> vector<64x128xf32>
    %156 = vector.shape_cast %147 : vector<1x128xi1> to vector<1x128xi1>
    %157 = vector.broadcast %156 : vector<1x128xi1> to vector<64x128xi1>
    %158 = arith.select %157, %154, %155 : vector<64x128xi1>, vector<64x128xf32>
    %159 = arith.minimumf %143, %158 : vector<64x128xf32>
    %160 = arith.maximumf %143, %158 : vector<64x128xf32>
    %161 = vector.shape_cast %153 : vector<1x128xi1> to vector<1x128xi1>
    %162 = vector.broadcast %161 : vector<1x128xi1> to vector<64x128xi1>
    %163 = arith.select %162, %159, %160 : vector<64x128xi1>, vector<64x128xf32>
    %c2_i32_49 = arith.constant 2 : i32
    %164 = vector.broadcast %c2_i32_49 : i32 to vector<1x128xi32>
    %165 = arith.andi %3, %164 : vector<1x128xi32>
    %c0_i32_50 = arith.constant 0 : i32
    %166 = vector.broadcast %c0_i32_50 : i32 to vector<1x128xi32>
    %167 = arith.cmpi eq, %165, %166 : vector<1x128xi32>
    %c16_i32_51 = arith.constant 16 : i32
    %168 = vector.broadcast %c16_i32_51 : i32 to vector<1x128xi32>
    %169 = arith.andi %3, %168 : vector<1x128xi32>
    %c0_i32_52 = arith.constant 0 : i32
    %170 = vector.broadcast %c0_i32_52 : i32 to vector<1x128xi32>
    %171 = arith.cmpi eq, %169, %170 : vector<1x128xi32>
    %172 = arith.xori %171, %167 : vector<1x128xi1>
    %cst_53 = arith.constant dense<true> : vector<1x128xi1>
    %173 = arith.xori %172, %cst_53 : vector<1x128xi1>
    %c126_i32_54 = arith.constant 126 : i32
    %174 = tpu.dynamic_rotate %163 by %c126_i32_54 dim 1 : vector<64x128xf32>, i32 -> vector<64x128xf32>
    %c2_i32_55 = arith.constant 2 : i32
    %175 = tpu.dynamic_rotate %163 by %c2_i32_55 dim 1 : vector<64x128xf32>, i32 -> vector<64x128xf32>
    %176 = vector.shape_cast %167 : vector<1x128xi1> to vector<1x128xi1>
    %177 = vector.broadcast %176 : vector<1x128xi1> to vector<64x128xi1>
    %178 = arith.select %177, %174, %175 : vector<64x128xi1>, vector<64x128xf32>
    %179 = arith.minimumf %163, %178 : vector<64x128xf32>
    %180 = arith.maximumf %163, %178 : vector<64x128xf32>
    %181 = vector.shape_cast %173 : vector<1x128xi1> to vector<1x128xi1>
    %182 = vector.broadcast %181 : vector<1x128xi1> to vector<64x128xi1>
    %183 = arith.select %182, %179, %180 : vector<64x128xi1>, vector<64x128xf32>
    %c1_i32_56 = arith.constant 1 : i32
    %184 = vector.broadcast %c1_i32_56 : i32 to vector<1x128xi32>
    %185 = arith.andi %3, %184 : vector<1x128xi32>
    %c0_i32_57 = arith.constant 0 : i32
    %186 = vector.broadcast %c0_i32_57 : i32 to vector<1x128xi32>
    %187 = arith.cmpi eq, %185, %186 : vector<1x128xi32>
    %c16_i32_58 = arith.constant 16 : i32
    %188 = vector.broadcast %c16_i32_58 : i32 to vector<1x128xi32>
    %189 = arith.andi %3, %188 : vector<1x128xi32>
    %c0_i32_59 = arith.constant 0 : i32
    %190 = vector.broadcast %c0_i32_59 : i32 to vector<1x128xi32>
    %191 = arith.cmpi eq, %189, %190 : vector<1x128xi32>
    %192 = arith.xori %191, %187 : vector<1x128xi1>
    %cst_60 = arith.constant dense<true> : vector<1x128xi1>
    %193 = arith.xori %192, %cst_60 : vector<1x128xi1>
    %c127_i32_61 = arith.constant 127 : i32
    %194 = tpu.dynamic_rotate %183 by %c127_i32_61 dim 1 : vector<64x128xf32>, i32 -> vector<64x128xf32>
    %c1_i32_62 = arith.constant 1 : i32
    %195 = tpu.dynamic_rotate %183 by %c1_i32_62 dim 1 : vector<64x128xf32>, i32 -> vector<64x128xf32>
    %196 = vector.shape_cast %187 : vector<1x128xi1> to vector<1x128xi1>
    %197 = vector.broadcast %196 : vector<1x128xi1> to vector<64x128xi1>
    %198 = arith.select %197, %194, %195 : vector<64x128xi1>, vector<64x128xf32>
    %199 = arith.minimumf %183, %198 : vector<64x128xf32>
    %200 = arith.maximumf %183, %198 : vector<64x128xf32>
    %201 = vector.shape_cast %193 : vector<1x128xi1> to vector<1x128xi1>
    %202 = vector.broadcast %201 : vector<1x128xi1> to vector<64x128xi1>
    %203 = arith.select %202, %199, %200 : vector<64x128xi1>, vector<64x128xf32>
    %c16_i32_63 = arith.constant 16 : i32
    %204 = vector.broadcast %c16_i32_63 : i32 to vector<1x128xi32>
    %205 = arith.andi %3, %204 : vector<1x128xi32>
    %c0_i32_64 = arith.constant 0 : i32
    %206 = vector.broadcast %c0_i32_64 : i32 to vector<1x128xi32>
    %207 = arith.cmpi eq, %205, %206 : vector<1x128xi32>
    %c32_i32 = arith.constant 32 : i32
    %208 = vector.broadcast %c32_i32 : i32 to vector<1x128xi32>
    %209 = arith.andi %3, %208 : vector<1x128xi32>
    %c0_i32_65 = arith.constant 0 : i32
    %210 = vector.broadcast %c0_i32_65 : i32 to vector<1x128xi32>
    %211 = arith.cmpi eq, %209, %210 : vector<1x128xi32>
    %212 = arith.xori %211, %207 : vector<1x128xi1>
    %cst_66 = arith.constant dense<true> : vector<1x128xi1>
    %213 = arith.xori %212, %cst_66 : vector<1x128xi1>
    %c112_i32 = arith.constant 112 : i32
    %214 = tpu.dynamic_rotate %203 by %c112_i32 dim 1 : vector<64x128xf32>, i32 -> vector<64x128xf32>
    %c16_i32_67 = arith.constant 16 : i32
    %215 = tpu.dynamic_rotate %203 by %c16_i32_67 dim 1 : vector<64x128xf32>, i32 -> vector<64x128xf32>
    %216 = vector.shape_cast %207 : vector<1x128xi1> to vector<1x128xi1>
    %217 = vector.broadcast %216 : vector<1x128xi1> to vector<64x128xi1>
    %218 = arith.select %217, %214, %215 : vector<64x128xi1>, vector<64x128xf32>
    %219 = arith.minimumf %203, %218 : vector<64x128xf32>
    %220 = arith.maximumf %203, %218 : vector<64x128xf32>
    %221 = vector.shape_cast %213 : vector<1x128xi1> to vector<1x128xi1>
    %222 = vector.broadcast %221 : vector<1x128xi1> to vector<64x128xi1>
    %223 = arith.select %222, %219, %220 : vector<64x128xi1>, vector<64x128xf32>
    %c8_i32_68 = arith.constant 8 : i32
    %224 = vector.broadcast %c8_i32_68 : i32 to vector<1x128xi32>
    %225 = arith.andi %3, %224 : vector<1x128xi32>
    %c0_i32_69 = arith.constant 0 : i32
    %226 = vector.broadcast %c0_i32_69 : i32 to vector<1x128xi32>
    %227 = arith.cmpi eq, %225, %226 : vector<1x128xi32>
    %c32_i32_70 = arith.constant 32 : i32
    %228 = vector.broadcast %c32_i32_70 : i32 to vector<1x128xi32>
    %229 = arith.andi %3, %228 : vector<1x128xi32>
    %c0_i32_71 = arith.constant 0 : i32
    %230 = vector.broadcast %c0_i32_71 : i32 to vector<1x128xi32>
    %231 = arith.cmpi eq, %229, %230 : vector<1x128xi32>
    %232 = arith.xori %231, %227 : vector<1x128xi1>
    %cst_72 = arith.constant dense<true> : vector<1x128xi1>
    %233 = arith.xori %232, %cst_72 : vector<1x128xi1>
    %c120_i32_73 = arith.constant 120 : i32
    %234 = tpu.dynamic_rotate %223 by %c120_i32_73 dim 1 : vector<64x128xf32>, i32 -> vector<64x128xf32>
    %c8_i32_74 = arith.constant 8 : i32
    %235 = tpu.dynamic_rotate %223 by %c8_i32_74 dim 1 : vector<64x128xf32>, i32 -> vector<64x128xf32>
    %236 = vector.shape_cast %227 : vector<1x128xi1> to vector<1x128xi1>
    %237 = vector.broadcast %236 : vector<1x128xi1> to vector<64x128xi1>
    %238 = arith.select %237, %234, %235 : vector<64x128xi1>, vector<64x128xf32>
    %239 = arith.minimumf %223, %238 : vector<64x128xf32>
    %240 = arith.maximumf %223, %238 : vector<64x128xf32>
    %241 = vector.shape_cast %233 : vector<1x128xi1> to vector<1x128xi1>
    %242 = vector.broadcast %241 : vector<1x128xi1> to vector<64x128xi1>
    %243 = arith.select %242, %239, %240 : vector<64x128xi1>, vector<64x128xf32>
    %c4_i32_75 = arith.constant 4 : i32
    %244 = vector.broadcast %c4_i32_75 : i32 to vector<1x128xi32>
    %245 = arith.andi %3, %244 : vector<1x128xi32>
    %c0_i32_76 = arith.constant 0 : i32
    %246 = vector.broadcast %c0_i32_76 : i32 to vector<1x128xi32>
    %247 = arith.cmpi eq, %245, %246 : vector<1x128xi32>
    %c32_i32_77 = arith.constant 32 : i32
    %248 = vector.broadcast %c32_i32_77 : i32 to vector<1x128xi32>
    %249 = arith.andi %3, %248 : vector<1x128xi32>
    %c0_i32_78 = arith.constant 0 : i32
    %250 = vector.broadcast %c0_i32_78 : i32 to vector<1x128xi32>
    %251 = arith.cmpi eq, %249, %250 : vector<1x128xi32>
    %252 = arith.xori %251, %247 : vector<1x128xi1>
    %cst_79 = arith.constant dense<true> : vector<1x128xi1>
    %253 = arith.xori %252, %cst_79 : vector<1x128xi1>
    %c124_i32_80 = arith.constant 124 : i32
    %254 = tpu.dynamic_rotate %243 by %c124_i32_80 dim 1 : vector<64x128xf32>, i32 -> vector<64x128xf32>
    %c4_i32_81 = arith.constant 4 : i32
    %255 = tpu.dynamic_rotate %243 by %c4_i32_81 dim 1 : vector<64x128xf32>, i32 -> vector<64x128xf32>
    %256 = vector.shape_cast %247 : vector<1x128xi1> to vector<1x128xi1>
    %257 = vector.broadcast %256 : vector<1x128xi1> to vector<64x128xi1>
    %258 = arith.select %257, %254, %255 : vector<64x128xi1>, vector<64x128xf32>
    %259 = arith.minimumf %243, %258 : vector<64x128xf32>
    %260 = arith.maximumf %243, %258 : vector<64x128xf32>
    %261 = vector.shape_cast %253 : vector<1x128xi1> to vector<1x128xi1>
    %262 = vector.broadcast %261 : vector<1x128xi1> to vector<64x128xi1>
    %263 = arith.select %262, %259, %260 : vector<64x128xi1>, vector<64x128xf32>
    %c2_i32_82 = arith.constant 2 : i32
    %264 = vector.broadcast %c2_i32_82 : i32 to vector<1x128xi32>
    %265 = arith.andi %3, %264 : vector<1x128xi32>
    %c0_i32_83 = arith.constant 0 : i32
    %266 = vector.broadcast %c0_i32_83 : i32 to vector<1x128xi32>
    %267 = arith.cmpi eq, %265, %266 : vector<1x128xi32>
    %c32_i32_84 = arith.constant 32 : i32
    %268 = vector.broadcast %c32_i32_84 : i32 to vector<1x128xi32>
    %269 = arith.andi %3, %268 : vector<1x128xi32>
    %c0_i32_85 = arith.constant 0 : i32
    %270 = vector.broadcast %c0_i32_85 : i32 to vector<1x128xi32>
    %271 = arith.cmpi eq, %269, %270 : vector<1x128xi32>
    %272 = arith.xori %271, %267 : vector<1x128xi1>
    %cst_86 = arith.constant dense<true> : vector<1x128xi1>
    %273 = arith.xori %272, %cst_86 : vector<1x128xi1>
    %c126_i32_87 = arith.constant 126 : i32
    %274 = tpu.dynamic_rotate %263 by %c126_i32_87 dim 1 : vector<64x128xf32>, i32 -> vector<64x128xf32>
    %c2_i32_88 = arith.constant 2 : i32
    %275 = tpu.dynamic_rotate %263 by %c2_i32_88 dim 1 : vector<64x128xf32>, i32 -> vector<64x128xf32>
    %276 = vector.shape_cast %267 : vector<1x128xi1> to vector<1x128xi1>
    %277 = vector.broadcast %276 : vector<1x128xi1> to vector<64x128xi1>
    %278 = arith.select %277, %274, %275 : vector<64x128xi1>, vector<64x128xf32>
    %279 = arith.minimumf %263, %278 : vector<64x128xf32>
    %280 = arith.maximumf %263, %278 : vector<64x128xf32>
    %281 = vector.shape_cast %273 : vector<1x128xi1> to vector<1x128xi1>
    %282 = vector.broadcast %281 : vector<1x128xi1> to vector<64x128xi1>
    %283 = arith.select %282, %279, %280 : vector<64x128xi1>, vector<64x128xf32>
    %c1_i32_89 = arith.constant 1 : i32
    %284 = vector.broadcast %c1_i32_89 : i32 to vector<1x128xi32>
    %285 = arith.andi %3, %284 : vector<1x128xi32>
    %c0_i32_90 = arith.constant 0 : i32
    %286 = vector.broadcast %c0_i32_90 : i32 to vector<1x128xi32>
    %287 = arith.cmpi eq, %285, %286 : vector<1x128xi32>
    %c32_i32_91 = arith.constant 32 : i32
    %288 = vector.broadcast %c32_i32_91 : i32 to vector<1x128xi32>
    %289 = arith.andi %3, %288 : vector<1x128xi32>
    %c0_i32_92 = arith.constant 0 : i32
    %290 = vector.broadcast %c0_i32_92 : i32 to vector<1x128xi32>
    %291 = arith.cmpi eq, %289, %290 : vector<1x128xi32>
    %292 = arith.xori %291, %287 : vector<1x128xi1>
    %cst_93 = arith.constant dense<true> : vector<1x128xi1>
    %293 = arith.xori %292, %cst_93 : vector<1x128xi1>
    %c127_i32_94 = arith.constant 127 : i32
    %294 = tpu.dynamic_rotate %283 by %c127_i32_94 dim 1 : vector<64x128xf32>, i32 -> vector<64x128xf32>
    %c1_i32_95 = arith.constant 1 : i32
    %295 = tpu.dynamic_rotate %283 by %c1_i32_95 dim 1 : vector<64x128xf32>, i32 -> vector<64x128xf32>
    %296 = vector.shape_cast %287 : vector<1x128xi1> to vector<1x128xi1>
    %297 = vector.broadcast %296 : vector<1x128xi1> to vector<64x128xi1>
    %298 = arith.select %297, %294, %295 : vector<64x128xi1>, vector<64x128xf32>
    %299 = arith.minimumf %283, %298 : vector<64x128xf32>
    %300 = arith.maximumf %283, %298 : vector<64x128xf32>
    %301 = vector.shape_cast %293 : vector<1x128xi1> to vector<1x128xi1>
    %302 = vector.broadcast %301 : vector<1x128xi1> to vector<64x128xi1>
    %303 = arith.select %302, %299, %300 : vector<64x128xi1>, vector<64x128xf32>
    %c32_i32_96 = arith.constant 32 : i32
    %304 = vector.broadcast %c32_i32_96 : i32 to vector<1x128xi32>
    %305 = arith.andi %3, %304 : vector<1x128xi32>
    %c0_i32_97 = arith.constant 0 : i32
    %306 = vector.broadcast %c0_i32_97 : i32 to vector<1x128xi32>
    %307 = arith.cmpi eq, %305, %306 : vector<1x128xi32>
    %c64_i32 = arith.constant 64 : i32
    %308 = vector.broadcast %c64_i32 : i32 to vector<1x128xi32>
    %309 = arith.andi %3, %308 : vector<1x128xi32>
    %c0_i32_98 = arith.constant 0 : i32
    %310 = vector.broadcast %c0_i32_98 : i32 to vector<1x128xi32>
    %311 = arith.cmpi eq, %309, %310 : vector<1x128xi32>
    %312 = arith.xori %311, %307 : vector<1x128xi1>
    %cst_99 = arith.constant dense<true> : vector<1x128xi1>
    %313 = arith.xori %312, %cst_99 : vector<1x128xi1>
    %c96_i32 = arith.constant 96 : i32
    %314 = tpu.dynamic_rotate %303 by %c96_i32 dim 1 : vector<64x128xf32>, i32 -> vector<64x128xf32>
    %c32_i32_100 = arith.constant 32 : i32
    %315 = tpu.dynamic_rotate %303 by %c32_i32_100 dim 1 : vector<64x128xf32>, i32 -> vector<64x128xf32>
    %316 = vector.shape_cast %307 : vector<1x128xi1> to vector<1x128xi1>
    %317 = vector.broadcast %316 : vector<1x128xi1> to vector<64x128xi1>
    %318 = arith.select %317, %314, %315 : vector<64x128xi1>, vector<64x128xf32>
    %319 = arith.minimumf %303, %318 : vector<64x128xf32>
    %320 = arith.maximumf %303, %318 : vector<64x128xf32>
    %321 = vector.shape_cast %313 : vector<1x128xi1> to vector<1x128xi1>
    %322 = vector.broadcast %321 : vector<1x128xi1> to vector<64x128xi1>
    %323 = arith.select %322, %319, %320 : vector<64x128xi1>, vector<64x128xf32>
    %c16_i32_101 = arith.constant 16 : i32
    %324 = vector.broadcast %c16_i32_101 : i32 to vector<1x128xi32>
    %325 = arith.andi %3, %324 : vector<1x128xi32>
    %c0_i32_102 = arith.constant 0 : i32
    %326 = vector.broadcast %c0_i32_102 : i32 to vector<1x128xi32>
    %327 = arith.cmpi eq, %325, %326 : vector<1x128xi32>
    %c64_i32_103 = arith.constant 64 : i32
    %328 = vector.broadcast %c64_i32_103 : i32 to vector<1x128xi32>
    %329 = arith.andi %3, %328 : vector<1x128xi32>
    %c0_i32_104 = arith.constant 0 : i32
    %330 = vector.broadcast %c0_i32_104 : i32 to vector<1x128xi32>
    %331 = arith.cmpi eq, %329, %330 : vector<1x128xi32>
    %332 = arith.xori %331, %327 : vector<1x128xi1>
    %cst_105 = arith.constant dense<true> : vector<1x128xi1>
    %333 = arith.xori %332, %cst_105 : vector<1x128xi1>
    %c112_i32_106 = arith.constant 112 : i32
    %334 = tpu.dynamic_rotate %323 by %c112_i32_106 dim 1 : vector<64x128xf32>, i32 -> vector<64x128xf32>
    %c16_i32_107 = arith.constant 16 : i32
    %335 = tpu.dynamic_rotate %323 by %c16_i32_107 dim 1 : vector<64x128xf32>, i32 -> vector<64x128xf32>
    %336 = vector.shape_cast %327 : vector<1x128xi1> to vector<1x128xi1>
    %337 = vector.broadcast %336 : vector<1x128xi1> to vector<64x128xi1>
    %338 = arith.select %337, %334, %335 : vector<64x128xi1>, vector<64x128xf32>
    %339 = arith.minimumf %323, %338 : vector<64x128xf32>
    %340 = arith.maximumf %323, %338 : vector<64x128xf32>
    %341 = vector.shape_cast %333 : vector<1x128xi1> to vector<1x128xi1>
    %342 = vector.broadcast %341 : vector<1x128xi1> to vector<64x128xi1>
    %343 = arith.select %342, %339, %340 : vector<64x128xi1>, vector<64x128xf32>
    %c8_i32_108 = arith.constant 8 : i32
    %344 = vector.broadcast %c8_i32_108 : i32 to vector<1x128xi32>
    %345 = arith.andi %3, %344 : vector<1x128xi32>
    %c0_i32_109 = arith.constant 0 : i32
    %346 = vector.broadcast %c0_i32_109 : i32 to vector<1x128xi32>
    %347 = arith.cmpi eq, %345, %346 : vector<1x128xi32>
    %c64_i32_110 = arith.constant 64 : i32
    %348 = vector.broadcast %c64_i32_110 : i32 to vector<1x128xi32>
    %349 = arith.andi %3, %348 : vector<1x128xi32>
    %c0_i32_111 = arith.constant 0 : i32
    %350 = vector.broadcast %c0_i32_111 : i32 to vector<1x128xi32>
    %351 = arith.cmpi eq, %349, %350 : vector<1x128xi32>
    %352 = arith.xori %351, %347 : vector<1x128xi1>
    %cst_112 = arith.constant dense<true> : vector<1x128xi1>
    %353 = arith.xori %352, %cst_112 : vector<1x128xi1>
    %c120_i32_113 = arith.constant 120 : i32
    %354 = tpu.dynamic_rotate %343 by %c120_i32_113 dim 1 : vector<64x128xf32>, i32 -> vector<64x128xf32>
    %c8_i32_114 = arith.constant 8 : i32
    %355 = tpu.dynamic_rotate %343 by %c8_i32_114 dim 1 : vector<64x128xf32>, i32 -> vector<64x128xf32>
    %356 = vector.shape_cast %347 : vector<1x128xi1> to vector<1x128xi1>
    %357 = vector.broadcast %356 : vector<1x128xi1> to vector<64x128xi1>
    %358 = arith.select %357, %354, %355 : vector<64x128xi1>, vector<64x128xf32>
    %359 = arith.minimumf %343, %358 : vector<64x128xf32>
    %360 = arith.maximumf %343, %358 : vector<64x128xf32>
    %361 = vector.shape_cast %353 : vector<1x128xi1> to vector<1x128xi1>
    %362 = vector.broadcast %361 : vector<1x128xi1> to vector<64x128xi1>
    %363 = arith.select %362, %359, %360 : vector<64x128xi1>, vector<64x128xf32>
    %c4_i32_115 = arith.constant 4 : i32
    %364 = vector.broadcast %c4_i32_115 : i32 to vector<1x128xi32>
    %365 = arith.andi %3, %364 : vector<1x128xi32>
    %c0_i32_116 = arith.constant 0 : i32
    %366 = vector.broadcast %c0_i32_116 : i32 to vector<1x128xi32>
    %367 = arith.cmpi eq, %365, %366 : vector<1x128xi32>
    %c64_i32_117 = arith.constant 64 : i32
    %368 = vector.broadcast %c64_i32_117 : i32 to vector<1x128xi32>
    %369 = arith.andi %3, %368 : vector<1x128xi32>
    %c0_i32_118 = arith.constant 0 : i32
    %370 = vector.broadcast %c0_i32_118 : i32 to vector<1x128xi32>
    %371 = arith.cmpi eq, %369, %370 : vector<1x128xi32>
    %372 = arith.xori %371, %367 : vector<1x128xi1>
    %cst_119 = arith.constant dense<true> : vector<1x128xi1>
    %373 = arith.xori %372, %cst_119 : vector<1x128xi1>
    %c124_i32_120 = arith.constant 124 : i32
    %374 = tpu.dynamic_rotate %363 by %c124_i32_120 dim 1 : vector<64x128xf32>, i32 -> vector<64x128xf32>
    %c4_i32_121 = arith.constant 4 : i32
    %375 = tpu.dynamic_rotate %363 by %c4_i32_121 dim 1 : vector<64x128xf32>, i32 -> vector<64x128xf32>
    %376 = vector.shape_cast %367 : vector<1x128xi1> to vector<1x128xi1>
    %377 = vector.broadcast %376 : vector<1x128xi1> to vector<64x128xi1>
    %378 = arith.select %377, %374, %375 : vector<64x128xi1>, vector<64x128xf32>
    %379 = arith.minimumf %363, %378 : vector<64x128xf32>
    %380 = arith.maximumf %363, %378 : vector<64x128xf32>
    %381 = vector.shape_cast %373 : vector<1x128xi1> to vector<1x128xi1>
    %382 = vector.broadcast %381 : vector<1x128xi1> to vector<64x128xi1>
    %383 = arith.select %382, %379, %380 : vector<64x128xi1>, vector<64x128xf32>
    %c2_i32_122 = arith.constant 2 : i32
    %384 = vector.broadcast %c2_i32_122 : i32 to vector<1x128xi32>
    %385 = arith.andi %3, %384 : vector<1x128xi32>
    %c0_i32_123 = arith.constant 0 : i32
    %386 = vector.broadcast %c0_i32_123 : i32 to vector<1x128xi32>
    %387 = arith.cmpi eq, %385, %386 : vector<1x128xi32>
    %c64_i32_124 = arith.constant 64 : i32
    %388 = vector.broadcast %c64_i32_124 : i32 to vector<1x128xi32>
    %389 = arith.andi %3, %388 : vector<1x128xi32>
    %c0_i32_125 = arith.constant 0 : i32
    %390 = vector.broadcast %c0_i32_125 : i32 to vector<1x128xi32>
    %391 = arith.cmpi eq, %389, %390 : vector<1x128xi32>
    %392 = arith.xori %391, %387 : vector<1x128xi1>
    %cst_126 = arith.constant dense<true> : vector<1x128xi1>
    %393 = arith.xori %392, %cst_126 : vector<1x128xi1>
    %c126_i32_127 = arith.constant 126 : i32
    %394 = tpu.dynamic_rotate %383 by %c126_i32_127 dim 1 : vector<64x128xf32>, i32 -> vector<64x128xf32>
    %c2_i32_128 = arith.constant 2 : i32
    %395 = tpu.dynamic_rotate %383 by %c2_i32_128 dim 1 : vector<64x128xf32>, i32 -> vector<64x128xf32>
    %396 = vector.shape_cast %387 : vector<1x128xi1> to vector<1x128xi1>
    %397 = vector.broadcast %396 : vector<1x128xi1> to vector<64x128xi1>
    %398 = arith.select %397, %394, %395 : vector<64x128xi1>, vector<64x128xf32>
    %399 = arith.minimumf %383, %398 : vector<64x128xf32>
    %400 = arith.maximumf %383, %398 : vector<64x128xf32>
    %401 = vector.shape_cast %393 : vector<1x128xi1> to vector<1x128xi1>
    %402 = vector.broadcast %401 : vector<1x128xi1> to vector<64x128xi1>
    %403 = arith.select %402, %399, %400 : vector<64x128xi1>, vector<64x128xf32>
    %c1_i32_129 = arith.constant 1 : i32
    %404 = vector.broadcast %c1_i32_129 : i32 to vector<1x128xi32>
    %405 = arith.andi %3, %404 : vector<1x128xi32>
    %c0_i32_130 = arith.constant 0 : i32
    %406 = vector.broadcast %c0_i32_130 : i32 to vector<1x128xi32>
    %407 = arith.cmpi eq, %405, %406 : vector<1x128xi32>
    %c64_i32_131 = arith.constant 64 : i32
    %408 = vector.broadcast %c64_i32_131 : i32 to vector<1x128xi32>
    %409 = arith.andi %3, %408 : vector<1x128xi32>
    %c0_i32_132 = arith.constant 0 : i32
    %410 = vector.broadcast %c0_i32_132 : i32 to vector<1x128xi32>
    %411 = arith.cmpi eq, %409, %410 : vector<1x128xi32>
    %412 = arith.xori %411, %407 : vector<1x128xi1>
    %cst_133 = arith.constant dense<true> : vector<1x128xi1>
    %413 = arith.xori %412, %cst_133 : vector<1x128xi1>
    %c127_i32_134 = arith.constant 127 : i32
    %414 = tpu.dynamic_rotate %403 by %c127_i32_134 dim 1 : vector<64x128xf32>, i32 -> vector<64x128xf32>
    %c1_i32_135 = arith.constant 1 : i32
    %415 = tpu.dynamic_rotate %403 by %c1_i32_135 dim 1 : vector<64x128xf32>, i32 -> vector<64x128xf32>
    %416 = vector.shape_cast %407 : vector<1x128xi1> to vector<1x128xi1>
    %417 = vector.broadcast %416 : vector<1x128xi1> to vector<64x128xi1>
    %418 = arith.select %417, %414, %415 : vector<64x128xi1>, vector<64x128xf32>
    %419 = arith.minimumf %403, %418 : vector<64x128xf32>
    %420 = arith.maximumf %403, %418 : vector<64x128xf32>
    %421 = vector.shape_cast %413 : vector<1x128xi1> to vector<1x128xi1>
    %422 = vector.broadcast %421 : vector<1x128xi1> to vector<64x128xi1>
    %423 = arith.select %422, %419, %420 : vector<64x128xi1>, vector<64x128xf32>
    %c64_i32_136 = arith.constant 64 : i32
    %424 = vector.broadcast %c64_i32_136 : i32 to vector<1x128xi32>
    %425 = arith.andi %3, %424 : vector<1x128xi32>
    %c0_i32_137 = arith.constant 0 : i32
    %426 = vector.broadcast %c0_i32_137 : i32 to vector<1x128xi32>
    %427 = arith.cmpi eq, %425, %426 : vector<1x128xi32>
    %c128_i32 = arith.constant 128 : i32
    %428 = vector.broadcast %c128_i32 : i32 to vector<1x128xi32>
    %429 = arith.andi %3, %428 : vector<1x128xi32>
    %c0_i32_138 = arith.constant 0 : i32
    %430 = vector.broadcast %c0_i32_138 : i32 to vector<1x128xi32>
    %431 = arith.cmpi eq, %429, %430 : vector<1x128xi32>
    %432 = arith.xori %431, %427 : vector<1x128xi1>
    %cst_139 = arith.constant dense<true> : vector<1x128xi1>
    %433 = arith.xori %432, %cst_139 : vector<1x128xi1>
    %c64_i32_140 = arith.constant 64 : i32
    %434 = tpu.dynamic_rotate %423 by %c64_i32_140 dim 1 : vector<64x128xf32>, i32 -> vector<64x128xf32>
    %c64_i32_141 = arith.constant 64 : i32
    %435 = tpu.dynamic_rotate %423 by %c64_i32_141 dim 1 : vector<64x128xf32>, i32 -> vector<64x128xf32>
    %436 = vector.shape_cast %427 : vector<1x128xi1> to vector<1x128xi1>
    %437 = vector.broadcast %436 : vector<1x128xi1> to vector<64x128xi1>
    %438 = arith.select %437, %434, %435 : vector<64x128xi1>, vector<64x128xf32>
    %439 = arith.minimumf %423, %438 : vector<64x128xf32>
    %440 = arith.maximumf %423, %438 : vector<64x128xf32>
    %441 = vector.shape_cast %433 : vector<1x128xi1> to vector<1x128xi1>
    %442 = vector.broadcast %441 : vector<1x128xi1> to vector<64x128xi1>
    %443 = arith.select %442, %439, %440 : vector<64x128xi1>, vector<64x128xf32>
    %c32_i32_142 = arith.constant 32 : i32
    %444 = vector.broadcast %c32_i32_142 : i32 to vector<1x128xi32>
    %445 = arith.andi %3, %444 : vector<1x128xi32>
    %c0_i32_143 = arith.constant 0 : i32
    %446 = vector.broadcast %c0_i32_143 : i32 to vector<1x128xi32>
    %447 = arith.cmpi eq, %445, %446 : vector<1x128xi32>
    %c128_i32_144 = arith.constant 128 : i32
    %448 = vector.broadcast %c128_i32_144 : i32 to vector<1x128xi32>
    %449 = arith.andi %3, %448 : vector<1x128xi32>
    %c0_i32_145 = arith.constant 0 : i32
    %450 = vector.broadcast %c0_i32_145 : i32 to vector<1x128xi32>
    %451 = arith.cmpi eq, %449, %450 : vector<1x128xi32>
    %452 = arith.xori %451, %447 : vector<1x128xi1>
    %cst_146 = arith.constant dense<true> : vector<1x128xi1>
    %453 = arith.xori %452, %cst_146 : vector<1x128xi1>
    %c96_i32_147 = arith.constant 96 : i32
    %454 = tpu.dynamic_rotate %443 by %c96_i32_147 dim 1 : vector<64x128xf32>, i32 -> vector<64x128xf32>
    %c32_i32_148 = arith.constant 32 : i32
    %455 = tpu.dynamic_rotate %443 by %c32_i32_148 dim 1 : vector<64x128xf32>, i32 -> vector<64x128xf32>
    %456 = vector.shape_cast %447 : vector<1x128xi1> to vector<1x128xi1>
    %457 = vector.broadcast %456 : vector<1x128xi1> to vector<64x128xi1>
    %458 = arith.select %457, %454, %455 : vector<64x128xi1>, vector<64x128xf32>
    %459 = arith.minimumf %443, %458 : vector<64x128xf32>
    %460 = arith.maximumf %443, %458 : vector<64x128xf32>
    %461 = vector.shape_cast %453 : vector<1x128xi1> to vector<1x128xi1>
    %462 = vector.broadcast %461 : vector<1x128xi1> to vector<64x128xi1>
    %463 = arith.select %462, %459, %460 : vector<64x128xi1>, vector<64x128xf32>
    %c16_i32_149 = arith.constant 16 : i32
    %464 = vector.broadcast %c16_i32_149 : i32 to vector<1x128xi32>
    %465 = arith.andi %3, %464 : vector<1x128xi32>
    %c0_i32_150 = arith.constant 0 : i32
    %466 = vector.broadcast %c0_i32_150 : i32 to vector<1x128xi32>
    %467 = arith.cmpi eq, %465, %466 : vector<1x128xi32>
    %c128_i32_151 = arith.constant 128 : i32
    %468 = vector.broadcast %c128_i32_151 : i32 to vector<1x128xi32>
    %469 = arith.andi %3, %468 : vector<1x128xi32>
    %c0_i32_152 = arith.constant 0 : i32
    %470 = vector.broadcast %c0_i32_152 : i32 to vector<1x128xi32>
    %471 = arith.cmpi eq, %469, %470 : vector<1x128xi32>
    %472 = arith.xori %471, %467 : vector<1x128xi1>
    %cst_153 = arith.constant dense<true> : vector<1x128xi1>
    %473 = arith.xori %472, %cst_153 : vector<1x128xi1>
    %c112_i32_154 = arith.constant 112 : i32
    %474 = tpu.dynamic_rotate %463 by %c112_i32_154 dim 1 : vector<64x128xf32>, i32 -> vector<64x128xf32>
    %c16_i32_155 = arith.constant 16 : i32
    %475 = tpu.dynamic_rotate %463 by %c16_i32_155 dim 1 : vector<64x128xf32>, i32 -> vector<64x128xf32>
    %476 = vector.shape_cast %467 : vector<1x128xi1> to vector<1x128xi1>
    %477 = vector.broadcast %476 : vector<1x128xi1> to vector<64x128xi1>
    %478 = arith.select %477, %474, %475 : vector<64x128xi1>, vector<64x128xf32>
    %479 = arith.minimumf %463, %478 : vector<64x128xf32>
    %480 = arith.maximumf %463, %478 : vector<64x128xf32>
    %481 = vector.shape_cast %473 : vector<1x128xi1> to vector<1x128xi1>
    %482 = vector.broadcast %481 : vector<1x128xi1> to vector<64x128xi1>
    %483 = arith.select %482, %479, %480 : vector<64x128xi1>, vector<64x128xf32>
    %c8_i32_156 = arith.constant 8 : i32
    %484 = vector.broadcast %c8_i32_156 : i32 to vector<1x128xi32>
    %485 = arith.andi %3, %484 : vector<1x128xi32>
    %c0_i32_157 = arith.constant 0 : i32
    %486 = vector.broadcast %c0_i32_157 : i32 to vector<1x128xi32>
    %487 = arith.cmpi eq, %485, %486 : vector<1x128xi32>
    %c128_i32_158 = arith.constant 128 : i32
    %488 = vector.broadcast %c128_i32_158 : i32 to vector<1x128xi32>
    %489 = arith.andi %3, %488 : vector<1x128xi32>
    %c0_i32_159 = arith.constant 0 : i32
    %490 = vector.broadcast %c0_i32_159 : i32 to vector<1x128xi32>
    %491 = arith.cmpi eq, %489, %490 : vector<1x128xi32>
    %492 = arith.xori %491, %487 : vector<1x128xi1>
    %cst_160 = arith.constant dense<true> : vector<1x128xi1>
    %493 = arith.xori %492, %cst_160 : vector<1x128xi1>
    %c120_i32_161 = arith.constant 120 : i32
    %494 = tpu.dynamic_rotate %483 by %c120_i32_161 dim 1 : vector<64x128xf32>, i32 -> vector<64x128xf32>
    %c8_i32_162 = arith.constant 8 : i32
    %495 = tpu.dynamic_rotate %483 by %c8_i32_162 dim 1 : vector<64x128xf32>, i32 -> vector<64x128xf32>
    %496 = vector.shape_cast %487 : vector<1x128xi1> to vector<1x128xi1>
    %497 = vector.broadcast %496 : vector<1x128xi1> to vector<64x128xi1>
    %498 = arith.select %497, %494, %495 : vector<64x128xi1>, vector<64x128xf32>
    %499 = arith.minimumf %483, %498 : vector<64x128xf32>
    %500 = arith.maximumf %483, %498 : vector<64x128xf32>
    %501 = vector.shape_cast %493 : vector<1x128xi1> to vector<1x128xi1>
    %502 = vector.broadcast %501 : vector<1x128xi1> to vector<64x128xi1>
    %503 = arith.select %502, %499, %500 : vector<64x128xi1>, vector<64x128xf32>
    %c4_i32_163 = arith.constant 4 : i32
    %504 = vector.broadcast %c4_i32_163 : i32 to vector<1x128xi32>
    %505 = arith.andi %3, %504 : vector<1x128xi32>
    %c0_i32_164 = arith.constant 0 : i32
    %506 = vector.broadcast %c0_i32_164 : i32 to vector<1x128xi32>
    %507 = arith.cmpi eq, %505, %506 : vector<1x128xi32>
    %c128_i32_165 = arith.constant 128 : i32
    %508 = vector.broadcast %c128_i32_165 : i32 to vector<1x128xi32>
    %509 = arith.andi %3, %508 : vector<1x128xi32>
    %c0_i32_166 = arith.constant 0 : i32
    %510 = vector.broadcast %c0_i32_166 : i32 to vector<1x128xi32>
    %511 = arith.cmpi eq, %509, %510 : vector<1x128xi32>
    %512 = arith.xori %511, %507 : vector<1x128xi1>
    %cst_167 = arith.constant dense<true> : vector<1x128xi1>
    %513 = arith.xori %512, %cst_167 : vector<1x128xi1>
    %c124_i32_168 = arith.constant 124 : i32
    %514 = tpu.dynamic_rotate %503 by %c124_i32_168 dim 1 : vector<64x128xf32>, i32 -> vector<64x128xf32>
    %c4_i32_169 = arith.constant 4 : i32
    %515 = tpu.dynamic_rotate %503 by %c4_i32_169 dim 1 : vector<64x128xf32>, i32 -> vector<64x128xf32>
    %516 = vector.shape_cast %507 : vector<1x128xi1> to vector<1x128xi1>
    %517 = vector.broadcast %516 : vector<1x128xi1> to vector<64x128xi1>
    %518 = arith.select %517, %514, %515 : vector<64x128xi1>, vector<64x128xf32>
    %519 = arith.minimumf %503, %518 : vector<64x128xf32>
    %520 = arith.maximumf %503, %518 : vector<64x128xf32>
    %521 = vector.shape_cast %513 : vector<1x128xi1> to vector<1x128xi1>
    %522 = vector.broadcast %521 : vector<1x128xi1> to vector<64x128xi1>
    %523 = arith.select %522, %519, %520 : vector<64x128xi1>, vector<64x128xf32>
    %c2_i32_170 = arith.constant 2 : i32
    %524 = vector.broadcast %c2_i32_170 : i32 to vector<1x128xi32>
    %525 = arith.andi %3, %524 : vector<1x128xi32>
    %c0_i32_171 = arith.constant 0 : i32
    %526 = vector.broadcast %c0_i32_171 : i32 to vector<1x128xi32>
    %527 = arith.cmpi eq, %525, %526 : vector<1x128xi32>
    %c128_i32_172 = arith.constant 128 : i32
    %528 = vector.broadcast %c128_i32_172 : i32 to vector<1x128xi32>
    %529 = arith.andi %3, %528 : vector<1x128xi32>
    %c0_i32_173 = arith.constant 0 : i32
    %530 = vector.broadcast %c0_i32_173 : i32 to vector<1x128xi32>
    %531 = arith.cmpi eq, %529, %530 : vector<1x128xi32>
    %532 = arith.xori %531, %527 : vector<1x128xi1>
    %cst_174 = arith.constant dense<true> : vector<1x128xi1>
    %533 = arith.xori %532, %cst_174 : vector<1x128xi1>
    %c126_i32_175 = arith.constant 126 : i32
    %534 = tpu.dynamic_rotate %523 by %c126_i32_175 dim 1 : vector<64x128xf32>, i32 -> vector<64x128xf32>
    %c2_i32_176 = arith.constant 2 : i32
    %535 = tpu.dynamic_rotate %523 by %c2_i32_176 dim 1 : vector<64x128xf32>, i32 -> vector<64x128xf32>
    %536 = vector.shape_cast %527 : vector<1x128xi1> to vector<1x128xi1>
    %537 = vector.broadcast %536 : vector<1x128xi1> to vector<64x128xi1>
    %538 = arith.select %537, %534, %535 : vector<64x128xi1>, vector<64x128xf32>
    %539 = arith.minimumf %523, %538 : vector<64x128xf32>
    %540 = arith.maximumf %523, %538 : vector<64x128xf32>
    %541 = vector.shape_cast %533 : vector<1x128xi1> to vector<1x128xi1>
    %542 = vector.broadcast %541 : vector<1x128xi1> to vector<64x128xi1>
    %543 = arith.select %542, %539, %540 : vector<64x128xi1>, vector<64x128xf32>
    %c1_i32_177 = arith.constant 1 : i32
    %544 = vector.broadcast %c1_i32_177 : i32 to vector<1x128xi32>
    %545 = arith.andi %3, %544 : vector<1x128xi32>
    %c0_i32_178 = arith.constant 0 : i32
    %546 = vector.broadcast %c0_i32_178 : i32 to vector<1x128xi32>
    %547 = arith.cmpi eq, %545, %546 : vector<1x128xi32>
    %c128_i32_179 = arith.constant 128 : i32
    %548 = vector.broadcast %c128_i32_179 : i32 to vector<1x128xi32>
    %549 = arith.andi %3, %548 : vector<1x128xi32>
    %c0_i32_180 = arith.constant 0 : i32
    %550 = vector.broadcast %c0_i32_180 : i32 to vector<1x128xi32>
    %551 = arith.cmpi eq, %549, %550 : vector<1x128xi32>
    %552 = arith.xori %551, %547 : vector<1x128xi1>
    %cst_181 = arith.constant dense<true> : vector<1x128xi1>
    %553 = arith.xori %552, %cst_181 : vector<1x128xi1>
    %c127_i32_182 = arith.constant 127 : i32
    %554 = tpu.dynamic_rotate %543 by %c127_i32_182 dim 1 : vector<64x128xf32>, i32 -> vector<64x128xf32>
    %c1_i32_183 = arith.constant 1 : i32
    %555 = tpu.dynamic_rotate %543 by %c1_i32_183 dim 1 : vector<64x128xf32>, i32 -> vector<64x128xf32>
    %556 = vector.shape_cast %547 : vector<1x128xi1> to vector<1x128xi1>
    %557 = vector.broadcast %556 : vector<1x128xi1> to vector<64x128xi1>
    %558 = arith.select %557, %554, %555 : vector<64x128xi1>, vector<64x128xf32>
    %559 = arith.minimumf %543, %558 : vector<64x128xf32>
    %560 = arith.maximumf %543, %558 : vector<64x128xf32>
    %561 = vector.shape_cast %553 : vector<1x128xi1> to vector<1x128xi1>
    %562 = vector.broadcast %561 : vector<1x128xi1> to vector<64x128xi1>
    %563 = arith.select %562, %559, %560 : vector<64x128xi1>, vector<64x128xf32>
    %564 = vector.extract_strided_slice %563 {offsets = [0, 0], sizes = [32, 128], strides = [1, 1]} : vector<64x128xf32> to vector<32x128xf32>
    %565 = vector.extract_strided_slice %563 {offsets = [32, 0], sizes = [32, 128], strides = [1, 1]} : vector<64x128xf32> to vector<32x128xf32>
    %566 = arith.subf %564, %565 : vector<32x128xf32>
    %567 = math.absf %566 : vector<32x128xf32>
    %568 = vector.extract_strided_slice %567 {offsets = [0, 0], sizes = [8, 128], strides = [1, 1]} : vector<32x128xf32> to vector<8x128xf32>
    %569 = vector.extract_strided_slice %567 {offsets = [8, 0], sizes = [8, 128], strides = [1, 1]} : vector<32x128xf32> to vector<8x128xf32>
    %570 = arith.addf %568, %569 : vector<8x128xf32>
    %571 = vector.extract_strided_slice %567 {offsets = [16, 0], sizes = [8, 128], strides = [1, 1]} : vector<32x128xf32> to vector<8x128xf32>
    %572 = arith.addf %570, %571 : vector<8x128xf32>
    %573 = vector.extract_strided_slice %567 {offsets = [24, 0], sizes = [8, 128], strides = [1, 1]} : vector<32x128xf32> to vector<8x128xf32>
    %574 = arith.addf %572, %573 : vector<8x128xf32>
    %575 = vector.shape_cast %574 : vector<8x128xf32> to vector<1x8x128xf32>
    %c0_184 = arith.constant 0 : index
    %c0_185 = arith.constant 0 : index
    %c0_186 = arith.constant 0 : index
    %576 = vector.load %arg3[%c0_184, %c0_185, %c0_186] : memref<1x8x128xf32, #tpu.memory_space<vmem>>, vector<1x8x128xf32>
    tpu.vector_store %arg3[%c0_184, %c0_185, %c0_186], %575 {strides = array<i32>} : memref<1x8x128xf32, #tpu.memory_space<vmem>>, vector<1x8x128xf32>,
    return
  }
  func.func @transform_0(%arg0: i32) -> (i32, i32) {
    %c0_i32 = arith.constant 0 : i32
    %c0_i32_0 = arith.constant 0 : i32
    return %arg0, %c0_i32 : i32, i32
  }
  func.func @transform_1(%arg0: i32) -> (i32, i32) {
    %c0_i32 = arith.constant 0 : i32
    %c0_i32_0 = arith.constant 0 : i32
    %c0_i32_1 = arith.constant 0 : i32
    return %c0_i32, %c0_i32_0 : i32, i32
  }
  func.func @transform_2(%arg0: i32) -> (i32, i32, i32) {
    %c0_i32 = arith.constant 0 : i32
    %c0_i32_0 = arith.constant 0 : i32
    %c0_i32_1 = arith.constant 0 : i32
    return %arg0, %c0_i32, %c0_i32_0 : i32, i32, i32
  }
}

</mosaic_0001>

<bundles_post_ra>
// kernel: tpu_custom_call.1
= control target key start
LH: loop header
LB: loop body
LE: loop exit
PB: predicated region body
PF: predicated region fallthrough
CT: control target
= control target key end

     0   :  { %7 = vsyncpa [#allocation3], 0  ;;  %s7169_s0 = inlined_call_operand.vmem [shape: f32[128,64], index: 0, kind: input, shape index: {}]   ;;  %s7170_s1 = inlined_call_operand.vmem [shape: f32[128,64], index: 1, kind: input, shape index: {}]   ;;  %s7171_s2 = inlined_call_operand.hbm [shape: f32[2,8,128], index: 2, kind: output, shape index: {}]  }
   0x1   :  { %9 = vsyncpa [#allocation3 + $0x1], 0  ;;  %s3976_s9 = smov 0   ;;  %s3978_s10 = smov 0  }
   0x2   :  { %s3980_s11 = smov 0   ;;  %s3982_s12 = smov 0  }
   0x3 LB: > { %s3997_s13 = sadd.s32 4294967295, %s3944_s12   ;;  %s3178_s14 = sadd.s32 4294967294, %s3944_s12   ;;  %s3944_s12 = sphi %s3982_s12, %s7270_s12   ;;  %s3940_s11 = sphi %s3980_s11, %s7269_s11   ;;  %s3936_s10 = sphi %s3978_s10, %s7268_s10   ;;  %s3932_s9 = sphi %s3976_s9, %s7267_s9  }
   0x4   : > { %s4001_s15 = sadd.s32 1, %s3944_s12   ;;  %s69_s16 = sadd.s32 1, %s3940_s11 }
   0x5   : > { %s66_s17 = ssub.s32 %s3944_s12, %s4001_s15  ;;  %p79_p0 = scmp.ne.s32.totalorder %s3940_s11, %s3936_s10 }
   0x6   : > { %p67_p1 = scmp.eq.s32.totalorder %s66_s17, 0  ;;  %p80_p2 = scmp.eq.s32.totalorder %s3997_s13, 1 }
   0x7   : > { %p85_p3 = scmp.ne.s32.totalorder %s3936_s10, %s3932_s9  ;;  %p86_p4 = scmp.eq.s32.totalorder %s3178_s14, 1 }
   0x8   : > { %s4012_s18 = scalar_select %p67_p1, %s3940_s11, %s69_s16  }
   0x9   : > { %p4014_p5 = por %p80_p2, %p79_p0  ;;  %p4018_p6 = por %p86_p4, %p85_p3 }
   0xa   : > { %p3181_p7 = scmp.ge.s32.totalorder %s3944_s12, 1  ;;  %p116_p8 = scmp.lt.s32.totalorder %s3944_s12, 3 }
   0xc   : > { %p117_p9 = pnand %p3181_p7, %p116_p8 }
   0xe   : > { %120 = sbr.rel (%p117_p9) target bundleno = 4332 (0x10ec), region = 28 }
  0x15   : > { %v152_v0 = vld [vmem:[%s7170_s1] sm:$0xff]  ;;  %v153_v1 = vld [vmem:[%s7170_s1 + $0x8] sm:$0xff]  ;;  %vm168_vm0 = vcmask 523264   ;;  %v154_v2 = vld [vmem:[%s7170_s1 + $0x10] sm:$0xff]  ;;  %s3183_s5 = sshll.u32 %s3997_s13, 3  ;;  %s3946_s17 = smov 1  }
  0x16   : > { %v4034_v3 = vsel %vm168_vm0, %v152_v0, 0  ;;  %v4037_v4 = vsel %vm168_vm0, %v153_v1, 0  ;;  %v155_v5 = vld [vmem:[%s7170_s1 + $0x18] sm:$0xff]  ;;  %v4043_v6 = vsel %vm168_vm0, %v154_v2, 0  ;;  %v156_v11 = vld [vmem:[%s7170_s1 + $0x20] sm:$0xff]  ;;  %v157_v12 = vld [vmem:[%s7170_s1 + $0x28] sm:$0xff] }
  0x17   : > { %v242_v7 = vand.u32 4294901760, %v4034_v3  ;;  %v245_v8 = vand.u32 4294901760, %v4037_v4  ;;  %v4048_v9 = vsel %vm168_vm0, %v155_v5, 0  ;;  %v248_v10 = vand.u32 4294901760, %v4043_v6  ;;  %p139_p10 = scmp.lt.s32.totalorder %s3183_s5, 15  ;;  %v158_v20 = vld [vmem:[%s7170_s1 + $0x30] sm:$0xff] }
  0x18   : > { %v251_v13 = vand.u32 4294901760, %v4048_v9  ;;  %v4072_v16 = vsel %vm168_vm0, %v156_v11, 0  ;;  %v4075_v17 = vsel %vm168_vm0, %v157_v12, 0  ;;  %v159_v21 = vld [vmem:[%s7170_s1 + $0x38] sm:$0xff]  ;;  %v212_v24 = vsel %vm168_vm0, %v158_v20, 0  ;;  %v160_v31 = vld [vmem:[%s7170_s1 + $0x40] sm:$0xff] }
  0x19   : > { %v4063_v14 = vpack.c.bf16 %v245_v8, %v242_v7  ;;  %v254_v18 = vand.u32 4294901760, %v4072_v16  ;;  %v257_v19 = vand.u32 4294901760, %v4075_v17  ;;  %s7272_s5 = smov (!%p139_p10, %s3183_s5), 15  ;;  %v215_v25 = vsel %vm168_vm0, %v159_v21, 0  ;;  %v161_v32 = vld [vmem:[%s7170_s1 + $0x48] sm:$0xff]  ;;  %v162_v41 = vld [vmem:[%s7170_s1 + $0x50] sm:$0xff] }
  0x1a   : > { %v4069_v15 = vpack.c.bf16 %v251_v13, %v248_v10  ;;  %s3184_s16 = sshll.u32 %s7272_s5, 3  ;;  %v260_v28 = vand.u32 4294901760, %v212_v24  ;;  %v263_v29 = vand.u32 4294901760, %v215_v25  ;;  %v218_v36 = vsel %vm168_vm0, %v160_v31, 0  ;;  %v163_v42 = vld [vmem:[%s7170_s1 + $0x58] sm:$0xff]  ;;  %v164_v48 = vld [vmem:[%s7170_s1 + $0x60] sm:$0xff] }
  0x1b   : > { %3598 = vmatprep.subr.bf16.mxu1 %v4063_v14  ;;  %3694 = vmatprep.subr.bf16.mxu0 %v4063_v14  ;;  %s4094_s22 = scalar_lea.vmem %s7169_s0, %s3184_s16  ;;  %v4096_v22 = vpack.c.bf16 %v257_v19, %v254_v18  ;;  %v221_v37 = vsel %vm168_vm0, %v161_v32, 0  ;;  %v266_v39 = vand.u32 4294901760, %v218_v36  ;;  %v224_v44 = vsel %vm168_vm0, %v162_v41, 0  ;;  %v165_v49 = vld [vmem:[%s7170_s1 + $0x68] sm:$0xff]  ;;  %s3947_s21 = smov 127  }
  0x1c   : > { %3600 = vmatpush3.bf16.xpose.msra.mxu1 %v4063_v14  ;;  %3696 = vmatpush3.bf16.xpose.msra.mxu0 %v4063_v14  ;;  %v144_v23 = vld [vmem:[%s4094_s22] sm:$0xff]  ;;  %v4118_v34 = vpack.c.bf16 %v263_v29, %v260_v28  ;;  %v269_v40 = vand.u32 4294901760, %v221_v37  ;;  %v227_v45 = vsel %vm168_vm0, %v163_v42, 0  ;;  %v272_v46 = vand.u32 4294901760, %v224_v44  ;;  %v145_v12 = vld [vmem:[%s4094_s22 + $0x8] sm:$0xff]  ;;  %v146_v20 = vld [vmem:[%s4094_s22 + $0x10] sm:$0xff] }
  0x1d   : > { %3602 = vmatprep.subr.bf16.mxu1 %v4069_v15  ;;  %3698 = vmatprep.subr.bf16.mxu0 %v4069_v15  ;;  %v170_v26 = vsel %vm168_vm0, %v144_v23, 0  ;;  %v275_v47 = vand.u32 4294901760, %v227_v45  ;;  %v230_v51 = vsel %vm168_vm0, %v164_v48, 0  ;;  %v233_v52 = vsel %vm168_vm0, %v165_v49, 0  ;;  %v150_v48 = vld [vmem:[%s4094_s22 + $0x30] sm:$0xff]  ;;  %s3950_s23 = smov 2  }
  0x1e   : > { %v4102_v27 = vand.u32 4294901760, %v170_v26  ;;  %v4133_v43 = vpack.c.bf16 %v269_v40, %v266_v39  ;;  %v4154_v53 = vsub.f32 %v4034_v3, %v242_v7  ;;  %v4159_v54 = vsub.f32 %v4037_v4, %v245_v8  ;;  %v167_v7 = vld [vmem:[%s7170_s1 + $0x78] sm:$0xff]  ;;  %s3951_s24 = smov 124   ;;  %s3952_s25 = smov 4  }
  0x1f   : > { %v4147_v50 = vpack.c.bf16 %v275_v47, %v272_v46  ;;  %v4164_v55 = vsub.f32 %v4043_v6, %v248_v10  ;;  %v4169_v56 = vsub.f32 %v4048_v9, %v251_v13  ;;  %v4172_v57 = vsub.f32 %v4072_v16, %v254_v18  ;;  %v166_v6 = vld [vmem:[%s7170_s1 + $0x70] sm:$0xff]  ;;  %s3953_s26 = smov 120   ;;  %s3954_s27 = smov 8  }
  0x20   : > { %v4109_v30 = vsub.f32 %v170_v26, %v4102_v27  ;;  %v278_v58 = vand.u32 4294901760, %v230_v51  ;;  %v4177_v59 = vsub.f32 %v4075_v17, %v257_v19  ;;  %v4179_v60 = vsub.f32 %v212_v24, %v260_v28  ;;  %v147_v28 = vld [vmem:[%s4094_s22 + $0x18] sm:$0xff]  ;;  %s3955_s28 = smov 112   ;;  %s3956_s29 = smov 16  }
  0x21   : > { %v4181_v61 = vsub.f32 %v215_v25, %v263_v29  ;;  %v281_v62 = vand.u32 4294901760, %v233_v52  ;;  %v4185_v63 = vsub.f32 %v218_v36, %v266_v39  ;;  %v4187_v0 = vsub.f32 %v221_v37, %v269_v40  ;;  %v148_v29 = vld [vmem:[%s4094_s22 + $0x20] sm:$0xff]  ;;  %v149_v39 = vld [vmem:[%s4094_s22 + $0x28] sm:$0xff]  ;;  %s3957_s30 = smov 96   ;;  %s3958_s3 = smov 32  }
  0x22   : > { %v324_v33 = vand.u32 4294901760, %v4109_v30  ;;  %v4191_v1 = vpack.c.bf16 %v4159_v54, %v4154_v53  ;;  %v4193_v2 = vsub.f32 %v224_v44, %v272_v46  ;;  %v4195_v3 = vsub.f32 %v227_v45, %v275_v47  ;;  %s3959_s4 = smov 64   ;;  %s135_s5 = sand.u32 1, %s3936_s10  }
  0x23   : > { %v4199_v4 = vpack.c.bf16 %v4169_v56, %v4164_v55  ;;  %v4203_v5 = vpack.c.bf16 %v4177_v59, %v4172_v57  ;;  %v4213_v8 = vpack.c.bf16 %v4181_v61, %v4179_v60  ;;  %v4217_v9 = vpack.c.bf16 %v4187_v0, %v4185_v63  ;;  %s3182_s6 = sshll.u32 %s135_s5, 3  ;;  %s3186_s7 = sshll.u32 %s3997_s13, 7 }
  0x24   : > { %3604 = vmatpush3.bf16.xpose.msra.mxu1 %v4069_v15  ;;  %3700 = vmatpush3.bf16.xpose.msra.mxu0 %v4069_v15  ;;  %v325_v35 = vsub.f32 %v4109_v30, %v324_v33  ;;  %v4221_v10 = vpack.c.bf16 %v4195_v3, %v4193_v2  ;;  %v4223_v11 = vpack.c.bf16 %v281_v62, %v278_v58  ;;  %v236_v13 = vsel %vm168_vm0, %v166_v6, 0  ;;  %s137_s8 = scalar_lea.vmem [#allocation2], %s3182_s6  ;;  %s3960_s13 = smov [#allocation2]  }
  0x25   : > { %3606 = vmatprep.subr.bf16.mxu1 %v4096_v22  ;;  %3702 = vmatprep.subr.bf16.mxu0 %v4096_v22  ;;  %v239_v16 = vsel %vm168_vm0, %v167_v7, 0  ;;  %v4228_v17 = vsub.f32 %v230_v51, %v278_v58  ;;  %v4230_v18 = vsub.f32 %v233_v52, %v281_v62  ;;  %v173_v19 = vsel %vm168_vm0, %v145_v12, 0  ;;  %v151_v58 = vld [vmem:[%s4094_s22 + $0x38] sm:$0xff]  ;;  %s3949_s22 = smov 126   ;;  %s3119_s14 = sshll.u32 %s137_s8, 4  ;;  %s7127_s14 = int_to_ptr.vmem [resolvable:$true] %s3119_s14 }
  0x26   : > { %3497 = vmatprep.mubr.f32.mxu0 %v324_v33  ;;  %v326_v38 = vand.u32 4294901760, %v325_v35  ;;  %7183 = vst [vmem:[#allocation5_spill] sm:$0xff] %v4223_v11  ;;  %v284_v23 = vand.u32 4294901760, %v236_v13  ;;  %v287_v24 = vand.u32 4294901760, %v239_v16  ;;  %v405_v25 = vand.u32 4294901760, %v4154_v53 }
  0x27   : > { %v4238_v21 = vpack.c.bf16 %v4230_v18, %v4228_v17  ;;  %v412_v26 = vand.u32 4294901760, %v4159_v54  ;;  %v4246_v31 = vand.u32 4294901760, %v173_v19  ;;  %v176_v32 = vsel %vm168_vm0, %v146_v20, 0 }
  0x28   : > { %3365 = vmatprep.mubr.f32.mxu1 %v326_v38  ;;  %v179_v33 = vsel %vm168_vm0, %v147_v28, 0  ;;  %v4250_v35 = vpack.c.bf16 %v287_v24, %v284_v23  ;;  %v406_v36 = vsub.f32 %v4154_v53, %v405_v25  ;;  %v182_v38 = vsel %vm168_vm0, %v148_v29, 0 }
  0x29   : > { %7184 = vst [vmem:[#allocation6_spill] sm:$0xff] %v4238_v21  ;;  %v413_v37 = vsub.f32 %v4159_v54, %v412_v26  ;;  %v4256_v40 = vand.u32 4294901760, %v176_v32  ;;  %v4258_v41 = vsub.f32 %v236_v13, %v284_v23  ;;  %v4260_v42 = vsub.f32 %v239_v16, %v287_v24 }
  0x2a   : > { %7185 = vst [vmem:[#allocation7_spill] sm:$0xff] %v4250_v35  ;;  %v4263_v44 = vsub.f32 %v173_v19, %v4246_v31  ;;  %v4265_v45 = vand.u32 4294901760, %v179_v33  ;;  %v4269_v46 = vand.u32 4294901760, %v182_v38  ;;  %v185_v47 = vsel %vm168_vm0, %v149_v39, 0 }
  0x2b   : > { %v4275_v49 = vpack.c.bf16 %v4260_v42, %v4258_v41  ;;  %v407_v51 = vand.u32 4294901760, %v406_v36  ;;  %v414_v52 = vand.u32 4294901760, %v413_v37  ;;  %v419_v53 = vand.u32 4294901760, %v4164_v55 }
  0x2c   : > { %3608 = vmatpush3.bf16.xpose.msra.mxu1 %v4096_v22  ;;  %3704 = vmatpush3.bf16.xpose.msra.mxu0 %v4096_v22  ;;  %7186 = vst [vmem:[#allocation8_spill] sm:$0xff] %v4263_v44  ;;  %v426_v54 = vand.u32 4294901760, %v4169_v56  ;;  %v4283_v62 = vsub.f32 %v176_v32, %v4256_v40  ;;  %v334_v6 = vand.u32 4294901760, %v4263_v44  ;;  %v4287_v7 = vsub.f32 %v179_v33, %v4265_v45 }
  0x2d   : > { %3610 = vmatprep.subr.bf16.mxu1 %v4118_v34  ;;  %3706 = vmatprep.subr.bf16.mxu0 %v4118_v34  ;;  %7187 = vst [vmem:[#allocation9_spill] sm:$0xff] %v4275_v49  ;;  %v4289_v12 = vand.u32 4294901760, %v185_v47  ;;  %v188_v13 = vsel %vm168_vm0, %v150_v48, 0  ;;  %v4293_v16 = vsub.f32 %v182_v38, %v4269_v46  ;;  %v191_v19 = vsel %vm168_vm0, %v151_v58, 0 }
  0x2e   : > { %7188 = vst [vmem:[#allocation10_spill] sm:$0xff] %v4283_v62  ;;  %7189 = vst [vmem:[#allocation11_spill] sm:$0xff] %v4287_v7  ;;  %v3629_v20 = vpack.c.bf16 %v414_v52, %v407_v51  ;;  %v3725_v23 = vpack.c.bf16 %v412_v26, %v405_v25  ;;  %v420_v24 = vsub.f32 %v4164_v55, %v419_v53  ;;  %v344_v29 = vand.u32 4294901760, %v4283_v62 }
  0x2f   : > { %v427_v28 = vsub.f32 %v4169_v56, %v426_v54  ;;  %v4299_v32 = vand.u32 4294901760, %v188_v13  ;;  %v335_v33 = vsub.f32 %v4263_v44, %v334_v6  ;;  %v354_v36 = vand.u32 4294901760, %v4287_v7 }
  0x30   : > { %v4304_v37 = vsub.f32 %v185_v47, %v4289_v12  ;;  %v4306_v38 = vand.u32 4294901760, %v191_v19  ;;  %v364_v55 = vand.u32 4294901760, %v4293_v16  ;;  %v421_v56 = vand.u32 4294901760, %v420_v24 }
  0x31   : > { %v428_v25 = vand.u32 4294901760, %v427_v28  ;;  %v433_v26 = vand.u32 4294901760, %v4172_v57  ;;  %v440_v39 = vand.u32 4294901760, %v4177_v59  ;;  %v345_v48 = vsub.f32 %v4283_v62, %v344_v29 }
  0x32   : > { %v4315_v47 = vsub.f32 %v188_v13, %v4299_v32  ;;  %v336_v51 = vand.u32 4294901760, %v335_v33  ;;  %v355_v52 = vsub.f32 %v4287_v7, %v354_v36  ;;  %v374_v58 = vand.u32 4294901760, %v4304_v37 }
  0x33   : > { %v4320_v44 = vsub.f32 %v191_v19, %v4306_v38  ;;  %v365_v24 = vsub.f32 %v4293_v16, %v364_v55  ;;  %v3633_v28 = vpack.c.bf16 %v428_v25, %v421_v56  ;;  %v434_v49 = vsub.f32 %v4172_v57, %v433_v26 }
  0x34   : > { %3612 = vmatpush3.bf16.xpose.msra.mxu1 %v4118_v34  ;;  %3708 = vmatpush3.bf16.xpose.msra.mxu0 %v4118_v34  ;;  %v346_v62 = vand.u32 4294901760, %v345_v48  ;;  %v384_v13 = vand.u32 4294901760, %v4315_v47  ;;  %v356_v33 = vand.u32 4294901760, %v355_v52  ;;  %v375_v7 = vsub.f32 %v4304_v37, %v374_v58 }
  0x35   : > { %3614 = vmatprep.subr.bf16.mxu1 %v4133_v43  ;;  %3710 = vmatprep.subr.bf16.mxu0 %v4133_v43  ;;  %v394_v21 = vand.u32 4294901760, %v4320_v44  ;;  %v366_v19 = vand.u32 4294901760, %v365_v24  ;;  %v447_v57 = vand.u32 4294901760, %v4179_v60  ;;  %v475_v52 = vand.u32 4294901760, %v4193_v2 }
  0x36   : > { %v376_v56 = vand.u32 4294901760, %v375_v7  ;;  %vm3948_vm4 = vmmov 1  }
  0x37   : > { %v395_v25 = vsub.f32 %v4320_v44, %v394_v21 }
  0x3c   : > { %3616 = vmatpush3.bf16.xpose.msra.mxu1 %v4133_v43  ;;  %3712 = vmatpush3.bf16.xpose.msra.mxu0 %v4133_v43 }
  0x3d   : > { %3618 = vmatprep.subr.bf16.mxu1 %v4147_v50  ;;  %3714 = vmatprep.subr.bf16.mxu0 %v4147_v50 }
  0x44   : > { %3620 = vmatpush3.bf16.xpose.msra.mxu1 %v4147_v50  ;;  %3716 = vmatpush3.bf16.xpose.msra.mxu0 %v4147_v50 }
  0x45   : > { %3622 = vmatprep.subr.bf16.mxu1 %v4223_v11  ;;  %3718 = vmatprep.subr.bf16.mxu0 %v4223_v11 }
  0x4c   : > { %3624 = vmatpush3.bf16.xpose.msra.mxu1 %v4223_v11  ;;  %3720 = vmatpush3.bf16.xpose.msra.mxu0 %v4223_v11  ;;  %v441_v11 = vsub.f32 %v4177_v59, %v440_v39  ;;  %v454_v59 = vand.u32 4294901760, %v4181_v61 }
  0x4d   : > { %3626 = vmatprep.subr.bf16.mxu1 %v4250_v35  ;;  %3722 = vmatprep.subr.bf16.mxu0 %v4250_v35 }
  0x54   : > { %3628 = vmatpush3.bf16.xpose.msra.mxu1 %v4250_v35  ;;  %3724 = vmatpush3.bf16.xpose.msra.mxu0 %v4250_v35  ;;  %v3729_v35 = vpack.c.bf16 %v426_v54, %v419_v53  ;;  %v435_v53 = vand.u32 4294901760, %v434_v49  ;;  %v442_v54 = vand.u32 4294901760, %v441_v11  ;;  %v448_v49 = vsub.f32 %v4179_v60, %v447_v57 }
  0x55   : > { %3630 = vmatprep.subr.bf16.mxu1 %v3629_v20  ;;  %3726 = vmatprep.subr.bf16.mxu0 %v3725_v23  ;;  %v455_v11 = vsub.f32 %v4181_v61, %v454_v59  ;;  %v3737_v61 = vpack.c.bf16 %v454_v59, %v447_v57 }
  0x57   : > { %v456_v7 = vand.u32 4294901760, %v455_v11 }
  0x5b   : > { %3366 = vmatmul.mubr.f32.vlgmr.msra.gmra.mrb[0].mxu1 %v336_v51  ;;  %3498 = vmatmul.mubr.f32.vlgmr.msra.gmra.mrb[0].mxu0 %v334_v6  ;;  %v385_v6 = vsub.f32 %v4315_v47, %v384_v13 }
  0x5c   : > { %3632 = vmatpush3.bf16.xpose.msra.mxu1 %v3629_v20  ;;  %3728 = vmatpush3.bf16.xpose.msra.mxu0 %v3725_v23  ;;  %v3637_v20 = vpack.c.bf16 %v442_v54, %v435_v53  ;;  %v3733_v23 = vpack.c.bf16 %v440_v39, %v433_v26 }
  0x5d   : > { %3634 = vmatprep.subr.bf16.mxu1 %v3633_v28  ;;  %3730 = vmatprep.subr.bf16.mxu0 %v3729_v35  ;;  %v386_v48 = vand.u32 4294901760, %v385_v6  ;;  %v503_v6 = vand.u32 4294901760, %v4258_v41 }
  0x5e   : > { %3368 = vmatprep.mubr.f32.mxu1 %v346_v62  ;;  %3500 = vmatprep.mubr.f32.mxu0 %v344_v29  ;;  %v396_v62 = vand.u32 4294901760, %v395_v25  ;;  %v449_v29 = vand.u32 4294901760, %v448_v49 }
  0x5f   : > { %3369 = vmatmul.mubr.f32.gmra.mrb[2].mxu1 %v356_v33  ;;  %3501 = vmatmul.mubr.f32.gmra.mrb[2].mxu0 %v354_v36  ;;  %v461_v36 = vand.u32 4294901760, %v4185_v63  ;;  %v489_v33 = vand.u32 4294901760, %v4228_v17 }
  0x60   : > { %3371 = vmatprep.mubr.f32.mxu1 %v366_v19  ;;  %3503 = vmatprep.mubr.f32.mxu0 %v364_v55  ;;  %v468_v55 = vand.u32 4294901760, %v4187_v0  ;;  %v3641_v60 = vpack.c.bf16 %v456_v7, %v449_v29  ;;  %v496_v19 = vand.u32 4294901760, %v4230_v18 }
  0x61   : > { %v490_v57 = vsub.f32 %v4228_v17, %v489_v33 }
  0x62   : > { %v469_v26 = vsub.f32 %v4187_v0, %v468_v55  ;;  %v3741_v24 = vpack.c.bf16 %v468_v55, %v461_v36  ;;  %v497_v59 = vsub.f32 %v4230_v18, %v496_v19  ;;  %v1183_v55 = vlaneseq }
  0x63   : > { %3372 = vmatmul.mubr.f32.gmra.mrb[4].mxu1 %v376_v56  ;;  %3504 = vmatmul.mubr.f32.gmra.mrb[4].mxu0 %v374_v58  ;;  %v510_v56 = vand.u32 4294901760, %v4260_v42 }
  0x64   : > { %3636 = vmatpush3.bf16.xpose.msra.mxu1 %v3633_v28  ;;  %3732 = vmatpush3.bf16.xpose.msra.mxu0 %v3729_v35  ;;  %v462_v35 = vsub.f32 %v4185_v63, %v461_v36  ;;  %v470_v51 = vand.u32 4294901760, %v469_v26  ;;  %v476_v28 = vsub.f32 %v4193_v2, %v475_v52  ;;  %v491_v2 = vand.u32 4294901760, %v490_v57 }
  0x65   : > { %3638 = vmatprep.subr.bf16.mxu1 %v3637_v20  ;;  %3734 = vmatprep.subr.bf16.mxu0 %v3733_v23  ;;  %v511_v49 = vsub.f32 %v4260_v42, %v510_v56 }
  0x66   : > { %3374 = vmatprep.mubr.f32.mxu1 %v386_v48  ;;  %3506 = vmatprep.mubr.f32.mxu0 %v384_v13  ;;  %v463_v39 = vand.u32 4294901760, %v462_v35  ;;  %v477_v63 = vand.u32 4294901760, %v476_v28  ;;  %v3753_v48 = vpack.c.bf16 %v510_v56, %v503_v6 }
  0x67   : > { %3375 = vmatmul.mubr.f32.gmra.mrb[6].mxu1 %v396_v62  ;;  %3507 = vmatmul.mubr.f32.gmra.mrb[6].mxu0 %v394_v21  ;;  %v482_v21 = vand.u32 4294901760, %v4195_v3  ;;  %v512_v18 = vand.u32 4294901760, %v511_v49 }
  0x68   : > { %3409 = vmatprep.mubr.f32.mxu1 %v4102_v27  ;;  %3541 = vmatprep.mubr.f32.mxu0 %v4102_v27  ;;  %v3645_v58 = vpack.c.bf16 %v470_v51, %v463_v39 }
  0x69   : > { %v483_v13 = vsub.f32 %v4195_v3, %v482_v21  ;;  %v3745_v54 = vpack.c.bf16 %v482_v21, %v475_v52  ;;  %v498_v3 = vand.u32 4294901760, %v497_v59 }
  0x6b   : > { %v484_v0 = vand.u32 4294901760, %v483_v13  ;;  %v3653_v25 = vpack.c.bf16 %v498_v3, %v491_v2 }
  0x6c   : > { %3640 = vmatpush3.bf16.xpose.msra.mxu1 %v3637_v20  ;;  %3736 = vmatpush3.bf16.xpose.msra.mxu0 %v3733_v23  ;;  %v3749_v20 = vpack.c.bf16 %v496_v19, %v489_v33  ;;  %v504_v23 = vsub.f32 %v4258_v41, %v503_v6 }
  0x6d   : > { %3642 = vmatprep.subr.bf16.mxu1 %v3641_v60  ;;  %3738 = vmatprep.subr.bf16.mxu0 %v3737_v61  ;;  %v3649_v53 = vpack.c.bf16 %v484_v0, %v477_v63 }
  0x6e   : > { %v505_v17 = vand.u32 4294901760, %v504_v23 }
  0x70   : > { %v3657_v11 = vpack.c.bf16 %v512_v18, %v505_v17 }
  0x74   : > { %3644 = vmatpush3.bf16.xpose.msra.mxu1 %v3641_v60  ;;  %3740 = vmatpush3.bf16.xpose.msra.mxu0 %v3737_v61  ;;  %v4454_v60 = vand.u32 127, %v1183_v55 }
  0x75   : > { %3646 = vmatprep.subr.bf16.mxu1 %v3645_v58  ;;  %3742 = vmatprep.subr.bf16.mxu0 %v3741_v24 }
  0x76   : > { %v1185_v61 = vand.u32 1, %v4454_v60  ;;  %v1187_v35 = vand.u32 2, %v4454_v60 }
  0x78   : > { %vm4458_vm1 = vcmp.eq.s32.totalorder %v1185_v61, 0  ;;  %vm4462_vm2 = vcmp.eq.s32.totalorder %v1187_v35, 0 }
  0x79   : > { %vm1189_vm3 = vmxor %vm4462_vm2, %vm4458_vm1 }
  0x7a   : > { %vm4473_vm5 = vmxor %vm1189_vm3, %vm3948_vm4 }
  0x7c   : > { %3648 = vmatpush3.bf16.xpose.msra.mxu1 %v3645_v58  ;;  %3744 = vmatpush3.bf16.xpose.msra.mxu0 %v3741_v24 }
  0x7d   : > { %3650 = vmatprep.subr.bf16.mxu1 %v3649_v53  ;;  %3746 = vmatprep.subr.bf16.mxu0 %v3745_v54 }
  0x84   : > { %3652 = vmatpush3.bf16.xpose.msra.mxu1 %v3649_v53  ;;  %3748 = vmatpush3.bf16.xpose.msra.mxu0 %v3745_v54 }
  0x85   : > { %3654 = vmatprep.subr.bf16.mxu1 %v3653_v25  ;;  %3750 = vmatprep.subr.bf16.mxu0 %v3749_v20 }
  0x8c   : > { %3656 = vmatpush3.bf16.xpose.msra.mxu1 %v3653_v25  ;;  %3752 = vmatpush3.bf16.xpose.msra.mxu0 %v3749_v20 }
  0x8d   : > { %3658 = vmatprep.subr.bf16.mxu1 %v3657_v11  ;;  %3754 = vmatprep.subr.bf16.mxu0 %v3753_v48 }
  0x94   : > { %3660 = vmatpush3.bf16.xpose.msra.mxu1 %v3657_v11  ;;  %3756 = vmatpush3.bf16.xpose.msra.mxu0 %v3753_v48 }
  0x95   : > { %3662 = vmatprep.subr.bf16.mxu1 %v4191_v1  ;;  %3758 = vmatprep.subr.bf16.mxu0 %v4063_v14 }
  0x9b   : > { %3410 = vmatmul.mubr.f32.vlgmr.msra.gmra.mrb[0].mxu1 %v4246_v31  ;;  %3542 = vmatmul.mubr.f32.vlgmr.msra.gmra.mrb[0].mxu0 %v4246_v31 }
  0x9c   : > { %3664 = vmatpush3.bf16.xpose.msra.mxu1 %v4191_v1  ;;  %3760 = vmatpush3.bf16.xpose.msra.mxu0 %v4063_v14  ;;  %v7190_v14 = vld [vmem:[#allocation6_spill] sm:$0xff] }
  0x9d   : > { %3666 = vmatprep.subr.bf16.mxu1 %v4199_v4  ;;  %3762 = vmatprep.subr.bf16.mxu0 %v4069_v15 }
  0x9e   : > { %3412 = vmatprep.mubr.f32.mxu1 %v4256_v40  ;;  %3544 = vmatprep.mubr.f32.mxu0 %v4256_v40 }
  0x9f   : > { %3413 = vmatmul.mubr.f32.gmra.mrb[2].mxu1 %v4265_v45  ;;  %3545 = vmatmul.mubr.f32.gmra.mrb[2].mxu0 %v4265_v45 }
  0xa0   : > { %3415 = vmatprep.mubr.f32.mxu1 %v4269_v46  ;;  %3547 = vmatprep.mubr.f32.mxu0 %v4269_v46 }
  0xa3   : > { %3416 = vmatmul.mubr.f32.gmra.mrb[4].mxu1 %v4289_v12  ;;  %3548 = vmatmul.mubr.f32.gmra.mrb[4].mxu0 %v4289_v12 }
  0xa4   : > { %3668 = vmatpush3.bf16.xpose.msra.mxu1 %v4199_v4  ;;  %3764 = vmatpush3.bf16.xpose.msra.mxu0 %v4069_v15  ;;  %v7191_v15 = vld [vmem:[#allocation5_spill] sm:$0xff] }
  0xa5   : > { %3670 = vmatprep.subr.bf16.mxu1 %v4203_v5  ;;  %3766 = vmatprep.subr.bf16.mxu0 %v4096_v22 }
  0xa6   : > { %3418 = vmatprep.mubr.f32.mxu1 %v4299_v32  ;;  %3550 = vmatprep.mubr.f32.mxu0 %v4299_v32 }
  0xa7   : > { %3419 = vmatmul.mubr.f32.gmra.mrb[6].mxu1 %v4306_v38  ;;  %3551 = vmatmul.mubr.f32.gmra.mrb[6].mxu0 %v4306_v38 }
  0xa8   : > { %3453 = vmatprep.mubr.f32.mxu1 %v4109_v30  ;;  %3585 = vmatprep.mubr.f32.mxu0 %v4102_v27  ;;  %v7193_v27 = vld [vmem:[#allocation7_spill] sm:$0xff]  ;;  %v7194_v30 = vld [vmem:[#allocation8_spill] sm:$0xff] }
  0xac   : > { %3672 = vmatpush3.bf16.xpose.msra.mxu1 %v4203_v5  ;;  %3768 = vmatpush3.bf16.xpose.msra.mxu0 %v4096_v22  ;;  %v7192_v22 = vld [vmem:[#allocation9_spill] sm:$0xff] }
  0xad   : > { %3674 = vmatprep.subr.bf16.mxu1 %v4213_v8  ;;  %3770 = vmatprep.subr.bf16.mxu0 %v4118_v34 }
  0xb4   : > { %3676 = vmatpush3.bf16.xpose.msra.mxu1 %v4213_v8  ;;  %3772 = vmatpush3.bf16.xpose.msra.mxu0 %v4118_v34  ;;  %v7195_v34 = vld [vmem:[#allocation10_spill] sm:$0xff] }
  0xb5   : > { %3678 = vmatprep.subr.bf16.mxu1 %v4217_v9  ;;  %3774 = vmatprep.subr.bf16.mxu0 %v4133_v43 }
  0xbc   : > { %3680 = vmatpush3.bf16.xpose.msra.mxu1 %v4217_v9  ;;  %3776 = vmatpush3.bf16.xpose.msra.mxu0 %v4133_v43  ;;  %v7196_v43 = vld [vmem:[#allocation11_spill] sm:$0xff] }
  0xbd   : > { %3682 = vmatprep.subr.bf16.mxu1 %v4221_v10  ;;  %3778 = vmatprep.subr.bf16.mxu0 %v4147_v50 }
  0xc4   : > { %3684 = vmatpush3.bf16.xpose.msra.mxu1 %v4221_v10  ;;  %3780 = vmatpush3.bf16.xpose.msra.mxu0 %v4147_v50 }
  0xc5   : > { %3686 = vmatprep.subr.bf16.mxu1 %v7190_v14  ;;  %3782 = vmatprep.subr.bf16.mxu0 %v7191_v15 }
  0xcc   : > { %3688 = vmatpush3.bf16.xpose.msra.mxu1 %v7190_v14  ;;  %3784 = vmatpush3.bf16.xpose.msra.mxu0 %v7191_v15 }
  0xcd   : > { %3690 = vmatprep.subr.bf16.mxu1 %v7192_v22  ;;  %3786 = vmatprep.subr.bf16.mxu0 %v7193_v27 }
  0xd4   : > { %3692 = vmatpush3.bf16.xpose.msra.mxu1 %v7192_v22  ;;  %3788 = vmatpush3.bf16.xpose.msra.mxu0 %v7193_v27 }
  0xdb   : > { %3454 = vmatmul.mubr.f32.vlgmr.msra.gmra.mrb[0].mxu1 %v7194_v30  ;;  %3586 = vmatmul.mubr.f32.vlgmr.msra.gmra.mrb[0].mxu0 %v4246_v31 }
  0xdc   : > { %3456 = vmatprep.mubr.f32.mxu1 %v7195_v34  ;;  %3588 = vmatprep.mubr.f32.mxu0 %v4256_v40 }
  0xdf   : > { %3457 = vmatmul.mubr.f32.gmra.mrb[2].mxu1 %v7196_v43  ;;  %3589 = vmatmul.mubr.f32.gmra.mrb[2].mxu0 %v4265_v45 }
  0xe0   : > { %3459 = vmatprep.mubr.f32.mxu1 %v4293_v16  ;;  %3591 = vmatprep.mubr.f32.mxu0 %v4269_v46 }
  0xe3   : > { %3460 = vmatmul.mubr.f32.gmra.mrb[4].mxu1 %v4304_v37  ;;  %3592 = vmatmul.mubr.f32.gmra.mrb[4].mxu0 %v4289_v12 }
  0xe4   : > { %3462 = vmatprep.mubr.f32.mxu1 %v4315_v47  ;;  %3594 = vmatprep.mubr.f32.mxu0 %v4299_v32 }
  0xe7   : > { %3463 = vmatmul.mubr.f32.gmra.mrb[6].mxu1 %v4320_v44  ;;  %3595 = vmatmul.mubr.f32.gmra.mrb[6].mxu0 %v4306_v38 }
 0x1ae   : > { %v3455_v50 = vpop.f32.mrb[0].mxu1  ;;  %v3587_v1 = vpop.f32.mrb[0].mxu0 }
 0x1af   : > { %v3789_v4 = vadd.f32 %v3587_v1, %v3455_v50  ;;  %v695_v5 = vpop.f32.mrb[1].mxu1  ;;  %v1137_v8 = vpop.f32.mrb[1].mxu0 }
 0x1b0   : > { %v4414_v9 = vadd.f32 %v1137_v8, %v695_v5 }
 0x1b1   : > { %1209 = vrot.lane.b32.xlu1 %v3789_v4, %s3946_s17  ;;  %1193 = vrot.lane.b32.xlu0 %v3789_v4, %s3947_s21 }
 0x1b2   : > { %v3458_v10 = vpop.f32.mrb[2].mxu1  ;;  %v3590_v31 = vpop.f32.mrb[2].mxu0 }
 0x1b3   : > { %v4418_v40 = vadd.f32 %v3590_v31, %v3458_v10  ;;  %v709_v41 = vpop.f32.mrb[3].mxu1  ;;  %v1149_v42 = vpop.f32.mrb[3].mxu0 }
 0x1b4   : > { %v4420_v44 = vadd.f32 %v1149_v42, %v709_v41 }
 0x1b5   : > { %1191 = vrot.lane.b32.xlu0 %v4414_v9, %s3947_s21 }
 0x1b6   : > { %v3461_v45 = vpop.f32.mrb[4].mxu1  ;;  %v3593_v46 = vpop.f32.mrb[4].mxu0 }
 0x1b7   : > { %v3793_v12 = vadd.f32 %v3593_v46, %v3461_v45  ;;  %v723_v16 = vpop.f32.mrb[5].mxu1  ;;  %v1161_v32 = vpop.f32.mrb[5].mxu0 }
 0x1b8   : > { %v4424_v37 = vadd.f32 %v1161_v32, %v723_v16  ;;  %v1259_v16 = vand.u32 4, %v4454_v60 }
 0x1b9   : > { %1207 = vrot.lane.b32.xlu0 %v4414_v9, %s3946_s17  ;;  %1201 = vrot.lane.b32.xlu1 %v3793_v12, %s3947_s21 }
 0x1ba   : > { %v3464_v38 = vpop.f32.mrb[6].mxu1  ;;  %v3596_v47 = vpop.f32.mrb[6].mxu0  ;;  %vm4564_vm6 = vcmp.eq.s32.totalorder %v1259_v16, 0 }
 0x1bb   : > { %v4429_v62 = vadd.f32 %v3596_v47, %v3464_v38  ;;  %v737_v29 = vpop.f32.mrb[7].mxu1  ;;  %v1173_v7 = vpop.f32.mrb[7].mxu0  ;;  %vm1261_vm7 = vmxor %vm4564_vm6, %vm4462_vm2 }
 0x1bc   : > { %v4431_v36 = vadd.f32 %v1173_v7, %v737_v29  ;;  %vm4575_vm8 = vmxor %vm1261_vm7, %vm3948_vm4 }
 0x1bd   : > { %1197 = vrot.lane.b32.xlu0 %v4418_v40, %s3947_s21  ;;  %1217 = vrot.lane.b32.xlu1 %v3793_v12, %s3946_s17  ;;  %vm1331_vm9 = vmxor %vm4564_vm6, %vm4458_vm1 }
 0x1be   : > { %vm4674_vm10 = vmxor %vm1331_vm9, %vm3948_vm4 }
 0x1c1   : > { %1195 = vrot.lane.b32.xlu0 %v4420_v44, %s3947_s21  ;;  %1199 = vrot.lane.b32.xlu1 %v4424_v37, %s3947_s21 }
 0x1c5   : > { %1211 = vrot.lane.b32.xlu0 %v4420_v44, %s3946_s17  ;;  %1205 = vrot.lane.b32.xlu1 %v4429_v62, %s3947_s21 }
 0x1c9   : > { %1215 = vrot.lane.b32.xlu0 %v4424_v37, %s3946_s17  ;;  %1203 = vrot.lane.b32.xlu1 %v4431_v36, %s3947_s21 }
 0x1cd   : > { %1213 = vrot.lane.b32.xlu0 %v4418_v40, %s3946_s17  ;;  %1219 = vrot.lane.b32.xlu1 %v4431_v36, %s3946_s17 }
 0x1d1   : > { %1221 = vrot.lane.b32.xlu1 %v4429_v62, %s3946_s17 }
 0x223   : > { %v1210_v51 = vpop.permute.xlu1 %1209  ;;  %v1194_v52 = vpop.permute.xlu0 %1193 }
 0x224   : > { %v1226_v21 = vsel %vm4458_vm1, %v1194_v52, %v1210_v51 }
 0x225   : > { %v1234_v24 = vmin.f32 %v3789_v4, %v1226_v21  ;;  %v1242_v28 = vmax.f32 %v3789_v4, %v1226_v21 }
 0x227   : > { %v1192_v13 = vpop.permute.xlu0 %1191  ;;  %v4479_v63 = vsel %vm4473_vm5, %v1234_v24, %v1242_v28 }
 0x228   : > { %1265 = vrot.lane.b32.xlu1 %v4479_v63, %s3949_s22 }
 0x22b   : > { %v1208_v0 = vpop.permute.xlu0 %1207  ;;  %v1202_v33 = vpop.permute.xlu1 %1201 }
 0x22c   : > { %v1225_v19 = vsel %vm4458_vm1, %v1192_v13, %v1208_v0  ;;  %1281 = vrot.lane.b32.xlu1 %v4479_v63, %s3950_s23 }
 0x22d   : > { %v1233_v53 = vmin.f32 %v4414_v9, %v1225_v19  ;;  %v1241_v54 = vmax.f32 %v4414_v9, %v1225_v19 }
 0x22f   : > { %v1198_v57 = vpop.permute.xlu0 %1197  ;;  %v1218_v59 = vpop.permute.xlu1 %1217  ;;  %v4491_v2 = vsel %vm4473_vm5, %v1233_v53, %v1241_v54 }
 0x230   : > { %v1230_v3 = vsel %vm4458_vm1, %v1202_v33, %v1218_v59  ;;  %1263 = vrot.lane.b32.xlu0 %v4491_v2, %s3949_s22 }
 0x231   : > { %v1238_v6 = vmin.f32 %v3793_v12, %v1230_v3  ;;  %v1246_v56 = vmax.f32 %v3793_v12, %v1230_v3 }
 0x233   : > { %v1196_v25 = vpop.permute.xlu0 %1195  ;;  %v1200_v20 = vpop.permute.xlu1 %1199  ;;  %v4499_v23 = vsel %vm4473_vm5, %v1238_v6, %v1246_v56 }
 0x234   : > { %1279 = vrot.lane.b32.xlu0 %v4491_v2, %s3950_s23  ;;  %1273 = vrot.lane.b32.xlu1 %v4499_v23, %s3949_s22 }
 0x237   : > { %v1212_v49 = vpop.permute.xlu0 %1211  ;;  %v1206_v17 = vpop.permute.xlu1 %1205 }
 0x238   : > { %1289 = vrot.lane.b32.xlu1 %v4499_v23, %s3950_s23  ;;  %v1227_v15 = vsel %vm4458_vm1, %v1196_v25, %v1212_v49 }
 0x239   : > { %v1235_v34 = vmin.f32 %v4420_v44, %v1227_v15  ;;  %v1243_v43 = vmax.f32 %v4420_v44, %v1227_v15 }
 0x23b   : > { %v1216_v18 = vpop.permute.xlu0 %1215  ;;  %v1204_v11 = vpop.permute.xlu1 %1203 }
 0x23c   : > { %v1229_v42 = vsel %vm4458_vm1, %v1200_v20, %v1216_v18 }
 0x23d   : > { %v1237_v44 = vmin.f32 %v4424_v37, %v1229_v42  ;;  %v1245_v45 = vmax.f32 %v4424_v37, %v1229_v42 }
 0x23f   : > { %v1214_v48 = vpop.permute.xlu0 %1213  ;;  %v1220_v14 = vpop.permute.xlu1 %1219  ;;  %v4552_v12 = vsel %vm4473_vm5, %v1237_v44, %v1245_v45 }
 0x240   : > { %v1228_v22 = vsel %vm4458_vm1, %v1198_v57, %v1214_v48  ;;  %v1231_v4 = vsel %vm4458_vm1, %v1204_v11, %v1220_v14 }
 0x241   : > { %v1236_v27 = vmin.f32 %v4418_v40, %v1228_v22  ;;  %v1244_v30 = vmax.f32 %v4418_v40, %v1228_v22  ;;  %v1239_v10 = vmin.f32 %v4431_v36, %v1231_v4  ;;  %v1247_v31 = vmax.f32 %v4431_v36, %v1231_v4 }
 0x242   : > { %v4531_v40 = vsel %vm4473_vm5, %v1235_v34, %v1243_v43 }
 0x243   : > { %v1222_v50 = vpop.permute.xlu1 %1221  ;;  %v4517_v1 = vsel %vm4473_vm5, %v1236_v27, %v1244_v30  ;;  %v4544_v46 = vsel %vm4473_vm5, %v1239_v10, %v1247_v31 }
 0x244   : > { %v1232_v5 = vsel %vm4458_vm1, %v1206_v17, %v1222_v50  ;;  %1269 = vrot.lane.b32.xlu0 %v4517_v1, %s3949_s22 }
 0x245   : > { %v1240_v8 = vmin.f32 %v4429_v62, %v1232_v5  ;;  %v1248_v9 = vmax.f32 %v4429_v62, %v1232_v5 }
 0x247   : > { %v1258_v41 = vsel %vm4473_vm5, %v1240_v8, %v1248_v9 }
 0x248   : > { %1267 = vrot.lane.b32.xlu0 %v4531_v40, %s3949_s22  ;;  %1277 = vrot.lane.b32.xlu1 %v1258_v41, %s3949_s22 }
 0x24c   : > { %1283 = vrot.lane.b32.xlu0 %v4531_v40, %s3950_s23  ;;  %1275 = vrot.lane.b32.xlu1 %v4544_v46, %s3949_s22 }
 0x250   : > { %1271 = vrot.lane.b32.xlu0 %v4552_v12, %s3949_s22  ;;  %1291 = vrot.lane.b32.xlu1 %v4544_v46, %s3950_s23 }
 0x254   : > { %1287 = vrot.lane.b32.xlu0 %v4552_v12, %s3950_s23  ;;  %1293 = vrot.lane.b32.xlu1 %v1258_v41, %s3950_s23 }
 0x258   : > { %1285 = vrot.lane.b32.xlu0 %v4517_v1, %s3950_s23 }
 0x29a   : > { %v1266_v37 = vpop.permute.xlu1 %1265 }
 0x29e   : > { %v1282_v38 = vpop.permute.xlu1 %1281 }
 0x29f   : > { %v1298_v47 = vsel %vm4462_vm2, %v1266_v37, %v1282_v38 }
 0x2a0   : > { %v1306_v29 = vmin.f32 %v4479_v63, %v1298_v47  ;;  %v1314_v7 = vmax.f32 %v4479_v63, %v1298_v47 }
 0x2a2   : > { %v1264_v36 = vpop.permute.xlu0 %1263  ;;  %v4583_v55 = vsel %vm4575_vm8, %v1306_v29, %v1314_v7 }
 0x2a3   : > { %1335 = vrot.lane.b32.xlu1 %v4583_v55, %s3947_s21 }
 0x2a6   : > { %v1280_v61 = vpop.permute.xlu0 %1279  ;;  %v1274_v35 = vpop.permute.xlu1 %1273 }
 0x2a7   : > { %v1297_v51 = vsel %vm4462_vm2, %v1264_v36, %v1280_v61  ;;  %1351 = vrot.lane.b32.xlu1 %v4583_v55, %s3946_s17 }
 0x2a8   : > { %v1305_v52 = vmin.f32 %v4491_v2, %v1297_v51  ;;  %v1313_v21 = vmax.f32 %v4491_v2, %v1297_v51 }
 0x2aa   : > { %v1290_v58 = vpop.permute.xlu1 %1289  ;;  %v4595_v24 = vsel %vm4575_vm8, %v1305_v52, %v1313_v21 }
 0x2ab   : > { %v1302_v28 = vsel %vm4462_vm2, %v1274_v35, %v1290_v58  ;;  %1333 = vrot.lane.b32.xlu0 %v4595_v24, %s3947_s21 }
 0x2ac   : > { %v1310_v13 = vmin.f32 %v4499_v23, %v1302_v28  ;;  %v1318_v63 = vmax.f32 %v4499_v23, %v1302_v28 }
 0x2ae   : > { %v4605_v0 = vsel %vm4575_vm8, %v1310_v13, %v1318_v63 }
 0x2af   : > { %1349 = vrot.lane.b32.xlu0 %v4595_v24, %s3946_s17  ;;  %1343 = vrot.lane.b32.xlu1 %v4605_v0, %s3947_s21 }
 0x2b3   : > { %1359 = vrot.lane.b32.xlu1 %v4605_v0, %s3946_s17 }
 0x2b6   : > { %v1270_v33 = vpop.permute.xlu0 %1269 }
 0x2ba   : > { %v1268_v19 = vpop.permute.xlu0 %1267  ;;  %v1278_v53 = vpop.permute.xlu1 %1277 }
 0x2be   : > { %v1284_v54 = vpop.permute.xlu0 %1283  ;;  %v1276_v57 = vpop.permute.xlu1 %1275 }
 0x2bf   : > { %v1299_v48 = vsel %vm4462_vm2, %v1268_v19, %v1284_v54 }
 0x2c0   : > { %v1307_v27 = vmin.f32 %v4531_v40, %v1299_v48  ;;  %v1315_v30 = vmax.f32 %v4531_v40, %v1299_v48 }
 0x2c2   : > { %v1272_v59 = vpop.permute.xlu0 %1271  ;;  %v1292_v2 = vpop.permute.xlu1 %1291  ;;  %v4644_v50 = vsel %vm4575_vm8, %v1307_v27, %v1315_v30 }
 0x2c3   : > { %v1303_v56 = vsel %vm4462_vm2, %v1276_v57, %v1292_v2 }
 0x2c4   : > { %v1311_v49 = vmin.f32 %v4544_v46, %v1303_v56  ;;  %v1319_v17 = vmax.f32 %v4544_v46, %v1303_v56 }
 0x2c6   : > { %v1288_v3 = vpop.permute.xlu0 %1287  ;;  %v1294_v6 = vpop.permute.xlu1 %1293  ;;  %v1329_v43 = vsel %vm4575_vm8, %v1311_v49, %v1319_v17 }
 0x2c7   : > { %v1304_v25 = vsel %vm4462_vm2, %v1278_v53, %v1294_v6 }
 0x2c8   : > { %v1312_v20 = vmin.f32 %v1258_v41, %v1304_v25  ;;  %v1320_v23 = vmax.f32 %v1258_v41, %v1304_v25 }
 0x2ca   : > { %v1286_v18 = vpop.permute.xlu0 %1285  ;;  %v4621_v11 = vsel %vm4575_vm8, %v1312_v20, %v1320_v23 }
 0x2cb   : > { %v1300_v14 = vsel %vm4462_vm2, %v1270_v33, %v1286_v18  ;;  %1347 = vrot.lane.b32.xlu1 %v4621_v11, %s3947_s21 }
 0x2cc   : > { %v1308_v15 = vmin.f32 %v4517_v1, %v1300_v14  ;;  %v1316_v22 = vmax.f32 %v4517_v1, %v1300_v14  ;;  %v1301_v1 = vsel %vm4462_vm2, %v1272_v59, %v1288_v3 }
 0x2cd   : > { %v1309_v4 = vmin.f32 %v4552_v12, %v1301_v1  ;;  %v1317_v5 = vmax.f32 %v4552_v12, %v1301_v1 }
 0x2ce   : > { %v4635_v34 = vsel %vm4575_vm8, %v1308_v15, %v1316_v22  ;;  %v1399_v15 = vand.u32 8, %v4454_v60 }
 0x2cf   : > { %1339 = vrot.lane.b32.xlu0 %v4635_v34, %s3947_s21  ;;  %1345 = vrot.lane.b32.xlu1 %v1329_v43, %s3947_s21  ;;  %v4659_v8 = vsel %vm4575_vm8, %v1309_v4, %v1317_v5 }
 0x2d0   : > { %vm4771_vm11 = vcmp.eq.s32.totalorder %v1399_v15, 0 }
 0x2d1   : > { %vm1401_vm12 = vmxor %vm4771_vm11, %vm4564_vm6 }
 0x2d2   : > { %vm4782_vm13 = vmxor %vm1401_vm12, %vm3948_vm4 }
 0x2d3   : > { %1337 = vrot.lane.b32.xlu0 %v4644_v50, %s3947_s21  ;;  %1361 = vrot.lane.b32.xlu1 %v1329_v43, %s3946_s17  ;;  %vm1471_vm14 = vmxor %vm4771_vm11, %vm4462_vm2 }
 0x2d4   : > { %vm4887_vm15 = vmxor %vm1471_vm14, %vm3948_vm4 }
 0x2d5   : > { %vm1539_vm0 = vmxor %vm4771_vm11, %vm4458_vm1 }
 0x2d6   : > { %vm4992_vm3 = vmxor %vm1539_vm0, %vm3948_vm4 }
 0x2d7   : > { %1353 = vrot.lane.b32.xlu0 %v4644_v50, %s3946_s17  ;;  %1363 = vrot.lane.b32.xlu1 %v4621_v11, %s3946_s17 }
 0x2db   : > { %1341 = vrot.lane.b32.xlu0 %v4659_v8, %s3947_s21 }
 0x2df   : > { %1357 = vrot.lane.b32.xlu0 %v4659_v8, %s3946_s17 }
 0x2e3   : > { %1355 = vrot.lane.b32.xlu0 %v4635_v34, %s3946_s17 }
 0x315   : > { %v1336_v9 = vpop.permute.xlu1 %1335 }
 0x319   : > { %v1352_v10 = vpop.permute.xlu1 %1351 }
 0x31a   : > { %v1366_v31 = vsel %vm4458_vm1, %v1336_v9, %v1352_v10 }
 0x31b   : > { %v1374_v41 = vmin.f32 %v4583_v55, %v1366_v31  ;;  %v1382_v42 = vmax.f32 %v4583_v55, %v1366_v31 }
 0x31d   : > { %v1334_v44 = vpop.permute.xlu0 %1333  ;;  %v4682_v45 = vsel %vm4674_vm10, %v1374_v41, %v1382_v42 }
 0x31e   : > { %1405 = vrot.lane.b32.xlu1 %v4682_v45, %s3951_s24 }
 0x321   : > { %v1350_v46 = vpop.permute.xlu0 %1349  ;;  %v1344_v12 = vpop.permute.xlu1 %1343 }
 0x322   : > { %v1365_v16 = vsel %vm4458_vm1, %v1334_v44, %v1350_v46  ;;  %1421 = vrot.lane.b32.xlu1 %v4682_v45, %s3952_s25 }
 0x323   : > { %v1373_v37 = vmin.f32 %v4595_v24, %v1365_v16  ;;  %v1381_v38 = vmax.f32 %v4595_v24, %v1365_v16 }
 0x325   : > { %v1360_v47 = vpop.permute.xlu1 %1359  ;;  %v4694_v62 = vsel %vm4674_vm10, %v1373_v37, %v1381_v38 }
 0x326   : > { %v1370_v29 = vsel %vm4458_vm1, %v1344_v12, %v1360_v47  ;;  %1403 = vrot.lane.b32.xlu0 %v4694_v62, %s3951_s24 }
 0x327   : > { %v1378_v7 = vmin.f32 %v4605_v0, %v1370_v29  ;;  %v1386_v36 = vmax.f32 %v4605_v0, %v1370_v29 }
 0x329   : > { %v4704_v55 = vsel %vm4674_vm10, %v1378_v7, %v1386_v36 }
 0x32a   : > { %1419 = vrot.lane.b32.xlu0 %v4694_v62, %s3952_s25  ;;  %1413 = vrot.lane.b32.xlu1 %v4704_v55, %s3951_s24 }
 0x32e   : > { %1429 = vrot.lane.b32.xlu1 %v4704_v55, %s3952_s25 }
 0x33d   : > { %v1348_v61 = vpop.permute.xlu1 %1347 }
 0x341   : > { %v1340_v35 = vpop.permute.xlu0 %1339  ;;  %v1346_v51 = vpop.permute.xlu1 %1345 }
 0x345   : > { %v1338_v52 = vpop.permute.xlu0 %1337  ;;  %v1362_v21 = vpop.permute.xlu1 %1361 }
 0x346   : > { %v1371_v28 = vsel %vm4458_vm1, %v1346_v51, %v1362_v21 }
 0x347   : > { %v1379_v33 = vmin.f32 %v1329_v43, %v1371_v28  ;;  %v1387_v19 = vmax.f32 %v1329_v43, %v1371_v28 }
 0x349   : > { %v1354_v58 = vpop.permute.xlu0 %1353  ;;  %v1364_v24 = vpop.permute.xlu1 %1363  ;;  %v4726_v59 = vsel %vm4674_vm10, %v1379_v33, %v1387_v19 }
 0x34a   : > { %v1372_v13 = vsel %vm4458_vm1, %v1348_v61, %v1364_v24  ;;  %v1367_v3 = vsel %vm4458_vm1, %v1338_v52, %v1354_v58 }
 0x34b   : > { %v1380_v63 = vmin.f32 %v4621_v11, %v1372_v13  ;;  %v1388_v0 = vmax.f32 %v4621_v11, %v1372_v13  ;;  %v1375_v20 = vmin.f32 %v4644_v50, %v1367_v3  ;;  %v1383_v23 = vmax.f32 %v4644_v50, %v1367_v3 }
 0x34d   : > { %v1342_v53 = vpop.permute.xlu0 %1341  ;;  %v4720_v54 = vsel %vm4674_vm10, %v1380_v63, %v1388_v0  ;;  %v4750_v17 = vsel %vm4674_vm10, %v1375_v20, %v1383_v23 }
 0x34e   : > { %1417 = vrot.lane.b32.xlu1 %v4720_v54, %s3951_s24 }
 0x351   : > { %v1358_v57 = vpop.permute.xlu0 %1357 }
 0x352   : > { %1415 = vrot.lane.b32.xlu1 %v4726_v59, %s3951_s24  ;;  %v1369_v18 = vsel %vm4458_vm1, %v1342_v53, %v1358_v57 }
 0x353   : > { %v1377_v11 = vmin.f32 %v4659_v8, %v1369_v18  ;;  %v1385_v48 = vmax.f32 %v4659_v8, %v1369_v18 }
 0x355   : > { %v1356_v2 = vpop.permute.xlu0 %1355  ;;  %v4762_v14 = vsel %vm4674_vm10, %v1377_v11, %v1385_v48 }
 0x356   : > { %v1368_v6 = vsel %vm4458_vm1, %v1340_v35, %v1356_v2  ;;  %1431 = vrot.lane.b32.xlu1 %v4726_v59, %s3952_s25 }
 0x357   : > { %v1376_v56 = vmin.f32 %v4635_v34, %v1368_v6  ;;  %v1384_v25 = vmax.f32 %v4635_v34, %v1368_v6 }
 0x359   : > { %v4742_v49 = vsel %vm4674_vm10, %v1376_v56, %v1384_v25 }
 0x35a   : > { %1409 = vrot.lane.b32.xlu0 %v4742_v49, %s3951_s24  ;;  %1433 = vrot.lane.b32.xlu1 %v4720_v54, %s3952_s25 }
 0x35e   : > { %1407 = vrot.lane.b32.xlu0 %v4750_v17, %s3951_s24 }
 0x362   : > { %1423 = vrot.lane.b32.xlu0 %v4750_v17, %s3952_s25 }
 0x366   : > { %1411 = vrot.lane.b32.xlu0 %v4762_v14, %s3951_s24 }
 0x36a   : > { %1427 = vrot.lane.b32.xlu0 %v4762_v14, %s3952_s25 }
 0x36e   : > { %1425 = vrot.lane.b32.xlu0 %v4742_v49, %s3952_s25 }
 0x390   : > { %v1406_v27 = vpop.permute.xlu1 %1405 }
 0x394   : > { %v1422_v30 = vpop.permute.xlu1 %1421 }
 0x395   : > { %v1438_v34 = vsel %vm4564_vm6, %v1406_v27, %v1422_v30 }
 0x396   : > { %v1446_v50 = vmin.f32 %v4682_v45, %v1438_v34  ;;  %v1454_v1 = vmax.f32 %v4682_v45, %v1438_v34 }
 0x398   : > { %v1404_v4 = vpop.permute.xlu0 %1403  ;;  %v4790_v5 = vsel %vm4782_vm13, %v1446_v50, %v1454_v1 }
 0x399   : > { %1475 = vrot.lane.b32.xlu1 %v4790_v5, %s3949_s22 }
 0x39c   : > { %v1420_v8 = vpop.permute.xlu0 %1419  ;;  %v1414_v9 = vpop.permute.xlu1 %1413 }
 0x39d   : > { %v1437_v10 = vsel %vm4564_vm6, %v1404_v4, %v1420_v8  ;;  %1491 = vrot.lane.b32.xlu1 %v4790_v5, %s3950_s23 }
 0x39e   : > { %v1445_v31 = vmin.f32 %v4694_v62, %v1437_v10  ;;  %v1453_v40 = vmax.f32 %v4694_v62, %v1437_v10 }
 0x3a0   : > { %v1430_v41 = vpop.permute.xlu1 %1429  ;;  %v4802_v42 = vsel %vm4782_vm13, %v1445_v31, %v1453_v40 }
 0x3a1   : > { %v1442_v44 = vsel %vm4564_vm6, %v1414_v9, %v1430_v41  ;;  %1473 = vrot.lane.b32.xlu0 %v4802_v42, %s3949_s22 }
 0x3a2   : > { %v1450_v45 = vmin.f32 %v4704_v55, %v1442_v44  ;;  %v1458_v46 = vmax.f32 %v4704_v55, %v1442_v44 }
 0x3a4   : > { %v4812_v12 = vsel %vm4782_vm13, %v1450_v45, %v1458_v46 }
 0x3a5   : > { %1489 = vrot.lane.b32.xlu0 %v4802_v42, %s3950_s23  ;;  %1483 = vrot.lane.b32.xlu1 %v4812_v12, %s3949_s22 }
 0x3a9   : > { %1499 = vrot.lane.b32.xlu1 %v4812_v12, %s3950_s23 }
 0x3c0   : > { %v1418_v16 = vpop.permute.xlu1 %1417 }
 0x3c4   : > { %v1416_v37 = vpop.permute.xlu1 %1415 }
 0x3c8   : > { %v1432_v38 = vpop.permute.xlu1 %1431 }
 0x3c9   : > { %v1443_v29 = vsel %vm4564_vm6, %v1416_v37, %v1432_v38 }
 0x3ca   : > { %v1451_v61 = vmin.f32 %v4726_v59, %v1443_v29  ;;  %v1459_v35 = vmax.f32 %v4726_v59, %v1443_v29 }
 0x3cc   : > { %v1410_v47 = vpop.permute.xlu0 %1409  ;;  %v1434_v62 = vpop.permute.xlu1 %1433  ;;  %v4836_v58 = vsel %vm4782_vm13, %v1451_v61, %v1459_v35 }
 0x3cd   : > { %v1444_v7 = vsel %vm4564_vm6, %v1418_v16, %v1434_v62 }
 0x3ce   : > { %v1452_v36 = vmin.f32 %v4720_v54, %v1444_v7  ;;  %v1460_v55 = vmax.f32 %v4720_v54, %v1444_v7 }
 0x3d0   : > { %v1408_v51 = vpop.permute.xlu0 %1407  ;;  %v4830_v52 = vsel %vm4782_vm13, %v1452_v36, %v1460_v55 }
 0x3d1   : > { %1487 = vrot.lane.b32.xlu1 %v4830_v52, %s3949_s22 }
 0x3d4   : > { %v1424_v21 = vpop.permute.xlu0 %1423 }
 0x3d5   : > { %1485 = vrot.lane.b32.xlu1 %v4836_v58, %s3949_s22  ;;  %v1439_v63 = vsel %vm4564_vm6, %v1408_v51, %v1424_v21 }
 0x3d6   : > { %v1447_v53 = vmin.f32 %v4750_v17, %v1439_v63  ;;  %v1455_v54 = vmax.f32 %v4750_v17, %v1439_v63 }
 0x3d8   : > { %v1412_v24 = vpop.permute.xlu0 %1411  ;;  %v4860_v59 = vsel %vm4782_vm13, %v1447_v53, %v1455_v54 }
 0x3d9   : > { %1501 = vrot.lane.b32.xlu1 %v4836_v58, %s3950_s23 }
 0x3dc   : > { %v1428_v28 = vpop.permute.xlu0 %1427 }
 0x3dd   : > { %1503 = vrot.lane.b32.xlu1 %v4830_v52, %s3950_s23  ;;  %v1441_v2 = vsel %vm4564_vm6, %v1412_v24, %v1428_v28 }
 0x3de   : > { %v1449_v3 = vmin.f32 %v4762_v14, %v1441_v2  ;;  %v1457_v6 = vmax.f32 %v4762_v14, %v1441_v2 }
 0x3e0   : > { %v1426_v13 = vpop.permute.xlu0 %1425  ;;  %v4872_v56 = vsel %vm4782_vm13, %v1449_v3, %v1457_v6 }
 0x3e1   : > { %v1440_v0 = vsel %vm4564_vm6, %v1410_v47, %v1426_v13 }
 0x3e2   : > { %v1448_v33 = vmin.f32 %v4742_v49, %v1440_v0  ;;  %v1456_v19 = vmax.f32 %v4742_v49, %v1440_v0 }
 0x3e4   : > { %v4854_v57 = vsel %vm4782_vm13, %v1448_v33, %v1456_v19 }
 0x3e5   : > { %1479 = vrot.lane.b32.xlu0 %v4854_v57, %s3949_s22 }
 0x3e9   : > { %1477 = vrot.lane.b32.xlu0 %v4860_v59, %s3949_s22 }
 0x3ed   : > { %1493 = vrot.lane.b32.xlu0 %v4860_v59, %s3950_s23 }
 0x3f1   : > { %1481 = vrot.lane.b32.xlu0 %v4872_v56, %s3949_s22 }
 0x3f5   : > { %1497 = vrot.lane.b32.xlu0 %v4872_v56, %s3950_s23 }
 0x3f9   : > { %1495 = vrot.lane.b32.xlu0 %v4854_v57, %s3950_s23 }
 0x40b   : > { %v1476_v25 = vpop.permute.xlu1 %1475 }
 0x40f   : > { %v1492_v20 = vpop.permute.xlu1 %1491 }
 0x410   : > { %v1506_v23 = vsel %vm4462_vm2, %v1476_v25, %v1492_v20 }
 0x411   : > { %v1514_v17 = vmin.f32 %v4790_v5, %v1506_v23  ;;  %v1522_v18 = vmax.f32 %v4790_v5, %v1506_v23 }
 0x413   : > { %v1474_v11 = vpop.permute.xlu0 %1473  ;;  %v4895_v48 = vsel %vm4887_vm15, %v1514_v17, %v1522_v18 }
 0x414   : > { %1543 = vrot.lane.b32.xlu1 %v4895_v48, %s3947_s21 }
 0x417   : > { %v1490_v14 = vpop.permute.xlu0 %1489  ;;  %v1484_v15 = vpop.permute.xlu1 %1483 }
 0x418   : > { %v1505_v27 = vsel %vm4462_vm2, %v1474_v11, %v1490_v14  ;;  %1559 = vrot.lane.b32.xlu1 %v4895_v48, %s3946_s17 }
 0x419   : > { %v1513_v30 = vmin.f32 %v4802_v42, %v1505_v27  ;;  %v1521_v34 = vmax.f32 %v4802_v42, %v1505_v27 }
 0x41b   : > { %v1500_v43 = vpop.permute.xlu1 %1499  ;;  %v4907_v50 = vsel %vm4887_vm15, %v1513_v30, %v1521_v34 }
 0x41c   : > { %v1510_v1 = vsel %vm4462_vm2, %v1484_v15, %v1500_v43  ;;  %1541 = vrot.lane.b32.xlu0 %v4907_v50, %s3947_s21 }
 0x41d   : > { %v1518_v4 = vmin.f32 %v4812_v12, %v1510_v1  ;;  %v1526_v5 = vmax.f32 %v4812_v12, %v1510_v1 }
 0x41f   : > { %v4917_v8 = vsel %vm4887_vm15, %v1518_v4, %v1526_v5 }
 0x420   : > { %1557 = vrot.lane.b32.xlu0 %v4907_v50, %s3946_s17  ;;  %1551 = vrot.lane.b32.xlu1 %v4917_v8, %s3947_s21 }
 0x424   : > { %1567 = vrot.lane.b32.xlu1 %v4917_v8, %s3946_s17 }
 0x443   : > { %v1488_v9 = vpop.permute.xlu1 %1487 }
 0x447   : > { %v1486_v10 = vpop.permute.xlu1 %1485 }
 0x44b   : > { %v1502_v31 = vpop.permute.xlu1 %1501 }
 0x44c   : > { %v1511_v41 = vsel %vm4462_vm2, %v1486_v10, %v1502_v31 }
 0x44d   : > { %v1519_v46 = vmin.f32 %v4836_v58, %v1511_v41  ;;  %v1527_v12 = vmax.f32 %v4836_v58, %v1511_v41 }
 0x44f   : > { %v1504_v40 = vpop.permute.xlu1 %1503  ;;  %v4941_v38 = vsel %vm4887_vm15, %v1519_v46, %v1527_v12 }
 0x450   : > { %v1512_v42 = vsel %vm4462_vm2, %v1488_v9, %v1504_v40 }
 0x451   : > { %v1520_v44 = vmin.f32 %v4830_v52, %v1512_v42  ;;  %v1528_v45 = vmax.f32 %v4830_v52, %v1512_v42 }
 0x453   : > { %v4935_v16 = vsel %vm4887_vm15, %v1520_v44, %v1528_v45 }
 0x454   : > { %1555 = vrot.lane.b32.xlu1 %v4935_v16, %s3947_s21 }
 0x457   : > { %v1480_v37 = vpop.permute.xlu0 %1479 }
 0x458   : > { %1553 = vrot.lane.b32.xlu1 %v4941_v38, %s3947_s21 }
 0x45b   : > { %v1478_v47 = vpop.permute.xlu0 %1477 }
 0x45c   : > { %1569 = vrot.lane.b32.xlu1 %v4941_v38, %s3946_s17 }
 0x45f   : > { %v1494_v62 = vpop.permute.xlu0 %1493 }
 0x460   : > { %1571 = vrot.lane.b32.xlu1 %v4935_v16, %s3946_s17  ;;  %v1507_v55 = vsel %vm4462_vm2, %v1478_v47, %v1494_v62 }
 0x461   : > { %v1515_v52 = vmin.f32 %v4860_v59, %v1507_v55  ;;  %v1523_v21 = vmax.f32 %v4860_v59, %v1507_v55 }
 0x463   : > { %v1482_v29 = vpop.permute.xlu0 %1481  ;;  %v4965_v24 = vsel %vm4887_vm15, %v1515_v52, %v1523_v21 }
 0x467   : > { %v1498_v7 = vpop.permute.xlu0 %1497 }
 0x468   : > { %v1509_v28 = vsel %vm4462_vm2, %v1482_v29, %v1498_v7  ;;  %v1607_v29 = vand.u32 16, %v4454_v60 }
 0x469   : > { %v1517_v13 = vmin.f32 %v4872_v56, %v1509_v28  ;;  %v1525_v63 = vmax.f32 %v4872_v56, %v1509_v28 }
 0x46a   : > { %vm5077_vm5 = vcmp.eq.s32.totalorder %v1607_v29, 0 }
 0x46b   : > { %v1496_v36 = vpop.permute.xlu0 %1495  ;;  %v4977_v0 = vsel %vm4887_vm15, %v1517_v13, %v1525_v63  ;;  %vm1609_vm7 = vmxor %vm5077_vm5, %vm4771_vm11 }
 0x46c   : > { %v1508_v61 = vsel %vm4462_vm2, %v1480_v37, %v1496_v36  ;;  %vm5096_vm8 = vmxor %vm1609_vm7, %vm3948_vm4 }
 0x46d   : > { %v1516_v35 = vmin.f32 %v4854_v57, %v1508_v61  ;;  %v1524_v51 = vmax.f32 %v4854_v57, %v1508_v61  ;;  %vm1679_vm9 = vmxor %vm5077_vm5, %vm4564_vm6 }
 0x46e   : > { %vm5163_vm10 = vmxor %vm1679_vm9, %vm3948_vm4 }
 0x46f   : > { %v4959_v58 = vsel %vm4887_vm15, %v1516_v35, %v1524_v51  ;;  %vm1747_vm12 = vmxor %vm5077_vm5, %vm4462_vm2 }
 0x470   : > { %1547 = vrot.lane.b32.xlu0 %v4959_v58, %s3947_s21  ;;  %vm5256_vm13 = vmxor %vm1747_vm12, %vm3948_vm4 }
 0x471   : > { %vm1815_vm14 = vmxor %vm5077_vm5, %vm4458_vm1 }
 0x472   : > { %vm5357_vm15 = vmxor %vm1815_vm14, %vm3948_vm4 }
 0x474   : > { %1545 = vrot.lane.b32.xlu0 %v4965_v24, %s3947_s21 }
 0x478   : > { %1561 = vrot.lane.b32.xlu0 %v4965_v24, %s3946_s17 }
 0x47c   : > { %1549 = vrot.lane.b32.xlu0 %v4977_v0, %s3947_s21 }
 0x480   : > { %1565 = vrot.lane.b32.xlu0 %v4977_v0, %s3946_s17 }
 0x484   : > { %1563 = vrot.lane.b32.xlu0 %v4959_v58, %s3946_s17 }
 0x486   : > { %v1544_v33 = vpop.permute.xlu1 %1543 }
 0x48a   : > { %v1560_v19 = vpop.permute.xlu1 %1559 }
 0x48b   : > { %v1574_v53 = vsel %vm4458_vm1, %v1544_v33, %v1560_v19 }
 0x48c   : > { %v1582_v57 = vmin.f32 %v4895_v48, %v1574_v53  ;;  %v1590_v59 = vmax.f32 %v4895_v48, %v1574_v53 }
 0x48e   : > { %v1542_v2 = vpop.permute.xlu0 %1541  ;;  %v5000_v3 = vsel %vm4992_vm3, %v1582_v57, %v1590_v59 }
 0x48f   : > { %1613 = vrot.lane.b32.xlu1 %v5000_v3, %s3953_s26 }
 0x492   : > { %v1558_v6 = vpop.permute.xlu0 %1557  ;;  %v1552_v56 = vpop.permute.xlu1 %1551 }
 0x493   : > { %v1573_v25 = vsel %vm4458_vm1, %v1542_v2, %v1558_v6  ;;  %1629 = vrot.lane.b32.xlu1 %v5000_v3, %s3954_s27 }
 0x494   : > { %v1581_v20 = vmin.f32 %v4907_v50, %v1573_v25  ;;  %v1589_v23 = vmax.f32 %v4907_v50, %v1573_v25 }
 0x496   : > { %v1568_v49 = vpop.permute.xlu1 %1567  ;;  %v5012_v17 = vsel %vm4992_vm3, %v1581_v20, %v1589_v23 }
 0x497   : > { %v1578_v18 = vsel %vm4458_vm1, %v1552_v56, %v1568_v49  ;;  %1611 = vrot.lane.b32.xlu0 %v5012_v17, %s3953_s26 }
 0x498   : > { %v1586_v11 = vmin.f32 %v4917_v8, %v1578_v18  ;;  %v1594_v48 = vmax.f32 %v4917_v8, %v1578_v18 }
 0x49a   : > { %v5022_v14 = vsel %vm4992_vm3, %v1586_v11, %v1594_v48 }
 0x49b   : > { %1627 = vrot.lane.b32.xlu0 %v5012_v17, %s3954_s27  ;;  %1621 = vrot.lane.b32.xlu1 %v5022_v14, %s3953_s26 }
 0x49f   : > { %1637 = vrot.lane.b32.xlu1 %v5022_v14, %s3954_s27 }
 0x4c6   : > { %v1556_v15 = vpop.permute.xlu1 %1555 }
 0x4ca   : > { %v1554_v27 = vpop.permute.xlu1 %1553 }
 0x4ce   : > { %v1570_v30 = vpop.permute.xlu1 %1569 }
 0x4cf   : > { %v1579_v43 = vsel %vm4458_vm1, %v1554_v27, %v1570_v30 }
 0x4d0   : > { %v1587_v5 = vmin.f32 %v4941_v38, %v1579_v43  ;;  %v1595_v8 = vmax.f32 %v4941_v38, %v1579_v43 }
 0x4d2   : > { %v1572_v34 = vpop.permute.xlu1 %1571  ;;  %v5046_v10 = vsel %vm4992_vm3, %v1587_v5, %v1595_v8 }
 0x4d3   : > { %v1580_v50 = vsel %vm4458_vm1, %v1556_v15, %v1572_v34 }
 0x4d4   : > { %v1588_v1 = vmin.f32 %v4935_v16, %v1580_v50  ;;  %v1596_v4 = vmax.f32 %v4935_v16, %v1580_v50 }
 0x4d6   : > { %v5040_v9 = vsel %vm4992_vm3, %v1588_v1, %v1596_v4 }
 0x4d7   : > { %1625 = vrot.lane.b32.xlu1 %v5040_v9, %s3953_s26 }
 0x4db   : > { %1623 = vrot.lane.b32.xlu1 %v5046_v10, %s3953_s26 }
 0x4df   : > { %1639 = vrot.lane.b32.xlu1 %v5046_v10, %s3954_s27 }
 0x4e2   : > { %v1548_v31 = vpop.permute.xlu0 %1547 }
 0x4e3   : > { %1641 = vrot.lane.b32.xlu1 %v5040_v9, %s3954_s27 }
 0x4e6   : > { %v1546_v40 = vpop.permute.xlu0 %1545 }
 0x4ea   : > { %v1562_v41 = vpop.permute.xlu0 %1561 }
 0x4eb   : > { %v1575_v46 = vsel %vm4458_vm1, %v1546_v40, %v1562_v41 }
 0x4ec   : > { %v1583_v38 = vmin.f32 %v4965_v24, %v1575_v46  ;;  %v1591_v47 = vmax.f32 %v4965_v24, %v1575_v46 }
 0x4ee   : > { %v1550_v42 = vpop.permute.xlu0 %1549  ;;  %v5071_v7 = vsel %vm4992_vm3, %v1583_v38, %v1591_v47 }
 0x4f2   : > { %v1566_v44 = vpop.permute.xlu0 %1565 }
 0x4f3   : > { %v1577_v36 = vsel %vm4458_vm1, %v1550_v42, %v1566_v44 }
 0x4f4   : > { %v1585_v35 = vmin.f32 %v4977_v0, %v1577_v36  ;;  %v1593_v51 = vmax.f32 %v4977_v0, %v1577_v36 }
 0x4f6   : > { %v1564_v45 = vpop.permute.xlu0 %1563 }
 0x4f7   : > { %v1576_v12 = vsel %vm4458_vm1, %v1548_v31, %v1564_v45 }
 0x4f8   : > { %v1584_v16 = vmin.f32 %v4959_v58, %v1576_v12  ;;  %v1592_v37 = vmax.f32 %v4959_v58, %v1576_v12  ;;  %v5093_v58 = vsel %vm4992_vm3, %v1585_v35, %v1593_v51 }
 0x4fa   : > { %v5064_v62 = vsel %vm4992_vm3, %v1584_v16, %v1592_v37 }
 0x4fb   : > { %1617 = vrot.lane.b32.xlu0 %v5064_v62, %s3953_s26 }
 0x4ff   : > { %1615 = vrot.lane.b32.xlu0 %v5071_v7, %s3953_s26 }
 0x501   : > { %v1614_v61 = vpop.permute.xlu1 %1613 }
 0x503   : > { %1631 = vrot.lane.b32.xlu0 %v5071_v7, %s3954_s27 }
 0x505   : > { %v1630_v52 = vpop.permute.xlu1 %1629 }
 0x506   : > { %v1646_v21 = vsel %vm4771_vm11, %v1614_v61, %v1630_v52 }
 0x507   : > { %v1654_v28 = vmin.f32 %v5000_v3, %v1646_v21  ;;  %v1662_v13 = vmax.f32 %v5000_v3, %v1646_v21  ;;  %1619 = vrot.lane.b32.xlu0 %v5093_v58, %s3953_s26 }
 0x509   : > { %v1612_v63 = vpop.permute.xlu0 %1611  ;;  %v1672_v0 = vsel %vm5096_vm8, %v1654_v28, %v1662_v13 }
 0x50a   : > { %1683 = vrot.lane.b32.xlu1 %v1672_v0, %s3951_s24 }
 0x50b   : > { %1635 = vrot.lane.b32.xlu0 %v5093_v58, %s3954_s27 }
 0x50d   : > { %v1628_v33 = vpop.permute.xlu0 %1627  ;;  %v1622_v19 = vpop.permute.xlu1 %1621 }
 0x50e   : > { %v1645_v53 = vsel %vm4771_vm11, %v1612_v63, %v1628_v33  ;;  %1699 = vrot.lane.b32.xlu1 %v1672_v0, %s3952_s25 }
 0x50f   : > { %v1653_v54 = vmin.f32 %v5012_v17, %v1645_v53  ;;  %v1661_v57 = vmax.f32 %v5012_v17, %v1645_v53  ;;  %1633 = vrot.lane.b32.xlu0 %v5064_v62, %s3954_s27 }
 0x511   : > { %v1638_v59 = vpop.permute.xlu1 %1637  ;;  %v5118_v2 = vsel %vm5096_vm8, %v1653_v54, %v1661_v57 }
 0x512   : > { %v1650_v3 = vsel %vm4771_vm11, %v1622_v19, %v1638_v59 }
 0x513   : > { %v1658_v6 = vmin.f32 %v5022_v14, %v1650_v3  ;;  %v1666_v56 = vmax.f32 %v5022_v14, %v1650_v3  ;;  %1681 = vrot.lane.b32.xlu0 %v5118_v2, %s3951_s24 }
 0x515   : > { %v1676_v25 = vsel %vm5096_vm8, %v1658_v6, %v1666_v56 }
 0x516   : > { %1691 = vrot.lane.b32.xlu1 %v1676_v25, %s3951_s24 }
 0x517   : > { %1697 = vrot.lane.b32.xlu0 %v5118_v2, %s3952_s25 }
 0x51a   : > { %1707 = vrot.lane.b32.xlu1 %v1676_v25, %s3952_s25 }
 0x549   : > { %v1626_v20 = vpop.permute.xlu1 %1625 }
 0x54d   : > { %v1624_v23 = vpop.permute.xlu1 %1623 }
 0x551   : > { %v1640_v49 = vpop.permute.xlu1 %1639 }
 0x552   : > { %v1651_v18 = vsel %vm4771_vm11, %v1624_v23, %v1640_v49 }
 0x553   : > { %v1659_v15 = vmin.f32 %v5046_v10, %v1651_v18  ;;  %v1667_v27 = vmax.f32 %v5046_v10, %v1651_v18 }
 0x555   : > { %v1642_v17 = vpop.permute.xlu1 %1641  ;;  %v5148_v34 = vsel %vm5096_vm8, %v1659_v15, %v1667_v27 }
 0x556   : > { %v1652_v11 = vsel %vm4771_vm11, %v1626_v20, %v1642_v17 }
 0x557   : > { %v1660_v48 = vmin.f32 %v5040_v9, %v1652_v11  ;;  %v1668_v14 = vmax.f32 %v5040_v9, %v1652_v11 }
 0x559   : > { %v5142_v30 = vsel %vm5096_vm8, %v1660_v48, %v1668_v14 }
 0x55a   : > { %1695 = vrot.lane.b32.xlu1 %v5142_v30, %s3951_s24 }
 0x55e   : > { %1693 = vrot.lane.b32.xlu1 %v5148_v34, %s3951_s24 }
 0x562   : > { %1709 = vrot.lane.b32.xlu1 %v5148_v34, %s3952_s25 }
 0x566   : > { %1711 = vrot.lane.b32.xlu1 %v5142_v30, %s3952_s25 }
 0x56d   : > { %v1618_v43 = vpop.permute.xlu0 %1617 }
 0x571   : > { %v1616_v50 = vpop.permute.xlu0 %1615 }
 0x575   : > { %v1632_v1 = vpop.permute.xlu0 %1631 }
 0x576   : > { %v1647_v41 = vsel %vm4771_vm11, %v1616_v50, %v1632_v1 }
 0x577   : > { %v1655_v37 = vmin.f32 %v5071_v7, %v1647_v41  ;;  %v1663_v38 = vmax.f32 %v5071_v7, %v1647_v41 }
 0x579   : > { %v1620_v4 = vpop.permute.xlu0 %1619 }
 0x57c   : > { %v1684_v5 = vpop.permute.xlu1 %1683 }
 0x57d   : > { %v1636_v8 = vpop.permute.xlu0 %1635 }
 0x57e   : > { %v1649_v36 = vsel %vm4771_vm11, %v1620_v4, %v1636_v8 }
 0x57f   : > { %v1657_v61 = vmin.f32 %v5093_v58, %v1649_v36  ;;  %v1665_v35 = vmax.f32 %v5093_v58, %v1649_v36 }
 0x580   : > { %v1700_v9 = vpop.permute.xlu1 %1699 }
 0x581   : > { %v1714_v10 = vsel %vm4564_vm6, %v1684_v5, %v1700_v9  ;;  %v1634_v31 = vpop.permute.xlu0 %1633  ;;  %v5204_v63 = vsel %vm5096_vm8, %v1657_v61, %v1665_v35 }
 0x582   : > { %v1722_v42 = vmin.f32 %v1672_v0, %v1714_v10  ;;  %v1730_v44 = vmax.f32 %v1672_v0, %v1714_v10  ;;  %v1648_v45 = vsel %vm4771_vm11, %v1618_v43, %v1634_v31 }
 0x583   : > { %v1656_v46 = vmin.f32 %v5064_v62, %v1648_v45  ;;  %v1664_v12 = vmax.f32 %v5064_v62, %v1648_v45  ;;  %v5187_v62 = vsel %vm5096_vm8, %v1655_v37, %v1663_v38 }
 0x584   : > { %v1740_v16 = vsel %vm5163_vm10, %v1722_v42, %v1730_v44 }
 0x585   : > { %1751 = vrot.lane.b32.xlu1 %v1740_v16, %s3949_s22  ;;  %v5180_v47 = vsel %vm5096_vm8, %v1656_v46, %v1664_v12  ;;  %v1682_v51 = vpop.permute.xlu0 %1681 }
 0x586   : > { %1687 = vrot.lane.b32.xlu0 %v5180_v47, %s3951_s24 }
 0x588   : > { %v1692_v29 = vpop.permute.xlu1 %1691 }
 0x589   : > { %1767 = vrot.lane.b32.xlu1 %v1740_v16, %s3950_s23  ;;  %v1698_v58 = vpop.permute.xlu0 %1697 }
 0x58a   : > { %1685 = vrot.lane.b32.xlu0 %v5187_v62, %s3951_s24  ;;  %v1713_v0 = vsel %vm4564_vm6, %v1682_v51, %v1698_v58 }
 0x58b   : > { %v1721_v33 = vmin.f32 %v5118_v2, %v1713_v0  ;;  %v1729_v19 = vmax.f32 %v5118_v2, %v1713_v0 }
 0x58c   : > { %v1708_v7 = vpop.permute.xlu1 %1707 }
 0x58d   : > { %v1718_v52 = vsel %vm4564_vm6, %v1692_v29, %v1708_v7  ;;  %v5219_v24 = vsel %vm5163_vm10, %v1721_v33, %v1729_v19 }
 0x58e   : > { %v1726_v21 = vmin.f32 %v1676_v25, %v1718_v52  ;;  %v1734_v28 = vmax.f32 %v1676_v25, %v1718_v52  ;;  %1701 = vrot.lane.b32.xlu0 %v5187_v62, %s3952_s25 }
 0x590   : > { %v1744_v13 = vsel %vm5163_vm10, %v1726_v21, %v1734_v28 }
 0x591   : > { %1759 = vrot.lane.b32.xlu1 %v1744_v13, %s3949_s22 }
 0x592   : > { %1689 = vrot.lane.b32.xlu0 %v5204_v63, %s3951_s24 }
 0x595   : > { %1775 = vrot.lane.b32.xlu1 %v1744_v13, %s3950_s23 }
 0x596   : > { %1705 = vrot.lane.b32.xlu0 %v5204_v63, %s3952_s25 }
 0x59a   : > { %1703 = vrot.lane.b32.xlu0 %v5180_v47, %s3952_s25 }
 0x59e   : > { %1749 = vrot.lane.b32.xlu0 %v5219_v24, %s3949_s22 }
 0x5a2   : > { %1765 = vrot.lane.b32.xlu0 %v5219_v24, %s3950_s23 }
 0x5cc   : > { %v1696_v53 = vpop.permute.xlu1 %1695 }
 0x5d0   : > { %v1694_v54 = vpop.permute.xlu1 %1693 }
 0x5d4   : > { %v1710_v57 = vpop.permute.xlu1 %1709 }
 0x5d5   : > { %v1719_v2 = vsel %vm4564_vm6, %v1694_v54, %v1710_v57 }
 0x5d6   : > { %v1727_v25 = vmin.f32 %v5148_v34, %v1719_v2  ;;  %v1735_v20 = vmax.f32 %v5148_v34, %v1719_v2 }
 0x5d8   : > { %v1712_v59 = vpop.permute.xlu1 %1711  ;;  %v5241_v49 = vsel %vm5163_vm10, %v1727_v25, %v1735_v20 }
 0x5d9   : > { %v1720_v3 = vsel %vm4564_vm6, %v1696_v53, %v1712_v59 }
 0x5da   : > { %v1728_v6 = vmin.f32 %v5142_v30, %v1720_v3  ;;  %v1736_v56 = vmax.f32 %v5142_v30, %v1720_v3 }
 0x5dc   : > { %v5235_v23 = vsel %vm5163_vm10, %v1728_v6, %v1736_v56 }
 0x5dd   : > { %1763 = vrot.lane.b32.xlu1 %v5235_v23, %s3949_s22 }
 0x5e1   : > { %1761 = vrot.lane.b32.xlu1 %v5241_v49, %s3949_s22 }
 0x5e5   : > { %1777 = vrot.lane.b32.xlu1 %v5241_v49, %s3950_s23 }
 0x5e9   : > { %1779 = vrot.lane.b32.xlu1 %v5235_v23, %s3950_s23 }
 0x5f7   : > { %v1752_v17 = vpop.permute.xlu1 %1751 }
 0x5f8   : > { %v1688_v18 = vpop.permute.xlu0 %1687 }
 0x5fb   : > { %v1768_v11 = vpop.permute.xlu1 %1767 }
 0x5fc   : > { %v1782_v48 = vsel %vm4462_vm2, %v1752_v17, %v1768_v11  ;;  %v1686_v14 = vpop.permute.xlu0 %1685 }
 0x5fd   : > { %v1790_v27 = vmin.f32 %v1740_v16, %v1782_v48  ;;  %v1798_v30 = vmax.f32 %v1740_v16, %v1782_v48 }
 0x5ff   : > { %v5262_v34 = vsel %vm5256_vm13, %v1790_v27, %v1798_v30 }
 0x600   : > { %v1702_v43 = vpop.permute.xlu0 %1701  ;;  %1819 = vrot.lane.b32.xlu1 %v5262_v34, %s3947_s21 }
 0x601   : > { %v1715_v42 = vsel %vm4564_vm6, %v1686_v14, %v1702_v43 }
 0x602   : > { %v1723_v12 = vmin.f32 %v5187_v62, %v1715_v42  ;;  %v1731_v16 = vmax.f32 %v5187_v62, %v1715_v42 }
 0x603   : > { %v1760_v50 = vpop.permute.xlu1 %1759 }
 0x604   : > { %v1690_v1 = vpop.permute.xlu0 %1689  ;;  %1835 = vrot.lane.b32.xlu1 %v5262_v34, %s3946_s17  ;;  %v5294_v38 = vsel %vm5163_vm10, %v1723_v12, %v1731_v16 }
 0x607   : > { %v1776_v4 = vpop.permute.xlu1 %1775 }
 0x608   : > { %v1786_v5 = vsel %vm4462_vm2, %v1760_v50, %v1776_v4  ;;  %v1706_v8 = vpop.permute.xlu0 %1705 }
 0x609   : > { %v1794_v9 = vmin.f32 %v1744_v13, %v1786_v5  ;;  %v1802_v10 = vmax.f32 %v1744_v13, %v1786_v5 }
 0x60b   : > { %v5272_v31 = vsel %vm5256_vm13, %v1794_v9, %v1802_v10 }
 0x60c   : > { %v1704_v41 = vpop.permute.xlu0 %1703  ;;  %1827 = vrot.lane.b32.xlu1 %v5272_v31, %s3947_s21 }
 0x60d   : > { %v1716_v44 = vsel %vm4564_vm6, %v1688_v18, %v1704_v41 }
 0x60e   : > { %v1724_v45 = vmin.f32 %v5180_v47, %v1716_v44  ;;  %v1732_v46 = vmax.f32 %v5180_v47, %v1716_v44  ;;  %v1717_v47 = vsel %vm4564_vm6, %v1690_v1, %v1706_v8 }
 0x60f   : > { %v1725_v29 = vmin.f32 %v5204_v63, %v1717_v47  ;;  %v1733_v62 = vmax.f32 %v5204_v63, %v1717_v47 }
 0x610   : > { %1843 = vrot.lane.b32.xlu1 %v5272_v31, %s3946_s17  ;;  %v5288_v37 = vsel %vm5163_vm10, %v1724_v45, %v1732_v46  ;;  %v1750_v36 = vpop.permute.xlu0 %1749 }
 0x611   : > { %1755 = vrot.lane.b32.xlu0 %v5288_v37, %s3949_s22  ;;  %v5306_v7 = vsel %vm5163_vm10, %v1725_v29, %v1733_v62 }
 0x614   : > { %v1766_v61 = vpop.permute.xlu0 %1765 }
 0x615   : > { %1753 = vrot.lane.b32.xlu0 %v5294_v38, %s3949_s22  ;;  %v1781_v35 = vsel %vm4462_vm2, %v1750_v36, %v1766_v61 }
 0x616   : > { %v1789_v51 = vmin.f32 %v5219_v24, %v1781_v35  ;;  %v1797_v52 = vmax.f32 %v5219_v24, %v1781_v35 }
 0x618   : > { %v5320_v40 = vsel %vm5256_vm13, %v1789_v51, %v1797_v52 }
 0x619   : > { %1769 = vrot.lane.b32.xlu0 %v5294_v38, %s3950_s23 }
 0x61d   : > { %1757 = vrot.lane.b32.xlu0 %v5306_v7, %s3949_s22 }
 0x621   : > { %1773 = vrot.lane.b32.xlu0 %v5306_v7, %s3950_s23 }
 0x625   : > { %1771 = vrot.lane.b32.xlu0 %v5288_v37, %s3950_s23 }
 0x629   : > { %1817 = vrot.lane.b32.xlu0 %v5320_v40, %s3947_s21 }
 0x62d   : > { %1833 = vrot.lane.b32.xlu0 %v5320_v40, %s3946_s17 }
 0x64f   : > { %v1764_v21 = vpop.permute.xlu1 %1763 }
 0x653   : > { %v1762_v28 = vpop.permute.xlu1 %1761 }
 0x657   : > { %v1778_v13 = vpop.permute.xlu1 %1777 }
 0x658   : > { %v1787_v58 = vsel %vm4462_vm2, %v1762_v28, %v1778_v13 }
 0x659   : > { %v1795_v24 = vmin.f32 %v5241_v49, %v1787_v58  ;;  %v1803_v53 = vmax.f32 %v5241_v49, %v1787_v58 }
 0x65b   : > { %v1780_v63 = vpop.permute.xlu1 %1779  ;;  %v5342_v57 = vsel %vm5256_vm13, %v1795_v24, %v1803_v53 }
 0x65c   : > { %v1788_v0 = vsel %vm4462_vm2, %v1764_v21, %v1780_v63  ;;  %v1883_v63 = vand.u32 32, %v4454_v60 }
 0x65d   : > { %v1796_v33 = vmin.f32 %v5235_v23, %v1788_v0  ;;  %v1804_v19 = vmax.f32 %v5235_v23, %v1788_v0 }
 0x65e   : > { %vm5454_vm0 = vcmp.eq.s32.totalorder %v1883_v63, 0 }
 0x65f   : > { %v5336_v54 = vsel %vm5256_vm13, %v1796_v33, %v1804_v19  ;;  %vm1885_vm3 = vmxor %vm5454_vm0, %vm5077_vm5 }
 0x660   : > { %1831 = vrot.lane.b32.xlu1 %v5336_v54, %s3947_s21  ;;  %vm5467_vm7 = vmxor %vm1885_vm3, %vm3948_vm4 }
 0x661   : > { %vm1955_vm8 = vmxor %vm5454_vm0, %vm4771_vm11 }
 0x662   : > { %vm5574_vm9 = vmxor %vm1955_vm8, %vm3948_vm4 }
 0x663   : > { %vm2023_vm10 = vmxor %vm5454_vm0, %vm4564_vm6 }
 0x664   : > { %1829 = vrot.lane.b32.xlu1 %v5342_v57, %s3947_s21  ;;  %vm5679_vm12 = vmxor %vm2023_vm10, %vm3948_vm4 }
 0x668   : > { %1845 = vrot.lane.b32.xlu1 %v5342_v57, %s3946_s17 }
 0x66c   : > { %1847 = vrot.lane.b32.xlu1 %v5336_v54, %s3946_s17 }
 0x672   : > { %v1820_v59 = vpop.permute.xlu1 %1819 }
 0x676   : > { %v1836_v2 = vpop.permute.xlu1 %1835 }
 0x677   : > { %v1850_v3 = vsel %vm4458_vm1, %v1820_v59, %v1836_v2 }
 0x678   : > { %v1858_v56 = vmin.f32 %v5262_v34, %v1850_v3  ;;  %v1866_v25 = vmax.f32 %v5262_v34, %v1850_v3 }
 0x67a   : > { %v5365_v20 = vsel %vm5357_vm15, %v1858_v56, %v1866_v25 }
 0x67b   : > { %1889 = vrot.lane.b32.xlu1 %v5365_v20, %s3955_s28 }
 0x67e   : > { %v1828_v23 = vpop.permute.xlu1 %1827 }
 0x67f   : > { %1905 = vrot.lane.b32.xlu1 %v5365_v20, %s3956_s29 }
 0x682   : > { %v1844_v49 = vpop.permute.xlu1 %1843 }
 0x683   : > { %v1854_v17 = vsel %vm4458_vm1, %v1828_v23, %v1844_v49  ;;  %v1756_v18 = vpop.permute.xlu0 %1755 }
 0x684   : > { %v1862_v11 = vmin.f32 %v5272_v31, %v1854_v17  ;;  %v1870_v48 = vmax.f32 %v5272_v31, %v1854_v17 }
 0x686   : > { %v5377_v14 = vsel %vm5357_vm15, %v1862_v11, %v1870_v48 }
 0x687   : > { %v1754_v27 = vpop.permute.xlu0 %1753  ;;  %1897 = vrot.lane.b32.xlu1 %v5377_v14, %s3955_s28 }
 0x68b   : > { %v1770_v30 = vpop.permute.xlu0 %1769  ;;  %1913 = vrot.lane.b32.xlu1 %v5377_v14, %s3956_s29 }
 0x68c   : > { %v1783_v1 = vsel %vm4462_vm2, %v1754_v27, %v1770_v30 }
 0x68d   : > { %v1791_v9 = vmin.f32 %v5294_v38, %v1783_v1  ;;  %v1799_v10 = vmax.f32 %v5294_v38, %v1783_v1 }
 0x68f   : > { %v1758_v34 = vpop.permute.xlu0 %1757  ;;  %v5399_v41 = vsel %vm5256_vm13, %v1791_v9, %v1799_v10 }
 0x693   : > { %v1774_v43 = vpop.permute.xlu0 %1773 }
 0x694   : > { %v1785_v42 = vsel %vm4462_vm2, %v1758_v34, %v1774_v43 }
 0x695   : > { %v1793_v44 = vmin.f32 %v5306_v7, %v1785_v42  ;;  %v1801_v45 = vmax.f32 %v5306_v7, %v1785_v42 }
 0x697   : > { %v1772_v50 = vpop.permute.xlu0 %1771  ;;  %v5411_v12 = vsel %vm5256_vm13, %v1793_v44, %v1801_v45 }
 0x698   : > { %v1784_v4 = vsel %vm4462_vm2, %v1756_v18, %v1772_v50 }
 0x699   : > { %v1792_v5 = vmin.f32 %v5288_v37, %v1784_v4  ;;  %v1800_v8 = vmax.f32 %v5288_v37, %v1784_v4 }
 0x69b   : > { %v5393_v31 = vsel %vm5256_vm13, %v1792_v5, %v1800_v8  ;;  %v1818_v46 = vpop.permute.xlu0 %1817  ;;  %vm2091_vm13 = vmxor %vm5454_vm0, %vm4462_vm2 }
 0x69c   : > { %1823 = vrot.lane.b32.xlu0 %v5393_v31, %s3947_s21  ;;  %vm5784_vm14 = vmxor %vm2091_vm13, %vm3948_vm4 }
 0x69f   : > { %v1834_v16 = vpop.permute.xlu0 %1833 }
 0x6a0   : > { %1821 = vrot.lane.b32.xlu0 %v5399_v41, %s3947_s21  ;;  %v1849_v37 = vsel %vm4458_vm1, %v1818_v46, %v1834_v16 }
 0x6a1   : > { %v1857_v38 = vmin.f32 %v5320_v40, %v1849_v37  ;;  %v1865_v47 = vmax.f32 %v5320_v40, %v1849_v37 }
 0x6a3   : > { %v5425_v15 = vsel %vm5357_vm15, %v1857_v38, %v1865_v47 }
 0x6a4   : > { %1837 = vrot.lane.b32.xlu0 %v5399_v41, %s3946_s17 }
 0x6a8   : > { %1825 = vrot.lane.b32.xlu0 %v5411_v12, %s3947_s21 }
 0x6ac   : > { %1841 = vrot.lane.b32.xlu0 %v5411_v12, %s3946_s17 }
 0x6b0   : > { %1839 = vrot.lane.b32.xlu0 %v5393_v31, %s3946_s17 }
 0x6b4   : > { %1887 = vrot.lane.b32.xlu0 %v5425_v15, %s3955_s28 }
 0x6b8   : > { %1903 = vrot.lane.b32.xlu0 %v5425_v15, %s3956_s29 }
 0x6d2   : > { %v1832_v29 = vpop.permute.xlu1 %1831 }
 0x6d6   : > { %v1830_v62 = vpop.permute.xlu1 %1829 }
 0x6da   : > { %v1846_v36 = vpop.permute.xlu1 %1845 }
 0x6db   : > { %v1855_v61 = vsel %vm4458_vm1, %v1830_v62, %v1846_v36 }
 0x6dc   : > { %v1863_v40 = vmin.f32 %v5342_v57, %v1855_v61  ;;  %v1871_v21 = vmax.f32 %v5342_v57, %v1855_v61 }
 0x6de   : > { %v1848_v7 = vpop.permute.xlu1 %1847  ;;  %v5447_v13 = vsel %vm5357_vm15, %v1863_v40, %v1871_v21 }
 0x6df   : > { %v1856_v35 = vsel %vm4458_vm1, %v1832_v29, %v1848_v7 }
 0x6e0   : > { %v1864_v51 = vmin.f32 %v5336_v54, %v1856_v35  ;;  %v1872_v52 = vmax.f32 %v5336_v54, %v1856_v35 }
 0x6e2   : > { %v5441_v28 = vsel %vm5357_vm15, %v1864_v51, %v1872_v52 }
 0x6e3   : > { %1901 = vrot.lane.b32.xlu1 %v5441_v28, %s3955_s28 }
 0x6e7   : > { %1899 = vrot.lane.b32.xlu1 %v5447_v13, %s3955_s28 }
 0x6eb   : > { %1915 = vrot.lane.b32.xlu1 %v5447_v13, %s3956_s29 }
 0x6ed   : > { %v1890_v0 = vpop.permute.xlu1 %1889 }
 0x6ef   : > { %1917 = vrot.lane.b32.xlu1 %v5441_v28, %s3956_s29 }
 0x6f1   : > { %v1906_v33 = vpop.permute.xlu1 %1905 }
 0x6f2   : > { %v1922_v19 = vsel %vm5077_vm5, %v1890_v0, %v1906_v33 }
 0x6f3   : > { %v1930_v53 = vmin.f32 %v5365_v20, %v1922_v19  ;;  %v1938_v54 = vmax.f32 %v5365_v20, %v1922_v19 }
 0x6f5   : > { %v5475_v57 = vsel %vm5467_vm7, %v1930_v53, %v1938_v54 }
 0x6f6   : > { %1959 = vrot.lane.b32.xlu1 %v5475_v57, %s3953_s26 }
 0x6f9   : > { %v1898_v59 = vpop.permute.xlu1 %1897 }
 0x6fa   : > { %1975 = vrot.lane.b32.xlu1 %v5475_v57, %s3954_s27 }
 0x6fd   : > { %v1914_v2 = vpop.permute.xlu1 %1913 }
 0x6fe   : > { %v1926_v3 = vsel %vm5077_vm5, %v1898_v59, %v1914_v2 }
 0x6ff   : > { %v1934_v56 = vmin.f32 %v5377_v14, %v1926_v3  ;;  %v1942_v25 = vmax.f32 %v5377_v14, %v1926_v3 }
 0x701   : > { %v5487_v20 = vsel %vm5467_vm7, %v1934_v56, %v1942_v25 }
 0x702   : > { %1967 = vrot.lane.b32.xlu1 %v5487_v20, %s3953_s26 }
 0x706   : > { %1983 = vrot.lane.b32.xlu1 %v5487_v20, %s3954_s27 }
 0x70e   : > { %v1824_v23 = vpop.permute.xlu0 %1823 }
 0x712   : > { %v1822_v49 = vpop.permute.xlu0 %1821 }
 0x716   : > { %v1838_v17 = vpop.permute.xlu0 %1837 }
 0x717   : > { %v1851_v27 = vsel %vm4458_vm1, %v1822_v49, %v1838_v17 }
 0x718   : > { %v1859_v43 = vmin.f32 %v5399_v41, %v1851_v27  ;;  %v1867_v50 = vmax.f32 %v5399_v41, %v1851_v27 }
 0x71a   : > { %v1826_v18 = vpop.permute.xlu0 %1825  ;;  %v5509_v4 = vsel %vm5357_vm15, %v1859_v43, %v1867_v50 }
 0x71e   : > { %v1842_v11 = vpop.permute.xlu0 %1841 }
 0x71f   : > { %v1853_v5 = vsel %vm4458_vm1, %v1826_v18, %v1842_v11 }
 0x720   : > { %v1861_v8 = vmin.f32 %v5411_v12, %v1853_v5  ;;  %v1869_v9 = vmax.f32 %v5411_v12, %v1853_v5 }
 0x722   : > { %v1840_v48 = vpop.permute.xlu0 %1839 }
 0x723   : > { %v1852_v14 = vsel %vm4458_vm1, %v1824_v23, %v1840_v48 }
 0x724   : > { %v1860_v30 = vmin.f32 %v5393_v31, %v1852_v14  ;;  %v1868_v34 = vmax.f32 %v5393_v31, %v1852_v14  ;;  %v5521_v31 = vsel %vm5357_vm15, %v1861_v8, %v1869_v9 }
 0x726   : > { %v5503_v1 = vsel %vm5357_vm15, %v1860_v30, %v1868_v34  ;;  %v1888_v10 = vpop.permute.xlu0 %1887  ;;  %vm2159_vm15 = vmxor %vm5454_vm0, %vm4458_vm1 }
 0x727   : > { %1893 = vrot.lane.b32.xlu0 %v5503_v1, %s3955_s28  ;;  %vm5889_vm3 = vmxor %vm2159_vm15, %vm3948_vm4 }
 0x72a   : > { %v1904_v41 = vpop.permute.xlu0 %1903 }
 0x72b   : > { %1891 = vrot.lane.b32.xlu0 %v5509_v4, %s3955_s28  ;;  %v1921_v42 = vsel %vm5077_vm5, %v1888_v10, %v1904_v41 }
 0x72c   : > { %v1929_v44 = vmin.f32 %v5425_v15, %v1921_v42  ;;  %v1937_v45 = vmax.f32 %v5425_v15, %v1921_v42 }
 0x72e   : > { %v5535_v6 = vsel %vm5467_vm7, %v1929_v44, %v1937_v45 }
 0x72f   : > { %1907 = vrot.lane.b32.xlu0 %v5509_v4, %s3956_s29 }
 0x733   : > { %1895 = vrot.lane.b32.xlu0 %v5521_v31, %s3955_s28 }
 0x737   : > { %1911 = vrot.lane.b32.xlu0 %v5521_v31, %s3956_s29 }
 0x73b   : > { %1909 = vrot.lane.b32.xlu0 %v5503_v1, %s3956_s29 }
 0x73f   : > { %1957 = vrot.lane.b32.xlu0 %v5535_v6, %s3953_s26 }
 0x743   : > { %1973 = vrot.lane.b32.xlu0 %v5535_v6, %s3954_s27 }
 0x755   : > { %v1902_v46 = vpop.permute.xlu1 %1901 }
 0x759   : > { %v1900_v12 = vpop.permute.xlu1 %1899 }
 0x75d   : > { %v1916_v16 = vpop.permute.xlu1 %1915 }
 0x75e   : > { %v1927_v38 = vsel %vm5077_vm5, %v1900_v12, %v1916_v16 }
 0x75f   : > { %v1935_v62 = vmin.f32 %v5447_v13, %v1927_v38  ;;  %v1943_v36 = vmax.f32 %v5447_v13, %v1927_v38 }
 0x761   : > { %v1918_v37 = vpop.permute.xlu1 %1917  ;;  %v5557_v35 = vsel %vm5467_vm7, %v1935_v62, %v1943_v36 }
 0x762   : > { %v1928_v47 = vsel %vm5077_vm5, %v1902_v46, %v1918_v37 }
 0x763   : > { %v1936_v15 = vmin.f32 %v5441_v28, %v1928_v47  ;;  %v1944_v29 = vmax.f32 %v5441_v28, %v1928_v47 }
 0x765   : > { %v5551_v7 = vsel %vm5467_vm7, %v1936_v15, %v1944_v29 }
 0x766   : > { %1971 = vrot.lane.b32.xlu1 %v5551_v7, %s3953_s26 }
 0x768   : > { %v1960_v61 = vpop.permute.xlu1 %1959 }
 0x76a   : > { %1969 = vrot.lane.b32.xlu1 %v5557_v35, %s3953_s26 }
 0x76c   : > { %v1976_v51 = vpop.permute.xlu1 %1975 }
 0x76d   : > { %v1990_v52 = vsel %vm4771_vm11, %v1960_v61, %v1976_v51 }
 0x76e   : > { %1985 = vrot.lane.b32.xlu1 %v5557_v35, %s3954_s27  ;;  %v1998_v40 = vmin.f32 %v5475_v57, %v1990_v52  ;;  %v2006_v21 = vmax.f32 %v5475_v57, %v1990_v52 }
 0x770   : > { %v5580_v63 = vsel %vm5574_vm9, %v1998_v40, %v2006_v21 }
 0x772   : > { %1987 = vrot.lane.b32.xlu1 %v5551_v7, %s3954_s27 }
 0x774   : > { %v1968_v13 = vpop.permute.xlu1 %1967 }
 0x776   : > { %2027 = vrot.lane.b32.xlu1 %v5580_v63, %s3951_s24 }
 0x778   : > { %v1984_v0 = vpop.permute.xlu1 %1983 }
 0x779   : > { %v1994_v33 = vsel %vm4771_vm11, %v1968_v13, %v1984_v0 }
 0x77a   : > { %v2002_v19 = vmin.f32 %v5487_v20, %v1994_v33  ;;  %v2010_v53 = vmax.f32 %v5487_v20, %v1994_v33  ;;  %2043 = vrot.lane.b32.xlu1 %v5580_v63, %s3952_s25 }
 0x77c   : > { %v5592_v54 = vsel %vm5574_vm9, %v2002_v19, %v2010_v53 }
 0x77e   : > { %2035 = vrot.lane.b32.xlu1 %v5592_v54, %s3951_s24 }
 0x782   : > { %2051 = vrot.lane.b32.xlu1 %v5592_v54, %s3952_s25 }
 0x799   : > { %v1894_v57 = vpop.permute.xlu0 %1893 }
 0x79d   : > { %v1892_v59 = vpop.permute.xlu0 %1891 }
 0x7a1   : > { %v1908_v2 = vpop.permute.xlu0 %1907 }
 0x7a2   : > { %v1923_v20 = vsel %vm5077_vm5, %v1892_v59, %v1908_v2 }
 0x7a3   : > { %v1931_v18 = vmin.f32 %v5509_v4, %v1923_v20  ;;  %v1939_v11 = vmax.f32 %v5509_v4, %v1923_v20 }
 0x7a5   : > { %v1896_v3 = vpop.permute.xlu0 %1895  ;;  %v5614_v27 = vsel %vm5467_vm7, %v1931_v18, %v1939_v11 }
 0x7a9   : > { %v1912_v56 = vpop.permute.xlu0 %1911 }
 0x7aa   : > { %v1925_v14 = vsel %vm5077_vm5, %v1896_v3, %v1912_v56 }
 0x7ab   : > { %v1933_v30 = vmin.f32 %v5521_v31, %v1925_v14  ;;  %v1941_v34 = vmax.f32 %v5521_v31, %v1925_v14 }
 0x7ad   : > { %v1910_v25 = vpop.permute.xlu0 %1909  ;;  %v5626_v50 = vsel %vm5467_vm7, %v1933_v30, %v1941_v34 }
 0x7ae   : > { %v1924_v23 = vsel %vm5077_vm5, %v1894_v57, %v1910_v25 }
 0x7af   : > { %v1932_v49 = vmin.f32 %v5503_v1, %v1924_v23  ;;  %v1940_v17 = vmax.f32 %v5503_v1, %v1924_v23 }
 0x7b1   : > { %v5608_v48 = vsel %vm5467_vm7, %v1932_v49, %v1940_v17  ;;  %v1958_v43 = vpop.permute.xlu0 %1957 }
 0x7b2   : > { %1963 = vrot.lane.b32.xlu0 %v5608_v48, %s3953_s26 }
 0x7b5   : > { %v1974_v1 = vpop.permute.xlu0 %1973 }
 0x7b6   : > { %1961 = vrot.lane.b32.xlu0 %v5614_v27, %s3953_s26  ;;  %v1989_v4 = vsel %vm4771_vm11, %v1958_v43, %v1974_v1 }
 0x7b7   : > { %v1997_v5 = vmin.f32 %v5535_v6, %v1989_v4  ;;  %v2005_v8 = vmax.f32 %v5535_v6, %v1989_v4 }
 0x7b9   : > { %v5640_v24 = vsel %vm5574_vm9, %v1997_v5, %v2005_v8 }
 0x7ba   : > { %1977 = vrot.lane.b32.xlu0 %v5614_v27, %s3954_s27 }
 0x7be   : > { %1965 = vrot.lane.b32.xlu0 %v5626_v50, %s3953_s26 }
 0x7c2   : > { %1981 = vrot.lane.b32.xlu0 %v5626_v50, %s3954_s27 }
 0x7c6   : > { %1979 = vrot.lane.b32.xlu0 %v5608_v48, %s3954_s27 }
 0x7ca   : > { %2025 = vrot.lane.b32.xlu0 %v5640_v24, %s3951_s24 }
 0x7ce   : > { %2041 = vrot.lane.b32.xlu0 %v5640_v24, %s3952_s25 }
 0x7d8   : > { %v1972_v9 = vpop.permute.xlu1 %1971 }
 0x7dc   : > { %v1970_v10 = vpop.permute.xlu1 %1969 }
 0x7e0   : > { %v1986_v31 = vpop.permute.xlu1 %1985 }
 0x7e1   : > { %v1995_v42 = vsel %vm4771_vm11, %v1970_v10, %v1986_v31 }
 0x7e2   : > { %v2003_v46 = vmin.f32 %v5557_v35, %v1995_v42  ;;  %v2011_v12 = vmax.f32 %v5557_v35, %v1995_v42 }
 0x7e4   : > { %v1988_v41 = vpop.permute.xlu1 %1987  ;;  %v5662_v47 = vsel %vm5574_vm9, %v2003_v46, %v2011_v12 }
 0x7e5   : > { %v1996_v44 = vsel %vm4771_vm11, %v1972_v9, %v1988_v41 }
 0x7e6   : > { %v2004_v45 = vmin.f32 %v5551_v7, %v1996_v44  ;;  %v2012_v6 = vmax.f32 %v5551_v7, %v1996_v44 }
 0x7e8   : > { %v2028_v16 = vpop.permute.xlu1 %2027  ;;  %v5656_v37 = vsel %vm5574_vm9, %v2004_v45, %v2012_v6 }
 0x7e9   : > { %2039 = vrot.lane.b32.xlu1 %v5656_v37, %s3951_s24 }
 0x7ec   : > { %v2044_v38 = vpop.permute.xlu1 %2043 }
 0x7ed   : > { %2037 = vrot.lane.b32.xlu1 %v5662_v47, %s3951_s24  ;;  %v2058_v29 = vsel %vm4564_vm6, %v2028_v16, %v2044_v38 }
 0x7ee   : > { %v2066_v62 = vmin.f32 %v5580_v63, %v2058_v29  ;;  %v2074_v36 = vmax.f32 %v5580_v63, %v2058_v29 }
 0x7f0   : > { %v2036_v15 = vpop.permute.xlu1 %2035  ;;  %v5685_v35 = vsel %vm5679_vm12, %v2066_v62, %v2074_v36 }
 0x7f1   : > { %2053 = vrot.lane.b32.xlu1 %v5662_v47, %s3952_s25 }
 0x7f4   : > { %v2052_v61 = vpop.permute.xlu1 %2051 }
 0x7f5   : > { %2055 = vrot.lane.b32.xlu1 %v5656_v37, %s3952_s25  ;;  %v2062_v51 = vsel %vm4564_vm6, %v2036_v15, %v2052_v61 }
 0x7f6   : > { %v2070_v52 = vmin.f32 %v5592_v54, %v2062_v51  ;;  %v2078_v40 = vmax.f32 %v5592_v54, %v2062_v51 }
 0x7f8   : > { %v5697_v21 = vsel %vm5679_vm12, %v2070_v52, %v2078_v40 }
 0x7f9   : > { %2095 = vrot.lane.b32.xlu1 %v5685_v35, %s3949_s22 }
 0x7fd   : > { %2111 = vrot.lane.b32.xlu1 %v5685_v35, %s3950_s23 }
 0x801   : > { %2103 = vrot.lane.b32.xlu1 %v5697_v21, %s3949_s22 }
 0x805   : > { %2119 = vrot.lane.b32.xlu1 %v5697_v21, %s3950_s23 }
 0x824   : > { %v1964_v13 = vpop.permute.xlu0 %1963 }
 0x828   : > { %v1962_v63 = vpop.permute.xlu0 %1961 }
 0x82c   : > { %v1978_v0 = vpop.permute.xlu0 %1977 }
 0x82d   : > { %v1991_v54 = vsel %vm4771_vm11, %v1962_v63, %v1978_v0 }
 0x82e   : > { %v1999_v3 = vmin.f32 %v5614_v27, %v1991_v54  ;;  %v2007_v56 = vmax.f32 %v5614_v27, %v1991_v54 }
 0x830   : > { %v1966_v33 = vpop.permute.xlu0 %1965  ;;  %v5719_v20 = vsel %vm5574_vm9, %v1999_v3, %v2007_v56 }
 0x834   : > { %v1982_v19 = vpop.permute.xlu0 %1981 }
 0x835   : > { %v1993_v23 = vsel %vm4771_vm11, %v1966_v33, %v1982_v19 }
 0x836   : > { %v2001_v49 = vmin.f32 %v5626_v50, %v1993_v23  ;;  %v2009_v17 = vmax.f32 %v5626_v50, %v1993_v23 }
 0x838   : > { %v1980_v53 = vpop.permute.xlu0 %1979  ;;  %v5731_v11 = vsel %vm5574_vm9, %v2001_v49, %v2009_v17 }
 0x839   : > { %v1992_v57 = vsel %vm4771_vm11, %v1964_v13, %v1980_v53 }
 0x83a   : > { %v2000_v59 = vmin.f32 %v5608_v48, %v1992_v57  ;;  %v2008_v2 = vmax.f32 %v5608_v48, %v1992_v57 }
 0x83c   : > { %v5713_v25 = vsel %vm5574_vm9, %v2000_v59, %v2008_v2  ;;  %v2026_v18 = vpop.permute.xlu0 %2025 }
 0x83d   : > { %2031 = vrot.lane.b32.xlu0 %v5713_v25, %s3951_s24 }
 0x840   : > { %v2042_v48 = vpop.permute.xlu0 %2041 }
 0x841   : > { %2029 = vrot.lane.b32.xlu0 %v5719_v20, %s3951_s24  ;;  %v2057_v27 = vsel %vm4564_vm6, %v2026_v18, %v2042_v48 }
 0x842   : > { %v2065_v14 = vmin.f32 %v5640_v24, %v2057_v27  ;;  %v2073_v30 = vmax.f32 %v5640_v24, %v2057_v27 }
 0x844   : > { %v5745_v28 = vsel %vm5679_vm12, %v2065_v14, %v2073_v30 }
 0x845   : > { %2045 = vrot.lane.b32.xlu0 %v5719_v20, %s3952_s25 }
 0x849   : > { %2033 = vrot.lane.b32.xlu0 %v5731_v11, %s3951_s24 }
 0x84d   : > { %2049 = vrot.lane.b32.xlu0 %v5731_v11, %s3952_s25 }
 0x851   : > { %2047 = vrot.lane.b32.xlu0 %v5713_v25, %s3952_s25 }
 0x855   : > { %2093 = vrot.lane.b32.xlu0 %v5745_v28, %s3949_s22 }
 0x859   : > { %2109 = vrot.lane.b32.xlu0 %v5745_v28, %s3950_s23 }
 0x85b   : > { %v2040_v34 = vpop.permute.xlu1 %2039 }
 0x85f   : > { %v2038_v43 = vpop.permute.xlu1 %2037 }
 0x863   : > { %v2054_v50 = vpop.permute.xlu1 %2053 }
 0x864   : > { %v2063_v4 = vsel %vm4564_vm6, %v2038_v43, %v2054_v50 }
 0x865   : > { %v2071_v9 = vmin.f32 %v5662_v47, %v2063_v4  ;;  %v2079_v10 = vmax.f32 %v5662_v47, %v2063_v4 }
 0x867   : > { %v2056_v1 = vpop.permute.xlu1 %2055  ;;  %v5767_v44 = vsel %vm5679_vm12, %v2071_v9, %v2079_v10 }
 0x868   : > { %v2064_v5 = vsel %vm4564_vm6, %v2040_v34, %v2056_v1 }
 0x869   : > { %v2072_v8 = vmin.f32 %v5656_v37, %v2064_v5  ;;  %v2080_v24 = vmax.f32 %v5656_v37, %v2064_v5 }
 0x86b   : > { %v2096_v31 = vpop.permute.xlu1 %2095  ;;  %v5761_v41 = vsel %vm5679_vm12, %v2072_v8, %v2080_v24 }
 0x86c   : > { %2107 = vrot.lane.b32.xlu1 %v5761_v41, %s3949_s22 }
 0x86f   : > { %v2112_v42 = vpop.permute.xlu1 %2111 }
 0x870   : > { %2105 = vrot.lane.b32.xlu1 %v5767_v44, %s3949_s22  ;;  %v2126_v6 = vsel %vm4462_vm2, %v2096_v31, %v2112_v42 }
 0x871   : > { %v2134_v46 = vmin.f32 %v5685_v35, %v2126_v6  ;;  %v2142_v12 = vmax.f32 %v5685_v35, %v2126_v6 }
 0x873   : > { %v2104_v45 = vpop.permute.xlu1 %2103  ;;  %v5790_v38 = vsel %vm5784_vm14, %v2134_v46, %v2142_v12 }
 0x874   : > { %2121 = vrot.lane.b32.xlu1 %v5767_v44, %s3950_s23 }
 0x877   : > { %v2120_v37 = vpop.permute.xlu1 %2119 }
 0x878   : > { %2123 = vrot.lane.b32.xlu1 %v5761_v41, %s3950_s23  ;;  %v2130_v47 = vsel %vm4462_vm2, %v2104_v45, %v2120_v37 }
 0x879   : > { %v2138_v15 = vmin.f32 %v5697_v21, %v2130_v47  ;;  %v2146_v29 = vmax.f32 %v5697_v21, %v2130_v47 }
 0x87b   : > { %v5802_v62 = vsel %vm5784_vm14, %v2138_v15, %v2146_v29 }
 0x87c   : > { %2163 = vrot.lane.b32.xlu1 %v5790_v38, %s3947_s21 }
 0x880   : > { %2179 = vrot.lane.b32.xlu1 %v5790_v38, %s3946_s17 }
 0x884   : > { %2171 = vrot.lane.b32.xlu1 %v5802_v62, %s3947_s21 }
 0x888   : > { %2187 = vrot.lane.b32.xlu1 %v5802_v62, %s3946_s17 }
 0x8af   : > { %v2032_v36 = vpop.permute.xlu0 %2031 }
 0x8b3   : > { %v2030_v61 = vpop.permute.xlu0 %2029 }
 0x8b7   : > { %v2046_v35 = vpop.permute.xlu0 %2045 }
 0x8b8   : > { %v2059_v21 = vsel %vm4564_vm6, %v2030_v61, %v2046_v35 }
 0x8b9   : > { %v2067_v33 = vmin.f32 %v5719_v20, %v2059_v21  ;;  %v2075_v19 = vmax.f32 %v5719_v20, %v2059_v21 }
 0x8bb   : > { %v2034_v51 = vpop.permute.xlu0 %2033  ;;  %v5824_v54 = vsel %vm5679_vm12, %v2067_v33, %v2075_v19 }
 0x8bf   : > { %v2050_v52 = vpop.permute.xlu0 %2049 }
 0x8c0   : > { %v2061_v57 = vsel %vm4564_vm6, %v2034_v51, %v2050_v52 }
 0x8c1   : > { %v2069_v59 = vmin.f32 %v5731_v11, %v2061_v57  ;;  %v2077_v2 = vmax.f32 %v5731_v11, %v2061_v57 }
 0x8c3   : > { %v2048_v40 = vpop.permute.xlu0 %2047  ;;  %v5836_v56 = vsel %vm5679_vm12, %v2069_v59, %v2077_v2 }
 0x8c4   : > { %v2060_v13 = vsel %vm4564_vm6, %v2032_v36, %v2048_v40 }
 0x8c5   : > { %v2068_v63 = vmin.f32 %v5713_v25, %v2060_v13  ;;  %v2076_v0 = vmax.f32 %v5713_v25, %v2060_v13 }
 0x8c7   : > { %v5818_v53 = vsel %vm5679_vm12, %v2068_v63, %v2076_v0  ;;  %v2094_v3 = vpop.permute.xlu0 %2093 }
 0x8c8   : > { %2099 = vrot.lane.b32.xlu0 %v5818_v53, %s3949_s22 }
 0x8cb   : > { %v2110_v25 = vpop.permute.xlu0 %2109 }
 0x8cc   : > { %2097 = vrot.lane.b32.xlu0 %v5824_v54, %s3949_s22  ;;  %v2125_v20 = vsel %vm4462_vm2, %v2094_v3, %v2110_v25 }
 0x8cd   : > { %v2133_v23 = vmin.f32 %v5745_v28, %v2125_v20  ;;  %v2141_v49 = vmax.f32 %v5745_v28, %v2125_v20 }
 0x8cf   : > { %v5850_v17 = vsel %vm5784_vm14, %v2133_v23, %v2141_v49 }
 0x8d0   : > { %2113 = vrot.lane.b32.xlu0 %v5824_v54, %s3950_s23 }
 0x8d4   : > { %2101 = vrot.lane.b32.xlu0 %v5836_v56, %s3949_s22 }
 0x8d8   : > { %2117 = vrot.lane.b32.xlu0 %v5836_v56, %s3950_s23 }
 0x8dc   : > { %2115 = vrot.lane.b32.xlu0 %v5818_v53, %s3950_s23 }
 0x8de   : > { %v2108_v7 = vpop.permute.xlu1 %2107 }
 0x8e0   : > { %2161 = vrot.lane.b32.xlu0 %v5850_v17, %s3947_s21 }
 0x8e2   : > { %v2106_v18 = vpop.permute.xlu1 %2105 }
 0x8e4   : > { %2177 = vrot.lane.b32.xlu0 %v5850_v17, %s3946_s17 }
 0x8e6   : > { %v2122_v11 = vpop.permute.xlu1 %2121 }
 0x8e7   : > { %v2131_v27 = vsel %vm4462_vm2, %v2106_v18, %v2122_v11 }
 0x8e8   : > { %v2139_v34 = vmin.f32 %v5767_v44, %v2131_v27  ;;  %v2147_v43 = vmax.f32 %v5767_v44, %v2131_v27  ;;  %v2227_v27 = vand.u32 64, %v4454_v60 }
 0x8ea   : > { %v2124_v48 = vpop.permute.xlu1 %2123  ;;  %v5872_v5 = vsel %vm5784_vm14, %v2139_v34, %v2147_v43  ;;  %vm5982_vm7 = vcmp.eq.s32.totalorder %v2227_v27, 0 }
 0x8eb   : > { %v2132_v14 = vsel %vm4462_vm2, %v2108_v7, %v2124_v48  ;;  %vm2229_vm8 = vmxor %vm5982_vm7, %vm5454_vm0 }
 0x8ec   : > { %v2140_v30 = vmin.f32 %v5761_v41, %v2132_v14  ;;  %v2148_v28 = vmax.f32 %v5761_v41, %v2132_v14  ;;  %vm5999_vm9 = vmxor %vm2229_vm8, %vm3948_vm4 }
 0x8ed   : > { %vm2299_vm10 = vmxor %vm5982_vm7, %vm5077_vm5 }
 0x8ee   : > { %v2164_v50 = vpop.permute.xlu1 %2163  ;;  %v5866_v1 = vsel %vm5784_vm14, %v2140_v30, %v2148_v28  ;;  %vm6104_vm12 = vmxor %vm2299_vm10, %vm3948_vm4 }
 0x8ef   : > { %2175 = vrot.lane.b32.xlu1 %v5866_v1, %s3947_s21  ;;  %vm2367_vm13 = vmxor %vm5982_vm7, %vm4771_vm11 }
 0x8f0   : > { %vm2435_vm15 = vmxor %vm5982_vm7, %vm4564_vm6 }
 0x8f1   : > { %vm2503_vm8 = vmxor %vm5982_vm7, %vm4462_vm2 }
 0x8f2   : > { %v2180_v4 = vpop.permute.xlu1 %2179  ;;  %vm2571_vm10 = vmxor %vm5982_vm7, %vm4458_vm1 }
 0x8f3   : > { %2173 = vrot.lane.b32.xlu1 %v5872_v5, %s3947_s21  ;;  %v2194_v24 = vsel %vm4458_vm1, %v2164_v50, %v2180_v4 }
 0x8f4   : > { %v2202_v9 = vmin.f32 %v5790_v38, %v2194_v24  ;;  %v2210_v10 = vmax.f32 %v5790_v38, %v2194_v24 }
 0x8f6   : > { %v2172_v8 = vpop.permute.xlu1 %2171  ;;  %v5895_v42 = vsel %vm5889_vm3, %v2202_v9, %v2210_v10 }
 0x8f7   : > { %2189 = vrot.lane.b32.xlu1 %v5872_v5, %s3946_s17 }
 0x8fa   : > { %v2188_v41 = vpop.permute.xlu1 %2187 }
 0x8fb   : > { %2191 = vrot.lane.b32.xlu1 %v5866_v1, %s3946_s17  ;;  %v2198_v44 = vsel %vm4458_vm1, %v2172_v8, %v2188_v41 }
 0x8fc   : > { %v2206_v45 = vmin.f32 %v5802_v62, %v2198_v44  ;;  %v2214_v6 = vmax.f32 %v5802_v62, %v2198_v44 }
 0x8fe   : > { %v5907_v46 = vsel %vm5889_vm3, %v2206_v45, %v2214_v6 }
 0x8ff   : > { %2233 = vrot.lane.b32.xlu1 %v5895_v42, %s3957_s30 }
 0x903   : > { %2249 = vrot.lane.b32.xlu1 %v5895_v42, %s3958_s3 }
 0x907   : > { %2241 = vrot.lane.b32.xlu1 %v5907_v46, %s3957_s30 }
 0x90b   : > { %2257 = vrot.lane.b32.xlu1 %v5907_v46, %s3958_s3 }
 0x93a   : > { %v2100_v12 = vpop.permute.xlu0 %2099 }
 0x93e   : > { %v2098_v37 = vpop.permute.xlu0 %2097 }
 0x942   : > { %v2114_v38 = vpop.permute.xlu0 %2113 }
 0x943   : > { %v2127_v62 = vsel %vm4462_vm2, %v2098_v37, %v2114_v38 }
 0x944   : > { %v2135_v51 = vmin.f32 %v5824_v54, %v2127_v62  ;;  %v2143_v52 = vmax.f32 %v5824_v54, %v2127_v62 }
 0x946   : > { %v2102_v47 = vpop.permute.xlu0 %2101  ;;  %v5929_v21 = vsel %vm5784_vm14, %v2135_v51, %v2143_v52 }
 0x94a   : > { %v2118_v15 = vpop.permute.xlu0 %2117 }
 0x94b   : > { %v2129_v13 = vsel %vm4462_vm2, %v2102_v47, %v2118_v15 }
 0x94c   : > { %v2137_v63 = vmin.f32 %v5836_v56, %v2129_v13  ;;  %v2145_v0 = vmax.f32 %v5836_v56, %v2129_v13 }
 0x94e   : > { %v2116_v29 = vpop.permute.xlu0 %2115  ;;  %v5941_v19 = vsel %vm5784_vm14, %v2137_v63, %v2145_v0 }
 0x94f   : > { %v2128_v36 = vsel %vm4462_vm2, %v2100_v12, %v2116_v29 }
 0x950   : > { %v2136_v61 = vmin.f32 %v5818_v53, %v2128_v36  ;;  %v2144_v35 = vmax.f32 %v5818_v53, %v2128_v36 }
 0x952   : > { %v5923_v40 = vsel %vm5784_vm14, %v2136_v61, %v2144_v35  ;;  %v2162_v33 = vpop.permute.xlu0 %2161  ;;  %vm6203_vm14 = vmxor %vm2367_vm13, %vm3948_vm4 }
 0x953   : > { %2167 = vrot.lane.b32.xlu0 %v5923_v40, %s3947_s21  ;;  %vm2641_vm13 = vmxor %vm3948_vm4, %vm5982_vm7 }
 0x954   : > { %vm2685_vm7 = vmxor %vm3948_vm4, %vm5454_vm0 }
 0x956   : > { %v2178_v53 = vpop.permute.xlu0 %2177 }
 0x957   : > { %2165 = vrot.lane.b32.xlu0 %v5929_v21, %s3947_s21  ;;  %v2193_v57 = vsel %vm4458_vm1, %v2162_v33, %v2178_v53 }
 0x958   : > { %v2201_v2 = vmin.f32 %v5850_v17, %v2193_v57  ;;  %v2209_v3 = vmax.f32 %v5850_v17, %v2193_v57 }
 0x95a   : > { %v5955_v56 = vsel %vm5889_vm3, %v2201_v2, %v2209_v3 }
 0x95b   : > { %2181 = vrot.lane.b32.xlu0 %v5929_v21, %s3946_s17 }
 0x95f   : > { %2169 = vrot.lane.b32.xlu0 %v5941_v19, %s3947_s21 }
 0x961   : > { %v2176_v54 = vpop.permute.xlu1 %2175 }
 0x963   : > { %2185 = vrot.lane.b32.xlu0 %v5941_v19, %s3946_s17 }
 0x965   : > { %v2174_v59 = vpop.permute.xlu1 %2173 }
 0x967   : > { %2183 = vrot.lane.b32.xlu0 %v5923_v40, %s3946_s17 }
 0x969   : > { %v2190_v16 = vpop.permute.xlu1 %2189 }
 0x96a   : > { %v2199_v20 = vsel %vm4458_vm1, %v2174_v59, %v2190_v16 }
 0x96b   : > { %2231 = vrot.lane.b32.xlu0 %v5955_v56, %s3957_s30  ;;  %v2207_v17 = vmin.f32 %v5872_v5, %v2199_v20  ;;  %v2215_v18 = vmax.f32 %v5872_v5, %v2199_v20 }
 0x96d   : > { %v2192_v25 = vpop.permute.xlu1 %2191  ;;  %v5978_v30 = vsel %vm5889_vm3, %v2207_v17, %v2215_v18 }
 0x96e   : > { %v2200_v23 = vsel %vm4458_vm1, %v2176_v54, %v2192_v25 }
 0x96f   : > { %v2208_v49 = vmin.f32 %v5866_v1, %v2200_v23  ;;  %v2216_v7 = vmax.f32 %v5866_v1, %v2200_v23  ;;  %2247 = vrot.lane.b32.xlu0 %v5955_v56, %s3958_s3 }
 0x971   : > { %v2234_v11 = vpop.permute.xlu1 %2233  ;;  %v5971_v48 = vsel %vm5889_vm3, %v2208_v49, %v2216_v7 }
 0x972   : > { %2245 = vrot.lane.b32.xlu1 %v5971_v48, %s3957_s30 }
 0x975   : > { %v2250_v14 = vpop.permute.xlu1 %2249 }
 0x976   : > { %2243 = vrot.lane.b32.xlu1 %v5978_v30, %s3957_s30  ;;  %v2266_v43 = vsel %vm5454_vm0, %v2234_v11, %v2250_v14 }
 0x977   : > { %v2274_v60 = vmin.f32 %v5895_v42, %v2266_v43  ;;  %v2282_v50 = vmax.f32 %v5895_v42, %v2266_v43 }
 0x979   : > { %v2242_v34 = vpop.permute.xlu1 %2241  ;;  %v6005_v5 = vsel %vm5999_vm9, %v2274_v60, %v2282_v50 }
 0x97a   : > { %2259 = vrot.lane.b32.xlu1 %v5978_v30, %s3958_s3 }
 0x97d   : > { %v2258_v4 = vpop.permute.xlu1 %2257 }
 0x97e   : > { %2261 = vrot.lane.b32.xlu1 %v5971_v48, %s3958_s3  ;;  %v2270_v8 = vsel %vm5454_vm0, %v2242_v34, %v2258_v4 }
 0x97f   : > { %v2278_v24 = vmin.f32 %v5907_v46, %v2270_v8  ;;  %v2286_v9 = vmax.f32 %v5907_v46, %v2270_v8 }
 0x981   : > { %v6017_v10 = vsel %vm5999_vm9, %v2278_v24, %v2286_v9 }
 0x982   : > { %2303 = vrot.lane.b32.xlu1 %v6005_v5, %s3955_s28 }
 0x986   : > { %2319 = vrot.lane.b32.xlu1 %v6005_v5, %s3956_s29 }
 0x98a   : > { %2311 = vrot.lane.b32.xlu1 %v6017_v10, %s3955_s28 }
 0x98e   : > { %2327 = vrot.lane.b32.xlu1 %v6017_v10, %s3956_s29 }
 0x9c5   : > { %v2168_v41 = vpop.permute.xlu0 %2167 }
 0x9c9   : > { %v2166_v42 = vpop.permute.xlu0 %2165 }
 0x9cd   : > { %v2182_v44 = vpop.permute.xlu0 %2181 }
 0x9ce   : > { %v2195_v46 = vsel %vm4458_vm1, %v2166_v42, %v2182_v44 }
 0x9cf   : > { %v2203_v15 = vmin.f32 %v5929_v21, %v2195_v46  ;;  %v2211_v29 = vmax.f32 %v5929_v21, %v2195_v46 }
 0x9d1   : > { %v2170_v45 = vpop.permute.xlu0 %2169  ;;  %v6039_v36 = vsel %vm5889_vm3, %v2203_v15, %v2211_v29 }
 0x9d5   : > { %v2186_v6 = vpop.permute.xlu0 %2185 }
 0x9d6   : > { %v2197_v61 = vsel %vm4458_vm1, %v2170_v45, %v2186_v6 }
 0x9d7   : > { %v2205_v51 = vmin.f32 %v5941_v19, %v2197_v61  ;;  %v2213_v52 = vmax.f32 %v5941_v19, %v2197_v61 }
 0x9d9   : > { %v2184_v12 = vpop.permute.xlu0 %2183  ;;  %v6051_v13 = vsel %vm5889_vm3, %v2205_v51, %v2213_v52 }
 0x9da   : > { %v2196_v37 = vsel %vm4458_vm1, %v2168_v41, %v2184_v12 }
 0x9db   : > { %v2204_v38 = vmin.f32 %v5923_v40, %v2196_v37  ;;  %v2212_v47 = vmax.f32 %v5923_v40, %v2196_v37 }
 0x9dd   : > { %v6033_v62 = vsel %vm5889_vm3, %v2204_v38, %v2212_v47  ;;  %v2232_v40 = vpop.permute.xlu0 %2231  ;;  %vm6290_vm3 = vmxor %vm2435_vm15, %vm3948_vm4 }
 0x9de   : > { %2237 = vrot.lane.b32.xlu0 %v6033_v62, %s3957_s30  ;;  %vm6575_vm15 = vmxor %vm2685_vm7, %vm3948_vm4 }
 0x9e1   : > { %v2248_v63 = vpop.permute.xlu0 %2247 }
 0x9e2   : > { %2235 = vrot.lane.b32.xlu0 %v6039_v36, %s3957_s30  ;;  %v2265_v33 = vsel %vm5454_vm0, %v2232_v40, %v2248_v63 }
 0x9e3   : > { %v2273_v53 = vmin.f32 %v5955_v56, %v2265_v33  ;;  %v2281_v54 = vmax.f32 %v5955_v56, %v2265_v33 }
 0x9e4   : > { %v2246_v35 = vpop.permute.xlu1 %2245 }
 0x9e5   : > { %v6079_v20 = vsel %vm5999_vm9, %v2273_v53, %v2281_v54 }
 0x9e6   : > { %2251 = vrot.lane.b32.xlu0 %v6039_v36, %s3958_s3 }
 0x9e8   : > { %v2244_v21 = vpop.permute.xlu1 %2243 }
 0x9ea   : > { %2239 = vrot.lane.b32.xlu0 %v6051_v13, %s3957_s30 }
 0x9ec   : > { %v2260_v0 = vpop.permute.xlu1 %2259 }
 0x9ed   : > { %v2271_v31 = vsel %vm5454_vm0, %v2244_v21, %v2260_v0 }
 0x9ee   : > { %2255 = vrot.lane.b32.xlu0 %v6051_v13, %s3958_s3  ;;  %v2279_v3 = vmin.f32 %v5978_v30, %v2271_v31  ;;  %v2287_v16 = vmax.f32 %v5978_v30, %v2271_v31 }
 0x9f0   : > { %v2262_v19 = vpop.permute.xlu1 %2261  ;;  %v6085_v49 = vsel %vm5999_vm9, %v2279_v3, %v2287_v16 }
 0x9f1   : > { %v2272_v57 = vsel %vm5454_vm0, %v2246_v35, %v2262_v19 }
 0x9f2   : > { %v2280_v59 = vmin.f32 %v5971_v48, %v2272_v57  ;;  %v2288_v2 = vmax.f32 %v5971_v48, %v2272_v57  ;;  %2253 = vrot.lane.b32.xlu0 %v6033_v62, %s3958_s3 }
 0x9f4   : > { %v2304_v25 = vpop.permute.xlu1 %2303  ;;  %v6073_v56 = vsel %vm5999_vm9, %v2280_v59, %v2288_v2 }
 0x9f5   : > { %2315 = vrot.lane.b32.xlu1 %v6073_v56, %s3955_s28 }
 0x9f6   : > { %2301 = vrot.lane.b32.xlu0 %v6079_v20, %s3955_s28 }
 0x9f8   : > { %v2320_v23 = vpop.permute.xlu1 %2319 }
 0x9f9   : > { %2313 = vrot.lane.b32.xlu1 %v6085_v49, %s3955_s28  ;;  %v2334_v17 = vsel %vm5077_vm5, %v2304_v25, %v2320_v23 }
 0x9fa   : > { %2317 = vrot.lane.b32.xlu0 %v6079_v20, %s3956_s29  ;;  %v2342_v18 = vmin.f32 %v6005_v5, %v2334_v17  ;;  %v2350_v11 = vmax.f32 %v6005_v5, %v2334_v17 }
 0x9fc   : > { %v2312_v7 = vpop.permute.xlu1 %2311  ;;  %v6110_v14 = vsel %vm6104_vm12, %v2342_v18, %v2350_v11 }
 0x9fd   : > { %2329 = vrot.lane.b32.xlu1 %v6085_v49, %s3956_s29 }
 0xa00   : > { %v2328_v27 = vpop.permute.xlu1 %2327 }
 0xa01   : > { %2331 = vrot.lane.b32.xlu1 %v6073_v56, %s3956_s29  ;;  %v2338_v30 = vsel %vm5077_vm5, %v2312_v7, %v2328_v27 }
 0xa02   : > { %v2346_v34 = vmin.f32 %v6017_v10, %v2338_v30  ;;  %v2354_v43 = vmax.f32 %v6017_v10, %v2338_v30 }
 0xa04   : > { %v6122_v60 = vsel %vm6104_vm12, %v2346_v34, %v2354_v43 }
 0xa05   : > { %2371 = vrot.lane.b32.xlu1 %v6110_v14, %s3953_s26 }
 0xa09   : > { %2387 = vrot.lane.b32.xlu1 %v6110_v14, %s3954_s27 }
 0xa0d   : > { %2379 = vrot.lane.b32.xlu1 %v6122_v60, %s3953_s26 }
 0xa11   : > { %2395 = vrot.lane.b32.xlu1 %v6122_v60, %s3954_s27 }
 0xa50   : > { %v2238_v50 = vpop.permute.xlu0 %2237 }
 0xa54   : > { %v2236_v4 = vpop.permute.xlu0 %2235 }
 0xa58   : > { %v2252_v5 = vpop.permute.xlu0 %2251 }
 0xa59   : > { %v2267_v10 = vsel %vm5454_vm0, %v2236_v4, %v2252_v5 }
 0xa5a   : > { %v2275_v6 = vmin.f32 %v6039_v36, %v2267_v10  ;;  %v2283_v12 = vmax.f32 %v6039_v36, %v2267_v10 }
 0xa5c   : > { %v2240_v8 = vpop.permute.xlu0 %2239  ;;  %v6144_v38 = vsel %vm5999_vm9, %v2275_v6, %v2283_v12 }
 0xa60   : > { %v2256_v24 = vpop.permute.xlu0 %2255 }
 0xa61   : > { %v2269_v47 = vsel %vm5454_vm0, %v2240_v8, %v2256_v24 }
 0xa62   : > { %v2277_v29 = vmin.f32 %v6051_v13, %v2269_v47 }
 0xa64   : > { %v2254_v9 = vpop.permute.xlu0 %2253 }
 0xa65   : > { %v2268_v41 = vsel %vm5454_vm0, %v2238_v50, %v2254_v9 }
 0xa66   : > { %v2276_v42 = vmin.f32 %v6033_v62, %v2268_v41  ;;  %v2284_v44 = vmax.f32 %v6033_v62, %v2268_v41  ;;  %v2285_v62 = vmax.f32 %v6051_v13, %v2269_v47 }
 0xa67   : > { %v2316_v45 = vpop.permute.xlu1 %2315 }
 0xa68   : > { %v6138_v46 = vsel %vm5999_vm9, %v2276_v42, %v2284_v44  ;;  %v2302_v36 = vpop.permute.xlu0 %2301  ;;  %v6160_v52 = vsel %vm5999_vm9, %v2277_v29, %v2285_v62  ;;  %vm6375_vm9 = vmxor %vm2503_vm8, %vm3948_vm4 }
 0xa69   : > { %2307 = vrot.lane.b32.xlu0 %v6138_v46, %s3955_s28 }
 0xa6b   : > { %v2314_v37 = vpop.permute.xlu1 %2313 }
 0xa6c   : > { %v2318_v13 = vpop.permute.xlu0 %2317 }
 0xa6d   : > { %2305 = vrot.lane.b32.xlu0 %v6144_v38, %s3955_s28  ;;  %v2333_v1 = vsel %vm5077_vm5, %v2302_v36, %v2318_v13 }
 0xa6e   : > { %v2341_v31 = vmin.f32 %v6079_v20, %v2333_v1  ;;  %v2349_v57 = vmax.f32 %v6079_v20, %v2333_v1 }
 0xa6f   : > { %v2330_v15 = vpop.permute.xlu1 %2329 }
 0xa70   : > { %v2339_v35 = vsel %vm5077_vm5, %v2314_v37, %v2330_v15  ;;  %v6191_v3 = vsel %vm6104_vm12, %v2341_v31, %v2349_v57 }
 0xa71   : > { %2321 = vrot.lane.b32.xlu0 %v6144_v38, %s3956_s29  ;;  %v2347_v63 = vmin.f32 %v6085_v49, %v2339_v35  ;;  %v2355_v0 = vmax.f32 %v6085_v49, %v2339_v35 }
 0xa73   : > { %v2332_v61 = vpop.permute.xlu1 %2331  ;;  %v6177_v54 = vsel %vm6104_vm12, %v2347_v63, %v2355_v0 }
 0xa74   : > { %v2340_v51 = vsel %vm5077_vm5, %v2316_v45, %v2332_v61 }
 0xa75   : > { %v2348_v40 = vmin.f32 %v6073_v56, %v2340_v51  ;;  %v2356_v21 = vmax.f32 %v6073_v56, %v2340_v51  ;;  %2309 = vrot.lane.b32.xlu0 %v6160_v52, %s3955_s28 }
 0xa77   : > { %v2372_v33 = vpop.permute.xlu1 %2371  ;;  %v2366_v19 = vsel %vm6104_vm12, %v2348_v40, %v2356_v21 }
 0xa78   : > { %2383 = vrot.lane.b32.xlu1 %v2366_v19, %s3953_s26 }
 0xa79   : > { %2325 = vrot.lane.b32.xlu0 %v6160_v52, %s3956_s29 }
 0xa7b   : > { %v2388_v53 = vpop.permute.xlu1 %2387 }
 0xa7c   : > { %2381 = vrot.lane.b32.xlu1 %v6177_v54, %s3953_s26  ;;  %v2402_v2 = vsel %vm4771_vm11, %v2372_v33, %v2388_v53 }
 0xa7d   : > { %2323 = vrot.lane.b32.xlu0 %v6138_v46, %s3956_s29  ;;  %v2410_v16 = vmin.f32 %v6110_v14, %v2402_v2  ;;  %v2418_v25 = vmax.f32 %v6110_v14, %v2402_v2 }
 0xa7f   : > { %v2380_v59 = vpop.permute.xlu1 %2379  ;;  %v6211_v23 = vsel %vm6203_vm14, %v2410_v16, %v2418_v25 }
 0xa80   : > { %2397 = vrot.lane.b32.xlu1 %v6177_v54, %s3954_s27 }
 0xa81   : > { %2369 = vrot.lane.b32.xlu0 %v6191_v3, %s3953_s26 }
 0xa83   : > { %v2396_v20 = vpop.permute.xlu1 %2395 }
 0xa84   : > { %2399 = vrot.lane.b32.xlu1 %v2366_v19, %s3954_s27  ;;  %v2406_v49 = vsel %vm4771_vm11, %v2380_v59, %v2396_v20 }
 0xa85   : > { %2385 = vrot.lane.b32.xlu0 %v6191_v3, %s3954_s27  ;;  %v2414_v7 = vmin.f32 %v6122_v60, %v2406_v49  ;;  %v2422_v17 = vmax.f32 %v6122_v60, %v2406_v49 }
 0xa87   : > { %v6223_v18 = vsel %vm6203_vm14, %v2414_v7, %v2422_v17 }
 0xa88   : > { %2439 = vrot.lane.b32.xlu1 %v6211_v23, %s3951_s24 }
 0xa8c   : > { %2455 = vrot.lane.b32.xlu1 %v6211_v23, %s3952_s25 }
 0xa90   : > { %2447 = vrot.lane.b32.xlu1 %v6223_v18, %s3951_s24 }
 0xa94   : > { %2463 = vrot.lane.b32.xlu1 %v6223_v18, %s3952_s25 }
 0xadb   : > { %v2308_v11 = vpop.permute.xlu0 %2307 }
 0xadf   : > { %v2306_v27 = vpop.permute.xlu0 %2305 }
 0xae3   : > { %v2322_v14 = vpop.permute.xlu0 %2321 }
 0xae4   : > { %v2335_v4 = vsel %vm5077_vm5, %v2306_v27, %v2322_v14 }
 0xae5   : > { %v2343_v10 = vmin.f32 %v6144_v38, %v2335_v4  ;;  %v2351_v41 = vmax.f32 %v6144_v38, %v2335_v4 }
 0xae7   : > { %v2310_v30 = vpop.permute.xlu0 %2309  ;;  %v6249_v12 = vsel %vm6104_vm12, %v2343_v10, %v2351_v41 }
 0xaea   : > { %v2384_v34 = vpop.permute.xlu1 %2383 }
 0xaeb   : > { %v2326_v43 = vpop.permute.xlu0 %2325 }
 0xaee   : > { %v2382_v60 = vpop.permute.xlu1 %2381 }
 0xaef   : > { %v2324_v50 = vpop.permute.xlu0 %2323 }
 0xaf0   : > { %v2336_v5 = vsel %vm5077_vm5, %v2308_v11, %v2324_v50 }
 0xaf1   : > { %v2344_v8 = vmin.f32 %v6138_v46, %v2336_v5  ;;  %v2352_v24 = vmax.f32 %v6138_v46, %v2336_v5  ;;  %v2337_v46 = vsel %vm5077_vm5, %v2310_v30, %v2326_v43 }
 0xaf2   : > { %v2398_v9 = vpop.permute.xlu1 %2397  ;;  %v2345_v36 = vmin.f32 %v6160_v52, %v2337_v46  ;;  %v2353_v61 = vmax.f32 %v6160_v52, %v2337_v46 }
 0xaf3   : > { %v6239_v42 = vsel %vm6104_vm12, %v2344_v8, %v2352_v24  ;;  %v2407_v45 = vsel %vm4771_vm11, %v2382_v60, %v2398_v9  ;;  %v2370_v35 = vpop.permute.xlu0 %2369 }
 0xaf4   : > { %2375 = vrot.lane.b32.xlu0 %v6239_v42, %s3953_s26  ;;  %v2415_v47 = vmin.f32 %v6177_v54, %v2407_v45  ;;  %v2423_v15 = vmax.f32 %v6177_v54, %v2407_v45  ;;  %v6269_v21 = vsel %vm6104_vm12, %v2345_v36, %v2353_v61  ;;  %vm6458_vm12 = vmxor %vm2571_vm10, %vm3948_vm4 }
 0xaf6   : > { %v2400_v44 = vpop.permute.xlu1 %2399  ;;  %v2433_v40 = vsel %vm6203_vm14, %v2415_v47, %v2423_v15 }
 0xaf7   : > { %v2408_v6 = vsel %vm4771_vm11, %v2384_v34, %v2400_v44  ;;  %v2386_v52 = vpop.permute.xlu0 %2385 }
 0xaf8   : > { %v2416_v37 = vmin.f32 %v2366_v19, %v2408_v6  ;;  %v2424_v38 = vmax.f32 %v2366_v19, %v2408_v6  ;;  %2373 = vrot.lane.b32.xlu0 %v6249_v12, %s3953_s26  ;;  %v2401_v0 = vsel %vm4771_vm11, %v2370_v35, %v2386_v52 }
 0xaf9   : > { %v2409_v19 = vmin.f32 %v6191_v3, %v2401_v0  ;;  %v2417_v1 = vmax.f32 %v6191_v3, %v2401_v0 }
 0xafa   : > { %v2440_v29 = vpop.permute.xlu1 %2439  ;;  %v2434_v62 = vsel %vm6203_vm14, %v2416_v37, %v2424_v38 }
 0xafb   : > { %2451 = vrot.lane.b32.xlu1 %v2434_v62, %s3951_s24  ;;  %v6306_v59 = vsel %vm6203_vm14, %v2409_v19, %v2417_v1 }
 0xafc   : > { %2389 = vrot.lane.b32.xlu0 %v6249_v12, %s3954_s27 }
 0xafe   : > { %v2456_v51 = vpop.permute.xlu1 %2455 }
 0xaff   : > { %2449 = vrot.lane.b32.xlu1 %v2433_v40, %s3951_s24  ;;  %v2470_v63 = vsel %vm4564_vm6, %v2440_v29, %v2456_v51 }
 0xb00   : > { %2377 = vrot.lane.b32.xlu0 %v6269_v21, %s3953_s26  ;;  %v2478_v48 = vmin.f32 %v6211_v23, %v2470_v63  ;;  %v2486_v33 = vmax.f32 %v6211_v23, %v2470_v63 }
 0xb02   : > { %v2448_v13 = vpop.permute.xlu1 %2447  ;;  %v6298_v31 = vsel %vm6290_vm3, %v2478_v48, %v2486_v33 }
 0xb03   : > { %2465 = vrot.lane.b32.xlu1 %v2433_v40, %s3952_s25 }
 0xb04   : > { %2393 = vrot.lane.b32.xlu0 %v6269_v21, %s3954_s27 }
 0xb06   : > { %v2464_v54 = vpop.permute.xlu1 %2463 }
 0xb07   : > { %2467 = vrot.lane.b32.xlu1 %v2434_v62, %s3952_s25  ;;  %v2474_v57 = vsel %vm4564_vm6, %v2448_v13, %v2464_v54 }
 0xb08   : > { %2391 = vrot.lane.b32.xlu0 %v6239_v42, %s3954_s27  ;;  %v2482_v2 = vmin.f32 %v6223_v18, %v2474_v57  ;;  %v2490_v3 = vmax.f32 %v6223_v18, %v2474_v57 }
 0xb0a   : > { %v6318_v16 = vsel %vm6290_vm3, %v2482_v2, %v2490_v3 }
 0xb0b   : > { %2507 = vrot.lane.b32.xlu1 %v6298_v31, %s3949_s22 }
 0xb0c   : > { %2437 = vrot.lane.b32.xlu0 %v6306_v59, %s3951_s24 }
 0xb0f   : > { %2523 = vrot.lane.b32.xlu1 %v6298_v31, %s3950_s23 }
 0xb10   : > { %2453 = vrot.lane.b32.xlu0 %v6306_v59, %s3952_s25 }
 0xb13   : > { %2515 = vrot.lane.b32.xlu1 %v6318_v16, %s3949_s22 }
 0xb17   : > { %2531 = vrot.lane.b32.xlu1 %v6318_v16, %s3950_s23 }
 0xb66   : > { %v2376_v25 = vpop.permute.xlu0 %2375 }
 0xb6a   : > { %v2374_v20 = vpop.permute.xlu0 %2373 }
 0xb6d   : > { %v2452_v23 = vpop.permute.xlu1 %2451 }
 0xb6e   : > { %v2390_v49 = vpop.permute.xlu0 %2389 }
 0xb6f   : > { %v2403_v43 = vsel %vm4771_vm11, %v2374_v20, %v2390_v49 }
 0xb70   : > { %v2411_v44 = vmin.f32 %v6249_v12, %v2403_v43  ;;  %v2419_v45 = vmax.f32 %v6249_v12, %v2403_v43 }
 0xb71   : > { %v2450_v7 = vpop.permute.xlu1 %2449 }
 0xb72   : > { %v2378_v17 = vpop.permute.xlu0 %2377  ;;  %v6350_v37 = vsel %vm6203_vm14, %v2411_v44, %v2419_v45 }
 0xb75   : > { %v2466_v18 = vpop.permute.xlu1 %2465 }
 0xb76   : > { %v2394_v11 = vpop.permute.xlu0 %2393  ;;  %v2475_v14 = vsel %vm4564_vm6, %v2450_v7, %v2466_v18 }
 0xb77   : > { %v2483_v24 = vmin.f32 %v2433_v40, %v2475_v14  ;;  %v2491_v9 = vmax.f32 %v2433_v40, %v2475_v14  ;;  %v2405_v12 = vsel %vm4771_vm11, %v2378_v17, %v2394_v11 }
 0xb78   : > { %v2413_v47 = vmin.f32 %v6269_v21, %v2405_v12  ;;  %v2421_v15 = vmax.f32 %v6269_v21, %v2405_v12 }
 0xb79   : > { %v2468_v27 = vpop.permute.xlu1 %2467  ;;  %v2501_v46 = vsel %vm6290_vm3, %v2483_v24, %v2491_v9 }
 0xb7a   : > { %v2476_v30 = vsel %vm4564_vm6, %v2452_v23, %v2468_v27  ;;  %v2392_v34 = vpop.permute.xlu0 %2391  ;;  %v6372_v35 = vsel %vm6203_vm14, %v2413_v47, %v2421_v15 }
 0xb7b   : > { %v2484_v60 = vmin.f32 %v2434_v62, %v2476_v30  ;;  %v2492_v50 = vmax.f32 %v2434_v62, %v2476_v30  ;;  %v2404_v4 = vsel %vm4771_vm11, %v2376_v25, %v2392_v34 }
 0xb7c   : > { %v2412_v5 = vmin.f32 %v6239_v42, %v2404_v4  ;;  %v2420_v8 = vmax.f32 %v6239_v42, %v2404_v4 }
 0xb7d   : > { %v2508_v10 = vpop.permute.xlu1 %2507  ;;  %v2502_v41 = vsel %vm6290_vm3, %v2484_v60, %v2492_v50 }
 0xb7e   : > { %2519 = vrot.lane.b32.xlu1 %v2502_v41, %s3949_s22  ;;  %v6341_v6 = vsel %vm6203_vm14, %v2412_v5, %v2420_v8  ;;  %v2438_v29 = vpop.permute.xlu0 %2437  ;;  %vm6505_vm14 = vmxor %vm2641_vm13, %vm3948_vm4 }
 0xb7f   : > { %2443 = vrot.lane.b32.xlu0 %v6341_v6, %s3951_s24 }
 0xb81   : > { %v2524_v42 = vpop.permute.xlu1 %2523 }
 0xb82   : > { %2517 = vrot.lane.b32.xlu1 %v2501_v46, %s3949_s22  ;;  %v2538_v62 = vsel %vm4462_vm2, %v2508_v10, %v2524_v42  ;;  %v2454_v21 = vpop.permute.xlu0 %2453 }
 0xb83   : > { %2441 = vrot.lane.b32.xlu0 %v6350_v37, %s3951_s24  ;;  %v2546_v36 = vmin.f32 %v6298_v31, %v2538_v62  ;;  %v2554_v61 = vmax.f32 %v6298_v31, %v2538_v62  ;;  %v2469_v56 = vsel %vm4564_vm6, %v2438_v29, %v2454_v21 }
 0xb84   : > { %v2477_v48 = vmin.f32 %v6306_v59, %v2469_v56  ;;  %v2485_v33 = vmax.f32 %v6306_v59, %v2469_v56 }
 0xb85   : > { %v2516_v38 = vpop.permute.xlu1 %2515  ;;  %v6383_v52 = vsel %vm6375_vm9, %v2546_v36, %v2554_v61 }
 0xb86   : > { %2533 = vrot.lane.b32.xlu1 %v2501_v46, %s3950_s23  ;;  %v6406_v1 = vsel %vm6290_vm3, %v2477_v48, %v2485_v33 }
 0xb87   : > { %2457 = vrot.lane.b32.xlu0 %v6350_v37, %s3952_s25 }
 0xb89   : > { %v2532_v40 = vpop.permute.xlu1 %2531 }
 0xb8a   : > { %2535 = vrot.lane.b32.xlu1 %v2502_v41, %s3950_s23  ;;  %v2542_v13 = vsel %vm4462_vm2, %v2516_v38, %v2532_v40 }
 0xb8b   : > { %2445 = vrot.lane.b32.xlu0 %v6372_v35, %s3951_s24  ;;  %v2550_v63 = vmin.f32 %v6318_v16, %v2542_v13  ;;  %v2558_v0 = vmax.f32 %v6318_v16, %v2542_v13 }
 0xb8d   : > { %v2568_v19 = vsel %vm6375_vm9, %v2550_v63, %v2558_v0 }
 0xb8e   : > { %2575 = vrot.lane.b32.xlu1 %v6383_v52, %s3947_s21 }
 0xb8f   : > { %2461 = vrot.lane.b32.xlu0 %v6372_v35, %s3952_s25 }
 0xb92   : > { %2591 = vrot.lane.b32.xlu1 %v6383_v52, %s3946_s17 }
 0xb93   : > { %2459 = vrot.lane.b32.xlu0 %v6341_v6, %s3952_s25 }
 0xb96   : > { %2583 = vrot.lane.b32.xlu1 %v2568_v19, %s3947_s21 }
 0xb97   : > { %2505 = vrot.lane.b32.xlu0 %v6406_v1, %s3949_s22 }
 0xb9a   : > { %2599 = vrot.lane.b32.xlu1 %v2568_v19, %s3946_s17 }
 0xb9b   : > { %2521 = vrot.lane.b32.xlu0 %v6406_v1, %s3950_s23 }
 0xbf0   : > { %v2520_v54 = vpop.permute.xlu1 %2519 }
 0xbf1   : > { %v2444_v31 = vpop.permute.xlu0 %2443 }
 0xbf4   : > { %v2518_v57 = vpop.permute.xlu1 %2517 }
 0xbf5   : > { %v2442_v59 = vpop.permute.xlu0 %2441 }
 0xbf8   : > { %v2534_v2 = vpop.permute.xlu1 %2533 }
 0xbf9   : > { %v2458_v3 = vpop.permute.xlu0 %2457  ;;  %v2543_v25 = vsel %vm4462_vm2, %v2518_v57, %v2534_v2 }
 0xbfa   : > { %v2551_v17 = vmin.f32 %v2501_v46, %v2543_v25  ;;  %v2559_v18 = vmax.f32 %v2501_v46, %v2543_v25  ;;  %v2471_v60 = vsel %vm4564_vm6, %v2442_v59, %v2458_v3 }
 0xbfb   : > { %v2479_v24 = vmin.f32 %v6350_v37, %v2471_v60  ;;  %v2487_v9 = vmax.f32 %v6350_v37, %v2471_v60 }
 0xbfc   : > { %v2536_v16 = vpop.permute.xlu1 %2535  ;;  %v2569_v34 = vsel %vm6375_vm9, %v2551_v17, %v2559_v18 }
 0xbfd   : > { %v2544_v20 = vsel %vm4462_vm2, %v2520_v54, %v2536_v16  ;;  %v2446_v23 = vpop.permute.xlu0 %2445  ;;  %v6455_v46 = vsel %vm6290_vm3, %v2479_v24, %v2487_v9 }
 0xbfe   : > { %v2552_v49 = vmin.f32 %v2502_v41, %v2544_v20  ;;  %v2560_v7 = vmax.f32 %v2502_v41, %v2544_v20 }
 0xc00   : > { %v2576_v11 = vpop.permute.xlu1 %2575  ;;  %v6419_v27 = vsel %vm6375_vm9, %v2552_v49, %v2560_v7 }
 0xc01   : > { %v2462_v14 = vpop.permute.xlu0 %2461  ;;  %2587 = vrot.lane.b32.xlu1 %v6419_v27, %s3947_s21 }
 0xc02   : > { %v2473_v12 = vsel %vm4564_vm6, %v2446_v23, %v2462_v14 }
 0xc03   : > { %v2481_v29 = vmin.f32 %v6372_v35, %v2473_v12  ;;  %v2489_v62 = vmax.f32 %v6372_v35, %v2473_v12 }
 0xc04   : > { %v2592_v30 = vpop.permute.xlu1 %2591 }
 0xc05   : > { %v2460_v43 = vpop.permute.xlu0 %2459  ;;  %2585 = vrot.lane.b32.xlu1 %v2569_v34, %s3947_s21  ;;  %v2606_v10 = vsel %vm4458_vm1, %v2576_v11, %v2592_v30  ;;  %v2499_v40 = vsel %vm6290_vm3, %v2481_v29, %v2489_v62 }
 0xc06   : > { %v2472_v50 = vsel %vm4564_vm6, %v2444_v31, %v2460_v43  ;;  %v2614_v44 = vmin.f32 %v6383_v52, %v2606_v10  ;;  %v2622_v45 = vmax.f32 %v6383_v52, %v2606_v10 }
 0xc07   : > { %v2480_v4 = vmin.f32 %v6341_v6, %v2472_v50  ;;  %v2488_v5 = vmax.f32 %v6341_v6, %v2472_v50 }
 0xc08   : > { %v2584_v8 = vpop.permute.xlu1 %2583  ;;  %v2632_v15 = vsel %vm6458_vm12, %v2614_v44, %v2622_v45 }
 0xc09   : > { %2601 = vrot.lane.b32.xlu1 %v2569_v34, %s3946_s17  ;;  %v6439_v41 = vsel %vm6290_vm3, %v2480_v4, %v2488_v5  ;;  %v2506_v36 = vpop.permute.xlu0 %2505  ;;  %vm2753_vm3 = vmxor %vm3948_vm4, %vm5077_vm5 }
 0xc0a   : > { %2511 = vrot.lane.b32.xlu0 %v6439_v41, %s3949_s22  ;;  %vm6646_vm8 = vmxor %vm2753_vm3, %vm3948_vm4 }
 0xc0c   : > { %v2600_v6 = vpop.permute.xlu1 %2599 }
 0xc0d   : > { %v2610_v42 = vsel %vm4458_vm1, %v2584_v8, %v2600_v6  ;;  %2603 = vrot.lane.b32.xlu1 %v6419_v27, %s3946_s17  ;;  %v2522_v21 = vpop.permute.xlu0 %2521 }
 0xc0e   : > { %2509 = vrot.lane.b32.xlu0 %v6455_v46, %s3949_s22  ;;  %v2618_v38 = vmin.f32 %v2568_v19, %v2610_v42  ;;  %v2626_v47 = vmax.f32 %v2568_v19, %v2610_v42  ;;  %v2537_v35 = vsel %vm4462_vm2, %v2506_v36, %v2522_v21 }
 0xc0f   : > { %v2545_v52 = vmin.f32 %v6406_v1, %v2537_v35  ;;  %v2553_v13 = vmax.f32 %v6406_v1, %v2537_v35 }
 0xc10   : > { %v2636_v61 = vsel %vm6458_vm12, %v2618_v38, %v2626_v47 }
 0xc11   : > { %2645 = vrot.lane.b32.xlu1 %v2632_v15, %s3959_s4  ;;  %v2563_v56 = vsel %vm6375_vm9, %v2545_v52, %v2553_v13 }
 0xc12   : > { %2525 = vrot.lane.b32.xlu0 %v6455_v46, %s3950_s23 }
 0xc15   : > { %2653 = vrot.lane.b32.xlu1 %v2636_v61, %s3959_s4 }
 0xc16   : > { %2513 = vrot.lane.b32.xlu0 %v2499_v40, %s3949_s22 }
 0xc1a   : > { %2529 = vrot.lane.b32.xlu0 %v2499_v40, %s3950_s23 }
 0xc1e   : > { %2527 = vrot.lane.b32.xlu0 %v6439_v41, %s3950_s23 }
 0xc22   : > { %2573 = vrot.lane.b32.xlu0 %v2563_v56, %s3947_s21 }
 0xc26   : > { %2589 = vrot.lane.b32.xlu0 %v2563_v56, %s3946_s17 }
 0xc73   : > { %v2588_v53 = vpop.permute.xlu1 %2587 }
 0xc77   : > { %v2586_v63 = vpop.permute.xlu1 %2585 }
 0xc7b   : > { %v2602_v0 = vpop.permute.xlu1 %2601 }
 0xc7c   : > { %v2611_v48 = vsel %vm4458_vm1, %v2586_v63, %v2602_v0  ;;  %v2512_v33 = vpop.permute.xlu0 %2511 }
 0xc7d   : > { %v2619_v19 = vmin.f32 %v2569_v34, %v2611_v48  ;;  %v2627_v54 = vmax.f32 %v2569_v34, %v2611_v48 }
 0xc7f   : > { %v2604_v1 = vpop.permute.xlu1 %2603  ;;  %v2637_v31 = vsel %vm6458_vm12, %v2619_v19, %v2627_v54 }
 0xc80   : > { %v2612_v57 = vsel %vm4458_vm1, %v2588_v53, %v2604_v1  ;;  %v2510_v59 = vpop.permute.xlu0 %2509  ;;  %2655 = vrot.lane.b32.xlu1 %v2637_v31, %s3959_s4 }
 0xc81   : > { %v2620_v2 = vmin.f32 %v6419_v27, %v2612_v57  ;;  %v2628_v3 = vmax.f32 %v6419_v27, %v2612_v57 }
 0xc83   : > { %v2646_v16 = vpop.permute.xlu1 %2645  ;;  %v2638_v25 = vsel %vm6458_vm12, %v2620_v2, %v2628_v3 }
 0xc84   : > { %v2660_v23 = vmin.f32 %v2632_v15, %v2646_v16  ;;  %v2668_v49 = vmax.f32 %v2632_v15, %v2646_v16  ;;  %v2526_v7 = vpop.permute.xlu0 %2525  ;;  %2657 = vrot.lane.b32.xlu1 %v2638_v25, %s3959_s4 }
 0xc85   : > { %v2539_v43 = vsel %vm4462_vm2, %v2510_v59, %v2526_v7 }
 0xc86   : > { %v2678_v28 = vsel %vm6505_vm14, %v2660_v23, %v2668_v49  ;;  %v2547_v5 = vmin.f32 %v6455_v46, %v2539_v43  ;;  %v2555_v8 = vmax.f32 %v6455_v46, %v2539_v43 }
 0xc87   : > { %v2654_v17 = vpop.permute.xlu1 %2653 }
 0xc88   : > { %v2514_v18 = vpop.permute.xlu0 %2513  ;;  %2689 = vrot.lane.b32.xlu1 %v2678_v28, %s3957_s30  ;;  %v2664_v11 = vmin.f32 %v2636_v61, %v2654_v17  ;;  %v2672_v27 = vmax.f32 %v2636_v61, %v2654_v17  ;;  %v2565_v9 = vsel %vm6375_vm9, %v2547_v5, %v2555_v8 }
 0xc8a   : > { %v6516_v30 = vsel %vm6505_vm14, %v2664_v11, %v2672_v27 }
 0xc8c   : > { %v2530_v14 = vpop.permute.xlu0 %2529  ;;  %2705 = vrot.lane.b32.xlu1 %v2678_v28, %s3958_s3 }
 0xc8d   : > { %v2541_v10 = vsel %vm4462_vm2, %v2514_v18, %v2530_v14 }
 0xc8e   : > { %v2557_v44 = vmax.f32 %v2499_v40, %v2541_v10 }
 0xc90   : > { %v2528_v34 = vpop.permute.xlu0 %2527  ;;  %2697 = vrot.lane.b32.xlu1 %v6516_v30, %s3957_s30 }
 0xc91   : > { %v2540_v60 = vsel %vm4462_vm2, %v2512_v33, %v2528_v34 }
 0xc92   : > { %v2548_v50 = vmin.f32 %v6439_v41, %v2540_v60  ;;  %v2556_v4 = vmax.f32 %v6439_v41, %v2540_v60  ;;  %v2549_v41 = vmin.f32 %v2499_v40, %v2541_v10 }
 0xc94   : > { %2713 = vrot.lane.b32.xlu1 %v6516_v30, %s3958_s3  ;;  %v6532_v24 = vsel %vm6375_vm9, %v2548_v50, %v2556_v4  ;;  %v2574_v45 = vpop.permute.xlu0 %2573  ;;  %v2567_v6 = vsel %vm6375_vm9, %v2549_v41, %v2557_v44  ;;  %vm2821_vm9 = vmxor %vm3948_vm4, %vm4771_vm11 }
 0xc95   : > { %2579 = vrot.lane.b32.xlu0 %v6532_v24, %s3947_s21  ;;  %vm6730_vm10 = vmxor %vm2821_vm9, %vm3948_vm4 }
 0xc98   : > { %v2590_v42 = vpop.permute.xlu0 %2589 }
 0xc99   : > { %2577 = vrot.lane.b32.xlu0 %v2565_v9, %s3947_s21  ;;  %v2605_v46 = vsel %vm4458_vm1, %v2574_v45, %v2590_v42 }
 0xc9a   : > { %v2613_v12 = vmin.f32 %v2563_v56, %v2605_v46  ;;  %v2621_v38 = vmax.f32 %v2563_v56, %v2605_v46 }
 0xc9c   : > { %v2631_v47 = vsel %vm6458_vm12, %v2613_v12, %v2621_v38 }
 0xc9d   : > { %2593 = vrot.lane.b32.xlu0 %v2565_v9, %s3946_s17 }
 0xca1   : > { %2581 = vrot.lane.b32.xlu0 %v2567_v6, %s3947_s21 }
 0xca5   : > { %2597 = vrot.lane.b32.xlu0 %v2567_v6, %s3946_s17 }
 0xca9   : > { %2595 = vrot.lane.b32.xlu0 %v6532_v24, %s3946_s17 }
 0xcad   : > { %2643 = vrot.lane.b32.xlu0 %v2631_v47, %s3959_s4 }
 0xcf2   : > { %v2656_v51 = vpop.permute.xlu1 %2655 }
 0xcf3   : > { %v2665_v36 = vmin.f32 %v2637_v31, %v2656_v51  ;;  %v2673_v61 = vmax.f32 %v2637_v31, %v2656_v51 }
 0xcf5   : > { %v6561_v35 = vsel %vm6505_vm14, %v2665_v36, %v2673_v61 }
 0xcf6   : > { %v2658_v15 = vpop.permute.xlu1 %2657 }
 0xcf7   : > { %v2666_v29 = vmin.f32 %v2638_v25, %v2658_v15  ;;  %v2674_v62 = vmax.f32 %v2638_v25, %v2658_v15 }
 0xcf9   : > { %v6555_v40 = vsel %vm6505_vm14, %v2666_v29, %v2674_v62 }
 0xcfa   : > { %2701 = vrot.lane.b32.xlu1 %v6555_v40, %s3957_s30  ;;  %v2690_v21 = vpop.permute.xlu1 %2689 }
 0xcfe   : > { %2699 = vrot.lane.b32.xlu1 %v6561_v35, %s3957_s30  ;;  %v2706_v52 = vpop.permute.xlu1 %2705 }
 0xcff   : > { %v2720_v13 = vsel %vm5454_vm0, %v2690_v21, %v2706_v52 }
 0xd00   : > { %v2728_v53 = vmin.f32 %v2678_v28, %v2720_v13  ;;  %v2736_v63 = vmax.f32 %v2678_v28, %v2720_v13 }
 0xd02   : > { %2715 = vrot.lane.b32.xlu1 %v6561_v35, %s3958_s3  ;;  %v2698_v56 = vpop.permute.xlu1 %2697  ;;  %v6581_v19 = vsel %vm6575_vm15, %v2728_v53, %v2736_v63 }
 0xd06   : > { %2717 = vrot.lane.b32.xlu1 %v6555_v40, %s3958_s3  ;;  %v2714_v48 = vpop.permute.xlu1 %2713 }
 0xd07   : > { %v2580_v33 = vpop.permute.xlu0 %2579  ;;  %v2724_v54 = vsel %vm5454_vm0, %v2698_v56, %v2714_v48 }
 0xd08   : > { %v2732_v31 = vmin.f32 %v6516_v30, %v2724_v54  ;;  %v2740_v57 = vmax.f32 %v6516_v30, %v2724_v54 }
 0xd0a   : > { %2757 = vrot.lane.b32.xlu1 %v6581_v19, %s3955_s28  ;;  %v2750_v25 = vsel %vm6575_vm15, %v2732_v31, %v2740_v57 }
 0xd0b   : > { %v2578_v1 = vpop.permute.xlu0 %2577 }
 0xd0e   : > { %2773 = vrot.lane.b32.xlu1 %v6581_v19, %s3956_s29 }
 0xd0f   : > { %v2594_v59 = vpop.permute.xlu0 %2593 }
 0xd10   : > { %v2607_v2 = vsel %vm4458_vm1, %v2578_v1, %v2594_v59 }
 0xd11   : > { %v2615_v3 = vmin.f32 %v2565_v9, %v2607_v2  ;;  %v2623_v16 = vmax.f32 %v2565_v9, %v2607_v2 }
 0xd12   : > { %2765 = vrot.lane.b32.xlu1 %v2750_v25, %s3955_s28 }
 0xd13   : > { %v2582_v23 = vpop.permute.xlu0 %2581  ;;  %v6598_v49 = vsel %vm6458_vm12, %v2615_v3, %v2623_v16 }
 0xd14   : > { %2647 = vrot.lane.b32.xlu0 %v6598_v49, %s3959_s4 }
 0xd16   : > { %2781 = vrot.lane.b32.xlu1 %v2750_v25, %s3956_s29 }
 0xd17   : > { %v2598_v7 = vpop.permute.xlu0 %2597 }
 0xd18   : > { %v2609_v28 = vsel %vm4458_vm1, %v2582_v23, %v2598_v7 }
 0xd19   : > { %v2617_v17 = vmin.f32 %v2567_v6, %v2609_v28  ;;  %v2625_v18 = vmax.f32 %v2567_v6, %v2609_v28 }
 0xd1b   : > { %v2596_v11 = vpop.permute.xlu0 %2595  ;;  %v6607_v27 = vsel %vm6458_vm12, %v2617_v17, %v2625_v18 }
 0xd1c   : > { %v2608_v14 = vsel %vm4458_vm1, %v2580_v33, %v2596_v11  ;;  %2651 = vrot.lane.b32.xlu0 %v6607_v27, %s3959_s4 }
 0xd1d   : > { %v2616_v30 = vmin.f32 %v6532_v24, %v2608_v14  ;;  %v2624_v34 = vmax.f32 %v6532_v24, %v2608_v14 }
 0xd1f   : > { %v2644_v43 = vpop.permute.xlu0 %2643  ;;  %v2634_v60 = vsel %vm6458_vm12, %v2616_v30, %v2624_v34 }
 0xd20   : > { %v2659_v50 = vmin.f32 %v2631_v47, %v2644_v43  ;;  %v2667_v4 = vmax.f32 %v2631_v47, %v2644_v43  ;;  %2649 = vrot.lane.b32.xlu0 %v2634_v60, %s3959_s4 }
 0xd22   : > { %v2677_v5 = vsel %vm6505_vm14, %v2659_v50, %v2667_v4 }
 0xd24   : > { %2687 = vrot.lane.b32.xlu0 %v2677_v5, %s3957_s30 }
 0xd28   : > { %2703 = vrot.lane.b32.xlu0 %v2677_v5, %s3958_s3 }
 0xd6c   : > { %v2702_v8 = vpop.permute.xlu1 %2701 }
 0xd70   : > { %v2700_v9 = vpop.permute.xlu1 %2699 }
 0xd74   : > { %v2716_v10 = vpop.permute.xlu1 %2715 }
 0xd75   : > { %v2725_v24 = vsel %vm5454_vm0, %v2700_v9, %v2716_v10 }
 0xd76   : > { %v2733_v6 = vmin.f32 %v6561_v35, %v2725_v24  ;;  %v2741_v42 = vmax.f32 %v6561_v35, %v2725_v24 }
 0xd78   : > { %v2718_v41 = vpop.permute.xlu1 %2717  ;;  %v2751_v47 = vsel %vm6575_vm15, %v2733_v6, %v2741_v42 }
 0xd79   : > { %v2726_v37 = vsel %vm5454_vm0, %v2702_v8, %v2718_v41 }
 0xd7a   : > { %v2734_v44 = vmin.f32 %v6555_v40, %v2726_v37  ;;  %v2742_v45 = vmax.f32 %v6555_v40, %v2726_v37 }
 0xd7c   : > { %v2758_v46 = vpop.permute.xlu1 %2757  ;;  %v2752_v12 = vsel %vm6575_vm15, %v2734_v44, %v2742_v45 }
 0xd7d   : > { %2769 = vrot.lane.b32.xlu1 %v2752_v12, %s3955_s28 }
 0xd80   : > { %v2774_v38 = vpop.permute.xlu1 %2773 }
 0xd81   : > { %2767 = vrot.lane.b32.xlu1 %v2751_v47, %s3955_s28  ;;  %v2788_v15 = vsel %vm5077_vm5, %v2758_v46, %v2774_v38 }
 0xd82   : > { %v2796_v29 = vmin.f32 %v6581_v19, %v2788_v15  ;;  %v2804_v62 = vmax.f32 %v6581_v19, %v2788_v15 }
 0xd84   : > { %v2766_v51 = vpop.permute.xlu1 %2765  ;;  %v6652_v21 = vsel %vm6646_vm8, %v2796_v29, %v2804_v62 }
 0xd85   : > { %2783 = vrot.lane.b32.xlu1 %v2751_v47, %s3956_s29 }
 0xd86   : > { %v2648_v61 = vpop.permute.xlu0 %2647 }
 0xd87   : > { %v2661_v19 = vmin.f32 %v6598_v49, %v2648_v61  ;;  %v2669_v54 = vmax.f32 %v6598_v49, %v2648_v61 }
 0xd88   : > { %v2782_v40 = vpop.permute.xlu1 %2781 }
 0xd89   : > { %2785 = vrot.lane.b32.xlu1 %v2752_v12, %s3956_s29  ;;  %v2792_v35 = vsel %vm5077_vm5, %v2766_v51, %v2782_v40  ;;  %v6674_v31 = vsel %vm6505_vm14, %v2661_v19, %v2669_v54 }
 0xd8a   : > { %v2800_v13 = vmin.f32 %v2750_v25, %v2792_v35  ;;  %v2808_v56 = vmax.f32 %v2750_v25, %v2792_v35 }
 0xd8c   : > { %v2818_v33 = vsel %vm6646_vm8, %v2800_v13, %v2808_v56 }
 0xd8d   : > { %2825 = vrot.lane.b32.xlu1 %v6652_v21, %s3953_s26 }
 0xd8e   : > { %v2652_v52 = vpop.permute.xlu0 %2651 }
 0xd8f   : > { %v2663_v57 = vmin.f32 %v6607_v27, %v2652_v52  ;;  %v2671_v59 = vmax.f32 %v6607_v27, %v2652_v52 }
 0xd91   : > { %2841 = vrot.lane.b32.xlu1 %v6652_v21, %s3954_s27  ;;  %v6684_v3 = vsel %vm6505_vm14, %v2663_v57, %v2671_v59 }
 0xd92   : > { %v2650_v53 = vpop.permute.xlu0 %2649 }
 0xd93   : > { %v2662_v63 = vmin.f32 %v2634_v60, %v2650_v53  ;;  %v2670_v48 = vmax.f32 %v2634_v60, %v2650_v53 }
 0xd95   : > { %2833 = vrot.lane.b32.xlu1 %v2818_v33, %s3953_s26  ;;  %v6667_v1 = vsel %vm6505_vm14, %v2662_v63, %v2670_v48 }
 0xd96   : > { %2693 = vrot.lane.b32.xlu0 %v6667_v1, %s3957_s30  ;;  %v2688_v2 = vpop.permute.xlu0 %2687 }
 0xd99   : > { %2849 = vrot.lane.b32.xlu1 %v2818_v33, %s3954_s27 }
 0xd9a   : > { %2691 = vrot.lane.b32.xlu0 %v6674_v31, %s3957_s30  ;;  %v2704_v16 = vpop.permute.xlu0 %2703 }
 0xd9b   : > { %v2719_v25 = vsel %vm5454_vm0, %v2688_v2, %v2704_v16 }
 0xd9c   : > { %v2727_v23 = vmin.f32 %v2677_v5, %v2719_v25  ;;  %v2735_v49 = vmax.f32 %v2677_v5, %v2719_v25 }
 0xd9e   : > { %2707 = vrot.lane.b32.xlu0 %v6674_v31, %s3958_s3  ;;  %v6696_v20 = vsel %vm6575_vm15, %v2727_v23, %v2735_v49 }
 0xda2   : > { %2695 = vrot.lane.b32.xlu0 %v6684_v3, %s3957_s30 }
 0xda6   : > { %2711 = vrot.lane.b32.xlu0 %v6684_v3, %s3958_s3 }
 0xdaa   : > { %2709 = vrot.lane.b32.xlu0 %v6667_v1, %s3958_s3 }
 0xdae   : > { %2755 = vrot.lane.b32.xlu0 %v6696_v20, %s3955_s28 }
 0xdb2   : > { %2771 = vrot.lane.b32.xlu0 %v6696_v20, %s3956_s29 }
 0xdef   : > { %v2770_v7 = vpop.permute.xlu1 %2769 }
 0xdf3   : > { %v2768_v28 = vpop.permute.xlu1 %2767 }
 0xdf7   : > { %v2784_v17 = vpop.permute.xlu1 %2783 }
 0xdf8   : > { %v2793_v11 = vsel %vm5077_vm5, %v2768_v28, %v2784_v17 }
 0xdf9   : > { %v2801_v34 = vmin.f32 %v2751_v47, %v2793_v11  ;;  %v2809_v43 = vmax.f32 %v2751_v47, %v2793_v11 }
 0xdfb   : > { %v2786_v18 = vpop.permute.xlu1 %2785  ;;  %v6714_v5 = vsel %vm6646_vm8, %v2801_v34, %v2809_v43 }
 0xdfc   : > { %v2794_v27 = vsel %vm5077_vm5, %v2770_v7, %v2786_v18 }
 0xdfd   : > { %v2802_v14 = vmin.f32 %v2752_v12, %v2794_v27  ;;  %v2810_v30 = vmax.f32 %v2752_v12, %v2794_v27 }
 0xdff   : > { %v2826_v60 = vpop.permute.xlu1 %2825  ;;  %v6708_v50 = vsel %vm6646_vm8, %v2802_v14, %v2810_v30 }
 0xe00   : > { %2837 = vrot.lane.b32.xlu1 %v6708_v50, %s3953_s26 }
 0xe03   : > { %v2842_v4 = vpop.permute.xlu1 %2841 }
 0xe04   : > { %2835 = vrot.lane.b32.xlu1 %v6714_v5, %s3953_s26  ;;  %v2856_v9 = vsel %vm4771_vm11, %v2826_v60, %v2842_v4 }
 0xe05   : > { %v2864_v41 = vmin.f32 %v6652_v21, %v2856_v9  ;;  %v2872_v24 = vmax.f32 %v6652_v21, %v2856_v9 }
 0xe07   : > { %v2834_v8 = vpop.permute.xlu1 %2833  ;;  %v6736_v6 = vsel %vm6730_vm10, %v2864_v41, %v2872_v24 }
 0xe08   : > { %v2694_v10 = vpop.permute.xlu0 %2693  ;;  %2851 = vrot.lane.b32.xlu1 %v6714_v5, %s3954_s27 }
 0xe0b   : > { %v2850_v45 = vpop.permute.xlu1 %2849 }
 0xe0c   : > { %v2692_v37 = vpop.permute.xlu0 %2691  ;;  %2853 = vrot.lane.b32.xlu1 %v6708_v50, %s3954_s27  ;;  %v2860_v42 = vsel %vm4771_vm11, %v2834_v8, %v2850_v45 }
 0xe0d   : > { %v2868_v12 = vmin.f32 %v2818_v33, %v2860_v42  ;;  %v2876_v38 = vmax.f32 %v2818_v33, %v2860_v42 }
 0xe0f   : > { %v6746_v51 = vsel %vm6730_vm10, %v2868_v12, %v2876_v38 }
 0xe10   : > { %v2708_v46 = vpop.permute.xlu0 %2707  ;;  %2893 = vrot.lane.b32.xlu1 %v6736_v6, %s3951_s24 }
 0xe11   : > { %v2721_v62 = vsel %vm5454_vm0, %v2692_v37, %v2708_v46 }
 0xe12   : > { %v2729_v35 = vmin.f32 %v6674_v31, %v2721_v62  ;;  %v2737_v52 = vmax.f32 %v6674_v31, %v2721_v62 }
 0xe14   : > { %v2696_v47 = vpop.permute.xlu0 %2695  ;;  %2909 = vrot.lane.b32.xlu1 %v6736_v6, %s3952_s25  ;;  %v6768_v56 = vsel %vm6575_vm15, %v2729_v35, %v2737_v52 }
 0xe18   : > { %v2712_v15 = vpop.permute.xlu0 %2711  ;;  %2901 = vrot.lane.b32.xlu1 %v6746_v51, %s3951_s24 }
 0xe19   : > { %v2723_v53 = vsel %vm5454_vm0, %v2696_v47, %v2712_v15 }
 0xe1a   : > { %v2731_v63 = vmin.f32 %v6684_v3, %v2723_v53  ;;  %v2739_v48 = vmax.f32 %v6684_v3, %v2723_v53 }
 0xe1c   : > { %v2710_v29 = vpop.permute.xlu0 %2709  ;;  %2917 = vrot.lane.b32.xlu1 %v6746_v51, %s3952_s25  ;;  %v6780_v19 = vsel %vm6575_vm15, %v2731_v63, %v2739_v48 }
 0xe1d   : > { %v2722_v61 = vsel %vm5454_vm0, %v2694_v10, %v2710_v29  ;;  %vm2889_vm0 = vmxor %vm3948_vm4, %vm4564_vm6 }
 0xe1e   : > { %v2730_v40 = vmin.f32 %v6667_v1, %v2722_v61  ;;  %v2738_v21 = vmax.f32 %v6667_v1, %v2722_v61  ;;  %vm6832_vm12 = vmxor %vm2889_vm0, %vm3948_vm4 }
 0xe20   : > { %v6762_v13 = vsel %vm6575_vm15, %v2730_v40, %v2738_v21  ;;  %v2756_v33 = vpop.permute.xlu0 %2755 }
 0xe21   : > { %2761 = vrot.lane.b32.xlu0 %v6762_v13, %s3955_s28 }
 0xe24   : > { %v2772_v58 = vpop.permute.xlu0 %2771 }
 0xe25   : > { %2759 = vrot.lane.b32.xlu0 %v6768_v56, %s3955_s28  ;;  %v2787_v54 = vsel %vm5077_vm5, %v2756_v33, %v2772_v58 }
 0xe26   : > { %v2795_v1 = vmin.f32 %v6696_v20, %v2787_v54  ;;  %v2803_v31 = vmax.f32 %v6696_v20, %v2787_v54 }
 0xe28   : > { %v6794_v0 = vsel %vm6646_vm8, %v2795_v1, %v2803_v31 }
 0xe29   : > { %2775 = vrot.lane.b32.xlu0 %v6768_v56, %s3956_s29 }
 0xe2d   : > { %2763 = vrot.lane.b32.xlu0 %v6780_v19, %s3955_s28 }
 0xe31   : > { %2779 = vrot.lane.b32.xlu0 %v6780_v19, %s3956_s29 }
 0xe35   : > { %2777 = vrot.lane.b32.xlu0 %v6762_v13, %s3956_s29 }
 0xe39   : > { %2823 = vrot.lane.b32.xlu0 %v6794_v0, %s3953_s26 }
 0xe3d   : > { %2839 = vrot.lane.b32.xlu0 %v6794_v0, %s3954_s27 }
 0xe72   : > { %v2838_v57 = vpop.permute.xlu1 %2837 }
 0xe76   : > { %v2836_v59 = vpop.permute.xlu1 %2835 }
 0xe7a   : > { %v2852_v2 = vpop.permute.xlu1 %2851 }
 0xe7b   : > { %v2861_v16 = vsel %vm4771_vm11, %v2836_v59, %v2852_v2 }
 0xe7c   : > { %v2869_v20 = vmin.f32 %v6714_v5, %v2861_v16  ;;  %v2877_v7 = vmax.f32 %v6714_v5, %v2861_v16 }
 0xe7e   : > { %v2854_v3 = vpop.permute.xlu1 %2853  ;;  %v6816_v11 = vsel %vm6730_vm10, %v2869_v20, %v2877_v7 }
 0xe7f   : > { %v2862_v25 = vsel %vm4771_vm11, %v2838_v57, %v2854_v3 }
 0xe80   : > { %v2870_v23 = vmin.f32 %v6708_v50, %v2862_v25  ;;  %v2878_v49 = vmax.f32 %v6708_v50, %v2862_v25 }
 0xe82   : > { %v2894_v28 = vpop.permute.xlu1 %2893  ;;  %v6810_v17 = vsel %vm6730_vm10, %v2870_v23, %v2878_v49 }
 0xe83   : > { %2905 = vrot.lane.b32.xlu1 %v6810_v17, %s3951_s24 }
 0xe86   : > { %v2910_v18 = vpop.permute.xlu1 %2909 }
 0xe87   : > { %2903 = vrot.lane.b32.xlu1 %v6816_v11, %s3951_s24  ;;  %v2924_v14 = vsel %vm4564_vm6, %v2894_v28, %v2910_v18 }
 0xe88   : > { %v2932_v30 = vmin.f32 %v6736_v6, %v2924_v14  ;;  %v2940_v34 = vmax.f32 %v6736_v6, %v2924_v14 }
 0xe8a   : > { %v2902_v27 = vpop.permute.xlu1 %2901  ;;  %v6838_v50 = vsel %vm6832_vm12, %v2932_v30, %v2940_v34 }
 0xe8b   : > { %2919 = vrot.lane.b32.xlu1 %v6816_v11, %s3952_s25 }
 0xe8e   : > { %v2918_v60 = vpop.permute.xlu1 %2917 }
 0xe8f   : > { %2921 = vrot.lane.b32.xlu1 %v6810_v17, %s3952_s25  ;;  %v2928_v4 = vsel %vm4564_vm6, %v2902_v27, %v2918_v60 }
 0xe90   : > { %v2936_v8 = vmin.f32 %v6746_v51, %v2928_v4  ;;  %v2944_v9 = vmax.f32 %v6746_v51, %v2928_v4 }
 0xe92   : > { %v6850_v41 = vsel %vm6832_vm12, %v2936_v8, %v2944_v9 }
 0xe93   : > { %v2762_v5 = vpop.permute.xlu0 %2761  ;;  %2961 = vrot.lane.b32.xlu1 %v6838_v50, %s3949_s22 }
 0xe97   : > { %v2760_v10 = vpop.permute.xlu0 %2759  ;;  %2977 = vrot.lane.b32.xlu1 %v6838_v50, %s3950_s23 }
 0xe9b   : > { %v2776_v24 = vpop.permute.xlu0 %2775  ;;  %2969 = vrot.lane.b32.xlu1 %v6850_v41, %s3949_s22 }
 0xe9c   : > { %v2789_v42 = vsel %vm5077_vm5, %v2760_v10, %v2776_v24 }
 0xe9d   : > { %v2797_v47 = vmin.f32 %v6768_v56, %v2789_v42  ;;  %v2805_v51 = vmax.f32 %v6768_v56, %v2789_v42 }
 0xe9f   : > { %v2764_v37 = vpop.permute.xlu0 %2763  ;;  %2985 = vrot.lane.b32.xlu1 %v6850_v41, %s3950_s23  ;;  %v6872_v29 = vsel %vm6646_vm8, %v2797_v47, %v2805_v51 }
 0xea3   : > { %v2780_v45 = vpop.permute.xlu0 %2779 }
 0xea4   : > { %v2791_v62 = vsel %vm5077_vm5, %v2764_v37, %v2780_v45 }
 0xea5   : > { %v2799_v61 = vmin.f32 %v6780_v19, %v2791_v62  ;;  %v2807_v40 = vmax.f32 %v6780_v19, %v2791_v62 }
 0xea7   : > { %v2778_v6 = vpop.permute.xlu0 %2777  ;;  %v6884_v35 = vsel %vm6646_vm8, %v2799_v61, %v2807_v40 }
 0xea8   : > { %v2790_v46 = vsel %vm5077_vm5, %v2762_v5, %v2778_v6  ;;  %vm2957_vm5 = vmxor %vm3948_vm4, %vm4462_vm2 }
 0xea9   : > { %v2798_v12 = vmin.f32 %v6762_v13, %v2790_v46  ;;  %v2806_v38 = vmax.f32 %v6762_v13, %v2790_v46  ;;  %vm6936_vm13 = vmxor %vm2957_vm5, %vm3948_vm4 }
 0xeab   : > { %v6866_v15 = vsel %vm6646_vm8, %v2798_v12, %v2806_v38  ;;  %v2824_v21 = vpop.permute.xlu0 %2823 }
 0xeac   : > { %2829 = vrot.lane.b32.xlu0 %v6866_v15, %s3953_s26 }
 0xeaf   : > { %v2840_v55 = vpop.permute.xlu0 %2839 }
 0xeb0   : > { %2827 = vrot.lane.b32.xlu0 %v6872_v29, %s3953_s26  ;;  %v2855_v52 = vsel %vm4771_vm11, %v2824_v21, %v2840_v55 }
 0xeb1   : > { %v2863_v13 = vmin.f32 %v6794_v0, %v2855_v52  ;;  %v2871_v56 = vmax.f32 %v6794_v0, %v2855_v52 }
 0xeb3   : > { %v6898_v36 = vsel %vm6730_vm10, %v2863_v13, %v2871_v56 }
 0xeb4   : > { %2843 = vrot.lane.b32.xlu0 %v6872_v29, %s3954_s27 }
 0xeb8   : > { %2831 = vrot.lane.b32.xlu0 %v6884_v35, %s3953_s26 }
 0xebc   : > { %2847 = vrot.lane.b32.xlu0 %v6884_v35, %s3954_s27 }
 0xec0   : > { %2845 = vrot.lane.b32.xlu0 %v6866_v15, %s3954_s27 }
 0xec4   : > { %2891 = vrot.lane.b32.xlu0 %v6898_v36, %s3951_s24 }
 0xec8   : > { %2907 = vrot.lane.b32.xlu0 %v6898_v36, %s3952_s25 }
 0xef5   : > { %v2906_v53 = vpop.permute.xlu1 %2905 }
 0xef9   : > { %v2904_v63 = vpop.permute.xlu1 %2903 }
 0xefd   : > { %v2920_v48 = vpop.permute.xlu1 %2919 }
 0xefe   : > { %v2929_v19 = vsel %vm4564_vm6, %v2904_v63, %v2920_v48 }
 0xeff   : > { %v2937_v31 = vmin.f32 %v6816_v11, %v2929_v19  ;;  %v2945_v0 = vmax.f32 %v6816_v11, %v2929_v19 }
 0xf01   : > { %v2922_v33 = vpop.permute.xlu1 %2921  ;;  %v6920_v3 = vsel %vm6832_vm12, %v2937_v31, %v2945_v0 }
 0xf02   : > { %v2930_v58 = vsel %vm4564_vm6, %v2906_v53, %v2922_v33 }
 0xf03   : > { %v2938_v54 = vmin.f32 %v6810_v17, %v2930_v58  ;;  %v2946_v1 = vmax.f32 %v6810_v17, %v2930_v58 }
 0xf05   : > { %v2962_v57 = vpop.permute.xlu1 %2961  ;;  %v6914_v59 = vsel %vm6832_vm12, %v2938_v54, %v2946_v1 }
 0xf06   : > { %2973 = vrot.lane.b32.xlu1 %v6914_v59, %s3949_s22 }
 0xf09   : > { %v2978_v2 = vpop.permute.xlu1 %2977 }
 0xf0a   : > { %2971 = vrot.lane.b32.xlu1 %v6920_v3, %s3949_s22  ;;  %v2992_v25 = vsel %vm4462_vm2, %v2962_v57, %v2978_v2 }
 0xf0b   : > { %v3000_v23 = vmin.f32 %v6838_v50, %v2992_v25  ;;  %v3008_v49 = vmax.f32 %v6838_v50, %v2992_v25 }
 0xf0d   : > { %v2970_v16 = vpop.permute.xlu1 %2969  ;;  %v6942_v28 = vsel %vm6936_vm13, %v3000_v23, %v3008_v49 }
 0xf0e   : > { %2987 = vrot.lane.b32.xlu1 %v6920_v3, %s3950_s23 }
 0xf11   : > { %v2986_v7 = vpop.permute.xlu1 %2985 }
 0xf12   : > { %2989 = vrot.lane.b32.xlu1 %v6914_v59, %s3950_s23  ;;  %v2996_v17 = vsel %vm4462_vm2, %v2970_v16, %v2986_v7 }
 0xf13   : > { %v3004_v18 = vmin.f32 %v6850_v41, %v2996_v17  ;;  %v3012_v11 = vmax.f32 %v6850_v41, %v2996_v17 }
 0xf15   : > { %v6954_v27 = vsel %vm6936_vm13, %v3004_v18, %v3012_v11 }
 0xf16   : > { %3029 = vrot.lane.b32.xlu1 %v6942_v28, %s3947_s21 }
 0xf1a   : > { %3045 = vrot.lane.b32.xlu1 %v6942_v28, %s3946_s17 }
 0xf1e   : > { %v2830_v14 = vpop.permute.xlu0 %2829  ;;  %3037 = vrot.lane.b32.xlu1 %v6954_v27, %s3947_s21 }
 0xf22   : > { %v2828_v30 = vpop.permute.xlu0 %2827  ;;  %3053 = vrot.lane.b32.xlu1 %v6954_v27, %s3946_s17 }
 0xf26   : > { %v2844_v34 = vpop.permute.xlu0 %2843 }
 0xf27   : > { %v2857_v5 = vsel %vm4771_vm11, %v2828_v30, %v2844_v34 }
 0xf28   : > { %v2865_v41 = vmin.f32 %v6872_v29, %v2857_v5  ;;  %v2873_v24 = vmax.f32 %v6872_v29, %v2857_v5 }
 0xf2a   : > { %v2832_v60 = vpop.permute.xlu0 %2831  ;;  %v2883_v45 = vsel %vm6730_vm10, %v2865_v41, %v2873_v24 }
 0xf2e   : > { %v2848_v50 = vpop.permute.xlu0 %2847 }
 0xf2f   : > { %v2859_v6 = vsel %vm4771_vm11, %v2832_v60, %v2848_v50 }
 0xf30   : > { %v2867_v42 = vmin.f32 %v6884_v35, %v2859_v6  ;;  %v2875_v46 = vmax.f32 %v6884_v35, %v2859_v6 }
 0xf32   : > { %v2846_v4 = vpop.permute.xlu0 %2845  ;;  %v2885_v38 = vsel %vm6730_vm10, %v2867_v42, %v2875_v46 }
 0xf33   : > { %v2858_v8 = vsel %vm4771_vm11, %v2830_v14, %v2846_v4 }
 0xf34   : > { %v2866_v9 = vmin.f32 %v6866_v15, %v2858_v8  ;;  %v2874_v10 = vmax.f32 %v6866_v15, %v2858_v8 }
 0xf36   : > { %v2884_v37 = vsel %vm6730_vm10, %v2866_v9, %v2874_v10  ;;  %v2892_v12 = vpop.permute.xlu0 %2891 }
 0xf37   : > { %2897 = vrot.lane.b32.xlu0 %v2884_v37, %s3951_s24 }
 0xf3a   : > { %v2908_v47 = vpop.permute.xlu0 %2907 }
 0xf3b   : > { %2895 = vrot.lane.b32.xlu0 %v2883_v45, %s3951_s24  ;;  %v2923_v51 = vsel %vm4564_vm6, %v2892_v12, %v2908_v47 }
 0xf3c   : > { %v2931_v22 = vmin.f32 %v6898_v36, %v2923_v51  ;;  %v2939_v15 = vmax.f32 %v6898_v36, %v2923_v51 }
 0xf3e   : > { %v2949_v29 = vsel %vm6832_vm12, %v2931_v22, %v2939_v15 }
 0xf3f   : > { %2911 = vrot.lane.b32.xlu0 %v2883_v45, %s3952_s25 }
 0xf43   : > { %2899 = vrot.lane.b32.xlu0 %v2885_v38, %s3951_s24  ;;  %s3886_s24 = sshll.u32 %s3960_s13, 4  ;;  %s3887_s24 = int_to_ptr.vmem [resolvable:$false] %s3886_s24 }
 0xf44   : > { %p3889_p0 = scmp.lt.s32.totalorder %s7127_s14, %s3887_s24 }
 0xf47   : > { %2915 = vrot.lane.b32.xlu0 %v2885_v38, %s3952_s25 }
 0xf4b   : > { %2913 = vrot.lane.b32.xlu0 %v2884_v37, %s3952_s25  ;;  %s3888_s25 = scalar_lea.vmem %s3887_s24, 256 }
 0xf4f   : > { %2959 = vrot.lane.b32.xlu0 %v2949_v29, %s3949_s22 }
 0xf53   : > { %2975 = vrot.lane.b32.xlu0 %v2949_v29, %s3950_s23 }
 0xf78   : > { %v2974_v44 = vpop.permute.xlu1 %2973 }
 0xf7c   : > { %v2972_v62 = vpop.permute.xlu1 %2971 }
 0xf80   : > { %v2988_v61 = vpop.permute.xlu1 %2987 }
 0xf81   : > { %v2997_v21 = vsel %vm4462_vm2, %v2972_v62, %v2988_v61 }
 0xf82   : > { %v3005_v13 = vmin.f32 %v6920_v3, %v2997_v21  ;;  %v3013_v56 = vmax.f32 %v6920_v3, %v2997_v21 }
 0xf84   : > { %v2990_v40 = vpop.permute.xlu1 %2989  ;;  %v7008_v53 = vsel %vm6936_vm13, %v3005_v13, %v3013_v56 }
 0xf85   : > { %v2998_v35 = vsel %vm4462_vm2, %v2974_v44, %v2990_v40 }
 0xf86   : > { %v3006_v55 = vmin.f32 %v6914_v59, %v2998_v35  ;;  %v3014_v52 = vmax.f32 %v6914_v59, %v2998_v35 }
 0xf88   : > { %v7002_v36 = vsel %vm6936_vm13, %v3006_v55, %v3014_v52  ;;  %v3030_v47 = vpop.permute.xlu1 %3029 }
 0xf89   : > { %3041 = vrot.lane.b32.xlu1 %v7002_v36, %s3947_s21 }
 0xf8c   : > { %v3046_v51 = vpop.permute.xlu1 %3045 }
 0xf8d   : > { %3039 = vrot.lane.b32.xlu1 %v7008_v53, %s3947_s21  ;;  %v3060_v55 = vsel %vm4458_vm1, %v3030_v47, %v3046_v51 }
 0xf90   : > { %v3038_v39 = vpop.permute.xlu1 %3037 }
 0xf91   : > { %3055 = vrot.lane.b32.xlu1 %v7008_v53, %s3946_s17 }
 0xf94   : > { %v3054_v15 = vpop.permute.xlu1 %3053 }
 0xf95   : > { %3057 = vrot.lane.b32.xlu1 %v7002_v36, %s3946_s17  ;;  %v3064_v35 = vsel %vm4458_vm1, %v3038_v39, %v3054_v15 }
 0xf96   : > { %v3072_v13 = vmin.f32 %v6954_v27, %v3064_v35  ;;  %v3080_v56 = vmax.f32 %v6954_v27, %v3064_v35 }
 0xfa9   : > { %v2898_v63 = vpop.permute.xlu0 %2897 }
 0xfad   : > { %v2896_v48 = vpop.permute.xlu0 %2895 }
 0xfb1   : > { %v2912_v33 = vpop.permute.xlu0 %2911 }
 0xfb2   : > { %v2925_v1 = vsel %vm4564_vm6, %v2896_v48, %v2912_v33 }
 0xfb3   : > { %v2933_v59 = vmin.f32 %v2883_v45, %v2925_v1  ;;  %v2941_v2 = vmax.f32 %v2883_v45, %v2925_v1 }
 0xfb5   : > { %v2900_v19 = vpop.permute.xlu0 %2899  ;;  %v2951_v16 = vsel %vm6832_vm12, %v2933_v59, %v2941_v2 }
 0xfb9   : > { %v2916_v58 = vpop.permute.xlu0 %2915 }
 0xfba   : > { %v2927_v25 = vsel %vm4564_vm6, %v2900_v19, %v2916_v58  ;;  %v3068_v19 = vmin.f32 %v6942_v28, %v3060_v55  ;;  %v3076_v58 = vmax.f32 %v6942_v28, %v3060_v55 }
 0xfbb   : > { %v2935_v23 = vmin.f32 %v2885_v38, %v2927_v25  ;;  %v2943_v49 = vmax.f32 %v2885_v38, %v2927_v25 }
 0xfbd   : > { %v2914_v54 = vpop.permute.xlu0 %2913  ;;  %v2953_v17 = vsel %vm6832_vm12, %v2935_v23, %v2943_v49 }
 0xfbe   : > { %v2926_v31 = vsel %vm4564_vm6, %v2898_v63, %v2914_v54 }
 0xfbf   : > { %v2934_v0 = vmin.f32 %v2884_v37, %v2926_v31  ;;  %v2942_v57 = vmax.f32 %v2884_v37, %v2926_v31 }
 0xfc1   : > { %v2952_v3 = vsel %vm6832_vm12, %v2934_v0, %v2942_v57  ;;  %v2960_v7 = vpop.permute.xlu0 %2959 }
 0xfc2   : > { %2965 = vrot.lane.b32.xlu0 %v2952_v3, %s3949_s22 }
 0xfc5   : > { %v2976_v18 = vpop.permute.xlu0 %2975 }
 0xfc6   : > { %2963 = vrot.lane.b32.xlu0 %v2951_v16, %s3949_s22  ;;  %v2991_v11 = vsel %vm4462_vm2, %v2960_v7, %v2976_v18 }
 0xfc7   : > { %v2999_v32 = vmin.f32 %v2949_v29, %v2991_v11  ;;  %v3007_v14 = vmax.f32 %v2949_v29, %v2991_v11 }
 0xfc9   : > { %v7038_v30 = vsel %vm6936_vm13, %v2999_v32, %v3007_v14 }
 0xfca   : > { %2979 = vrot.lane.b32.xlu0 %v2951_v16, %s3950_s23 }
 0xfce   : > { %2967 = vrot.lane.b32.xlu0 %v2953_v17, %s3949_s22  ;;  %s3106_s22 = scalar_lea.sflag [#allocation3], %s135_s5 }
 0xfd2   : > { %2983 = vrot.lane.b32.xlu0 %v2953_v17, %s3950_s23 }
 0xfd6   : > { %2981 = vrot.lane.b32.xlu0 %v2952_v3, %s3950_s23  ;;  %s3882_s23 = scalar_lea.vmem %s7127_s14, 128 }
 0xfd7   : > { %p3883_p11 = scmp.ne.s32.totalorder %s7127_s14, %s3882_s23  ;;  %p3890_p1 = scmp.lt.s32.totalorder %s3888_s25, %s3882_s23 }
 0xfd9   : > { %p3884_p12 = pnand %p3883_p11, %p4014_p5  ;;  %p3891_p2 = por %p3890_p1, %p3889_p0 }
 0xfda   : > { %3027 = vrot.lane.b32.xlu0 %v7038_v30, %s3947_s21 }
 0xfdb   : > { %p3885_p13 = pneg %p3884_p12 }
 0xfdd   : > { %p3892_p3 = pnand %p3891_p2, %p3885_p13 }
 0xfde   : > { %3043 = vrot.lane.b32.xlu0 %v7038_v30, %s3946_s17 }
 0xffb   : > { %v3042_v29 = vpop.permute.xlu1 %3041 }
 0xfff   : > { %v3040_v61 = vpop.permute.xlu1 %3039 }
0x1003   : > { %v3056_v21 = vpop.permute.xlu1 %3055 }
0x1004   : > { %v3065_v63 = vsel %vm4458_vm1, %v3040_v61, %v3056_v21 }
0x1005   : > { %v3073_v27 = vmin.f32 %v7008_v53, %v3065_v63  ;;  %v3081_v57 = vmax.f32 %v7008_v53, %v3065_v63 }
0x1007   : > { %v3058_v54 = vpop.permute.xlu1 %3057 }
0x1034   : > { %v2966_v43 = vpop.permute.xlu0 %2965 }
0x1038   : > { %v2964_v34 = vpop.permute.xlu0 %2963 }
0x103c   : > { %v2980_v60 = vpop.permute.xlu0 %2979 }
0x103d   : > { %v2993_v8 = vsel %vm4462_vm2, %v2964_v34, %v2980_v60 }
0x103e   : > { %v3001_v24 = vmin.f32 %v2951_v16, %v2993_v8  ;;  %v3009_v37 = vmax.f32 %v2951_v16, %v2993_v8  ;;  %v3066_v16 = vsel %vm4458_vm1, %v3042_v29, %v3058_v54 }
0x103f   : > { %v3074_v11 = vmin.f32 %v7002_v36, %v3066_v16  ;;  %v3082_v32 = vmax.f32 %v7002_v36, %v3066_v16 }
0x1040   : > { %v2968_v50 = vpop.permute.xlu0 %2967  ;;  %v3019_v6 = vsel %vm6936_vm13, %v3001_v24, %v3009_v37 }
0x1044   : > { %v2984_v4 = vpop.permute.xlu0 %2983 }
0x1045   : > { %v2995_v42 = vsel %vm4462_vm2, %v2968_v50, %v2984_v4 }
0x1046   : > { %v3003_v46 = vmin.f32 %v2953_v17, %v2995_v42  ;;  %v3011_v12 = vmax.f32 %v2953_v17, %v2995_v42 }
0x1048   : > { %v2982_v5 = vpop.permute.xlu0 %2981  ;;  %v3021_v38 = vsel %vm6936_vm13, %v3003_v46, %v3011_v12 }
0x1049   : > { %v2994_v9 = vsel %vm4462_vm2, %v2966_v43, %v2982_v5  ;;  %vm3025_vm2 = vmxor %vm3948_vm4, %vm4458_vm1 }
0x104a   : > { %v3002_v10 = vmin.f32 %v2952_v3, %v2994_v9  ;;  %v3010_v41 = vmax.f32 %v2952_v3, %v2994_v9  ;;  %vm7084_vm6 = vmxor %vm3025_vm2, %vm3948_vm4 }
0x104b   : > { %v3090_v59 = vsel %vm7084_vm6, %v3072_v13, %v3080_v56  ;;  %v3086_v23 = vsel %vm7084_vm6, %v3068_v19, %v3076_v58  ;;  %v3091_v18 = vsel %vm7084_vm6, %v3073_v27, %v3081_v57  ;;  %v3092_v9 = vsel %vm7084_vm6, %v3074_v11, %v3082_v32 }
0x104c   : > { %v7050_v45 = vsel %vm6936_vm13, %v3002_v10, %v3010_v41  ;;  %v3028_v22 = vpop.permute.xlu0 %3027  ;;  %v3094_v17 = vsub.f32 %v3086_v23, %v3090_v59 }
0x104d   : > { %3033 = vrot.lane.b32.xlu0 %v7050_v45, %s3947_s21 }
0x104e   : > { %v3098_v36 = vand.u32 2147483647, %v3094_v17 }
0x1050   : > { %v3044_v44 = vpop.permute.xlu0 %3043 }
0x1051   : > { %3031 = vrot.lane.b32.xlu0 %v3019_v6, %s3947_s21  ;;  %v3059_v33 = vsel %vm4458_vm1, %v3028_v22, %v3044_v44 }
0x1052   : > { %v3067_v2 = vmin.f32 %v7038_v30, %v3059_v33  ;;  %v3075_v3 = vmax.f32 %v7038_v30, %v3059_v33 }
0x1054   : > { %v3085_v14 = vsel %vm7084_vm6, %v3067_v2, %v3075_v3 }
0x1055   : > { %3047 = vrot.lane.b32.xlu0 %v3019_v6, %s3946_s17 }
0x1059   : > { %3035 = vrot.lane.b32.xlu0 %v3021_v38, %s3947_s21  ;;  %s7125_s21 = scalar_lea.hbm %s7171_s2, %s3186_s7 }
0x105d   : > { %3051 = vrot.lane.b32.xlu0 %v3021_v38, %s3946_s17 }
0x1061   : > { %3049 = vrot.lane.b32.xlu0 %v7050_v45, %s3946_s17 }
0x10bf   : > { %v3034_v62 = vpop.permute.xlu0 %3033 }
0x10c3   : > { %v3032_v40 = vpop.permute.xlu0 %3031 }
0x10c7   : > { %v3048_v20 = vpop.permute.xlu0 %3047 }
0x10c8   : > { %v3061_v52 = vsel %vm4458_vm1, %v3032_v40, %v3048_v20 }
0x10c9   : > { %v3069_v1 = vmin.f32 %v3019_v6, %v3061_v52  ;;  %v3077_v31 = vmax.f32 %v3019_v6, %v3061_v52 }
0x10cb   : > { %v3036_v48 = vpop.permute.xlu0 %3035  ;;  %v3087_v53 = vsel %vm7084_vm6, %v3069_v1, %v3077_v31 }
0x10cc   : > { %v3095_v34 = vsub.f32 %v3087_v53, %v3091_v18 }
0x10ce   : > { %v3099_v41 = vand.u32 2147483647, %v3095_v34 }
0x10cf   : > { %v3052_v28 = vpop.permute.xlu0 %3051 }
0x10d0   : > { %v3063_v25 = vsel %vm4458_vm1, %v3036_v48, %v3052_v28 }
0x10d1   : > { %v3071_v49 = vmin.f32 %v3021_v38, %v3063_v25  ;;  %v3079_v7 = vmax.f32 %v3021_v38, %v3063_v25 }
0x10d3   : > { %v3089_v30 = vsel %vm7084_vm6, %v3071_v49, %v3079_v7  ;;  %v3050_v43 = vpop.permute.xlu0 %3049 }
0x10d4   : > { %v3093_v60 = vsub.f32 %v3085_v14, %v3089_v30  ;;  %v3062_v50 = vsel %vm4458_vm1, %v3034_v62, %v3050_v43 }
0x10d5   : > { %v3070_v4 = vmin.f32 %v7050_v45, %v3062_v50  ;;  %v3078_v5 = vmax.f32 %v7050_v45, %v3062_v50 }
0x10d6   : > { %v3097_v8 = vand.u32 2147483647, %v3093_v60 }
0x10d7   : > { %v3088_v10 = vsel %vm7084_vm6, %v3070_v4, %v3078_v5 }
0x10d8   : > { %v3096_v24 = vsub.f32 %v3088_v10, %v3092_v9  ;;  %v3101_v37 = vadd.f32 %v3098_v36, %v3097_v8 }
0x10da   : > { %v3100_v26 = vand.u32 2147483647, %v3096_v24  ;;  %v3102_v6 = vadd.f32 %v3101_v37, %v3099_v41 }
0x10dc   : > { %v3103_v42 = vadd.f32 %v3102_v6, %v3100_v26 }
0x10de   : > { %3104 = vst [vmem:[%s137_s8] sm:$0xff] %v3103_v42 }
0x10df   : > { %3895 = shalt.err (!%p3892_p3)
}
0x10e0   : > { %s3896_s26 = scalar_lea.hbm %s7125_s21, 128  ;;  %s3900_s29 = scalar_lea.hbm %s7171_s2, 256 }
0x10e1   : > { %p3897_p4 = scmp.ne.s32.totalorder %s7125_s21, %s3896_s26  ;;  %p3901_p9 = scmp.lt.u32.totalorder %s7125_s21, %s7171_s2 }
0x10e2   : > { %p3902_p10 = scmp.lt.u32.totalorder %s3900_s29, %s3896_s26  ;;  %p3904_p12 = scmp.lt.u32.totalorder %s3896_s26, %s7125_s21 }
0x10e3   : > { %p3898_p7 = pnand %p3897_p4, %p4014_p5 }
0x10e4   : > { %p3903_p11 = por %p3902_p10, %p3901_p9 }
0x10e5   : > { %p3899_p8 = pneg %p3898_p7 }
0x10e6   : > { %p3905_p13 = por %p3904_p12, %p3903_p11 }
0x10e8   : > { %p3906_p0 = pnand %p3905_p13, %p3899_p8 }
0x10ea   : > { %3909 = shalt.err (!%p3906_p0)
}
0x10eb   : > { %3829 = dma.vmem_to_hbm [thread:$0]  (%p4014_p5), %s7127_s14, 128, %s7125_s21, %s3106_s22  }
0x10ec PF: > { %p3835_p1 = scmp.ge.s32.totalorder %s3944_s12, 2  ;;  %s3131_s4 = sand.u32 1, %s3932_s9  }
0x10ed   : > { %s3132_s5 = scalar_lea.sflag [#allocation3], %s3131_s4 }
0x10ee   : > { %p3832_p2 = pnand %p3835_p1, %p4018_p6 }
0x10f0   : > { %3927 = dma.done.wait (!%p3832_p2), %s3132_s5, 128  }
0x10f1   : > { %3929 = vsyncadd (!%p3832_p2), %s3132_s5, 4294967168  ;;  %p12_p3 = scmp.ge.s32.totalorder %s4001_s15, 4   ;;  %s7267_s9 = smov %s3936_s10 }
0x10f2   : > { %s7268_s10 = smov %s3940_s11  ;;  %s7269_s11 = smov %s4012_s18 }
0x10f3   : > { %s7270_s12 = smov %s4001_s15  ;;  %14 = sbr.rel (!%p12_p3) target bundleno = 3 (0x3), region = 63 }
0x10fa   :  { %3137 = vsyncpa [#allocation3], 1 }
0x10fb   :  { %3139 = vsyncpa [#allocation3 + $0x1], 1 }

</bundles_post_ra>
